<compile_context>
chip_gen: v5e
topology: v5e:2x2
jax: 0.10.0
libtpu: 0.0.40
codegen_flags: <defaults>
</compile_context>

<pallas_src>
import functools
import math

import jax
import jax.numpy as jnp
from jax.experimental import pallas as pl
from jax.experimental.pallas import tpu as pltpu


# ---------------------------------------------------------------------------
# VMEM budgeting (per generation) and batch-tile selection
# ---------------------------------------------------------------------------

def _vmem_limit_bytes():
    """Scoped-VMEM ceiling: 3/4 of physical, capped at 96 MiB (v5e/v6e have
    128 MiB physical, v7x only 64 MiB -> 48 MiB).  Falls back to a value that
    is safe on every generation if the hardware query is unavailable."""
    try:
        info = pltpu.get_tpu_info()
        phys = int(getattr(info, "vmem_capacity_bytes", 0) or 0)
        if phys > 0:
            return int(min((phys * 3) // 4, 96 * 1024 * 1024))
    except Exception:
        pass
    return 48 * 1024 * 1024


def _param_bytes(params):
    return sum(int(l.size) * l.dtype.itemsize
               for l in jax.tree_util.tree_leaves(params))


def _pick_batch_tile(B, S, dim, d_model, dim_ff, weight_bytes, vmem_limit):
    """Pick Bt (batch elements per grid step).  Several elements per step
    amortize the ~0.35us/step overhead and give the MXU a larger effective M;
    Bt is sized against the per-generation VMEM budget."""
    # crude per-batch-element activation footprint (f32 + bf16 temporaries)
    per_b = 8 * S * (dim + 12 * d_model + 2 * dim_ff + 2 * S) + 4096
    avail = vmem_limit - weight_bytes - (4 << 20)
    fit = max(1, avail // per_b)
    if fit >= B:
        return B, B                       # one grid step, block == full batch
    bt = max(8, (fit // 8) * 8)           # multiple of 8 keeps the (Bt, 1) output block legal
    b_pad = ((B + bt - 1) // bt) * bt
    return bt, b_pad


# ---------------------------------------------------------------------------
# Fused forward kernel: input MLP -> [encoder layers] -> mean-pool -> score
# One grid step processes a tile of Bt batch elements.
# ---------------------------------------------------------------------------

def _fused_forward_kernel(*refs, n_mlp, n_layers, nhead, eps):
    idx = 0
    x_ref = refs[idx]; idx += 1
    mlp_refs = refs[idx:idx + 2 * n_mlp]; idx += 2 * n_mlp
    layer_refs = []
    for _ in range(n_layers):
        layer_refs.append(refs[idx:idx + 12]); idx += 12
    sw_ref, sb_ref = refs[idx], refs[idx + 1]; idx += 2
    out_ref = refs[idx]

    Bt, S, dim = x_ref.shape
    h = x_ref[...].reshape(Bt * S, dim)                       # (Bt*S, dim) f32

    # ---- input MLP: Linear(+ReLU) chain on the flattened (Bt*S, dim) view ----
    for i in range(n_mlp):
        w = mlp_refs[2 * i][...]                              # (K, N) bf16
        b = mlp_refs[2 * i + 1][...]                          # (1, N) f32
        h = jnp.dot(h.astype(jnp.bfloat16), w,
                    preferred_element_type=jnp.float32) + b
        if i < n_mlp - 1:
            h = jnp.maximum(h, 0.0)

    D = h.shape[-1]
    Dh = D // nhead

    # ---- transformer encoder layers (post-LN), looped inside the kernel ----
    for _l in range(n_layers):
        (wqkv_ref, bqkv_ref, wo_ref, bo_ref, ln1g_ref, ln1b_ref,
         w1_ref, b1_ref, w2_ref, b2_ref, ln2g_ref, ln2b_ref) = layer_refs[_l]

        # fused QKV projection; 1/sqrt(Dh) is pre-folded into the q columns at
        # init, and qkv is cast to bf16 once (no per-head scale / narrow casts).
        qkv = jnp.dot(h.astype(jnp.bfloat16), wqkv_ref[...],
                      preferred_element_type=jnp.float32) + bqkv_ref[...]
        qkv = qkv.astype(jnp.bfloat16).reshape(Bt, S, 3 * D)

        # multi-head self-attention over the set axis; each head's output is
        # accumulated straight into the output projection (wo pre-split per
        # head), so there is no lane-axis concatenate.
        acc = jnp.zeros((Bt * S, D), jnp.float32)
        for hd in range(nhead):
            qh = qkv[:, :, hd * Dh:(hd + 1) * Dh]                        # (Bt,S,Dh)
            kh = qkv[:, :, D + hd * Dh:D + (hd + 1) * Dh]
            vh = qkv[:, :, 2 * D + hd * Dh:2 * D + (hd + 1) * Dh]
            s = jax.lax.dot_general(qh, kh, (((2,), (2,)), ((0,), (0,))),
                                    preferred_element_type=jnp.float32)  # (Bt,S,S)
            m = jnp.max(s, axis=-1, keepdims=True)
            p = jnp.exp(s - m)
            p = p * pl.reciprocal(jnp.sum(p, axis=-1, keepdims=True), approx=True)
            hh = jax.lax.dot_general(p.astype(jnp.bfloat16), vh,
                                     (((2,), (1,)), ((0,), (0,))),
                                     preferred_element_type=jnp.float32)  # (Bt,S,Dh)
            acc = acc + jnp.dot(hh.reshape(Bt * S, Dh).astype(jnp.bfloat16),
                                wo_ref[hd],
                                preferred_element_type=jnp.float32)
        attn = acc + bo_ref[...]

        # residual + LayerNorm 1 (post-LN, norm_first=False)
        h1 = h + attn
        mu = jnp.mean(h1, axis=-1, keepdims=True)
        var = jnp.mean(jnp.square(h1 - mu), axis=-1, keepdims=True)
        h1 = (h1 - mu) * jax.lax.rsqrt(var + eps) * ln1g_ref[...] + ln1b_ref[...]

        # feed-forward: Linear -> ReLU -> Linear
        ff = jnp.dot(h1.astype(jnp.bfloat16), w1_ref[...],
                     preferred_element_type=jnp.float32) + b1_ref[...]
        ff = jnp.maximum(ff, 0.0)
        ff = jnp.dot(ff.astype(jnp.bfloat16), w2_ref[...],
                     preferred_element_type=jnp.float32) + b2_ref[...]

        # residual + LayerNorm 2
        h2 = h1 + ff
        mu = jnp.mean(h2, axis=-1, keepdims=True)
        var = jnp.mean(jnp.square(h2 - mu), axis=-1, keepdims=True)
        h = (h2 - mu) * jax.lax.rsqrt(var + eps) * ln2g_ref[...] + ln2b_ref[...]

    # ---- mean-pool over the set axis (torch.mean(enc_out, dim=0)) + score ----
    pooled = jnp.mean(h.reshape(Bt, S, D), axis=1)                        # (Bt, D)
    sc = jnp.dot(pooled.astype(jnp.bfloat16), sw_ref[...],
                 preferred_element_type=jnp.float32) + sb_ref[...]        # (Bt, 1)
    out_ref[...] = sc.astype(out_ref.dtype)


# ---------------------------------------------------------------------------
# Wrapper: one pallas_call for the whole forward pass
# ---------------------------------------------------------------------------

def exchangeable_potential_forward(params, x, *, nhead):
    B, S, dim = x.shape
    mlp = params["mlp"]
    layers = params["encoder_layers"]
    n_layers = len(layers)
    # TODO(synk): num_layers=0 (pool directly after the MLP) is not supported by
    # this fused path; nn.TransformerEncoder is always used with >= 1 layer.
    assert n_layers >= 1
    d_model = layers[0]["wqkv"].shape[0]
    dim_ff = layers[0]["w1"].shape[1]

    vmem_limit = _vmem_limit_bytes()
    bt, b_pad = _pick_batch_tile(B, S, dim, d_model, dim_ff,
                                 _param_bytes(params), vmem_limit)
    if b_pad != B:
        # zero-pad the batch so every grid step sees a full, finite tile
        x = jnp.pad(x, ((0, b_pad - B), (0, 0), (0, 0)))

    # Weights / biases / LN params: whole-array, single-copy VMEM residents
    # (constant index -> no point double-buffering them).
    vmem_full = pl.BlockSpec(memory_space=pltpu.MemorySpace.VMEM)

    in_specs = [pl.BlockSpec((bt, S, dim), lambda i: (i, 0, 0))]          # x tile
    operands = [x]
    for (w, b) in mlp:
        in_specs += [vmem_full, vmem_full]
        operands += [w, b]
    layer_keys = ("wqkv", "bqkv", "wo", "bo", "ln1_g", "ln1_b",
                  "w1", "b1", "w2", "b2", "ln2_g", "ln2_b")
    for layer in layers:
        for name in layer_keys:
            in_specs.append(vmem_full)
            operands.append(layer[name])
    in_specs += [vmem_full, vmem_full]
    operands += [params["score_w"], params["score_b"]]

    # TODO(synk): with B == 1 on a dual-TensorCore chip (v7x) the single batch
    # grid axis leaves one core idle; a second parallel axis over S-tiles would
    # be needed to occupy it.
    scores = pl.pallas_call(
        functools.partial(_fused_forward_kernel, n_mlp=len(mlp),
                          n_layers=n_layers, nhead=nhead, eps=1e-5),
        grid=(b_pad // bt,),
        out_shape=jax.ShapeDtypeStruct((b_pad, 1), jnp.float32),
        in_specs=in_specs,
        out_specs=pl.BlockSpec((bt, 1), lambda i: (i, 0)),
        compiler_params=pltpu.CompilerParams(
            dimension_semantics=("parallel",),
            vmem_limit_bytes=vmem_limit),
    )(*operands)

    # self.score(self.pool(enc_out, dim=0)).squeeze(-1)
    return scores[:B, 0]                                                  # (B,)


# ---------------------------------------------------------------------------
# Parameters (deterministic init, same shapes the nn.Module __init__ implies;
# weights stored bf16 kernel-ready, biases / LN params in f32)
# ---------------------------------------------------------------------------

def _dense_init(key, fan_in, fan_out):
    kw, kb = jax.random.split(key)
    bound = 1.0 / (fan_in ** 0.5)
    w = jax.random.uniform(kw, (fan_in, fan_out), jnp.float32, -bound, bound)
    b = jax.random.uniform(kb, (fan_out,), jnp.float32, -bound, bound)
    return w, b


def init_params(key, dim, mlp_hidden_dims, d_model, nhead, dim_feedforward,
                num_layers=1):
    assert d_model % nhead == 0
    Dh = d_model // nhead
    scale = 1.0 / math.sqrt(Dh)
    params = {}
    keys = jax.random.split(key, 3)

    # Input MLP: dim -> hidden... -> d_model (ReLU between layers).
    mlp = []
    sizes = [dim] + list(mlp_hidden_dims) + [d_model]
    mkeys = jax.random.split(keys[0], len(sizes) - 1)
    for i in range(len(sizes) - 1):
        w, b = _dense_init(mkeys[i], sizes[i], sizes[i + 1])
        mlp.append((w.astype(jnp.bfloat16), b.reshape(1, -1)))
    params["mlp"] = mlp

    # Transformer encoder layers (post-LN, relu activation, dropout=0).
    layers = []
    lkeys = jax.random.split(keys[1], num_layers)
    for li in range(num_layers):
        k = jax.random.split(lkeys[li], 6)
        wq, bq = _dense_init(k[0], d_model, d_model)
        wk, bk = _dense_init(k[1], d_model, d_model)
        wv, bv = _dense_init(k[2], d_model, d_model)
        wo, bo = _dense_init(k[3], d_model, d_model)
        w1, b1 = _dense_init(k[4], d_model, dim_feedforward)
        w2, b2 = _dense_init(k[5], dim_feedforward, d_model)
        layers.append(dict(
            # 1/sqrt(Dh) folded into the q columns (weight AND bias).
            wqkv=jnp.concatenate([wq * scale, wk, wv], axis=1).astype(jnp.bfloat16),
            bqkv=jnp.concatenate([bq * scale, bk, bv]).reshape(1, -1),
            # wo pre-split per head: head outputs fold straight into the output
            # projection (no lane-axis concat in-kernel).
            wo=wo.reshape(nhead, Dh, d_model).astype(jnp.bfloat16),
            bo=bo.reshape(1, -1),
            w1=w1.astype(jnp.bfloat16), b1=b1.reshape(1, -1),
            w2=w2.astype(jnp.bfloat16), b2=b2.reshape(1, -1),
            ln1_g=jnp.ones((1, d_model), jnp.float32),
            ln1_b=jnp.zeros((1, d_model), jnp.float32),
            ln2_g=jnp.ones((1, d_model), jnp.float32),
            ln2_b=jnp.zeros((1, d_model), jnp.float32),
        ))
    params["encoder_layers"] = layers

    # Score head: MLP(d_model, 1, []) == single Linear(d_model, 1).
    sw, sb = _dense_init(keys[2], d_model, 1)
    params["score_w"] = sw.astype(jnp.bfloat16)
    params["score_b"] = sb.reshape(1, 1)
    return params


# ---------------------------------------------------------------------------

if __name__ == "__main__":
    key = jax.random.PRNGKey(0)
    B, S, dim = 2, 8, 16
    d_model, nhead, dim_feedforward = 32, 4, 64
    mlp_hidden_dims = [32]
    num_layers = 2

    kx, kp = jax.random.split(key)
    x = jax.random.normal(kx, (B, S, dim), jnp.float32)
    params = init_params(kp, dim, mlp_hidden_dims, d_model, nhead,
                         dim_feedforward, num_layers=num_layers)

    fwd = jax.jit(functools.partial(exchangeable_potential_forward, nhead=nhead))
    out = jax.block_until_ready(fwd(params, x))

    assert out.shape == (B,), out.shape
    assert bool(jnp.all(jnp.isfinite(out)))
    print("KERNEL_OK")
</pallas_src>

<mosaic_0001>
module attributes {stable_mosaic.version = 11 : i64} {
  func.func @_fused_forward_kernel(%arg0: i32, %arg1: memref<2x8x16xf32, #tpu.memory_space<vmem>>, %arg2: memref<16x32xbf16, #tpu.memory_space<vmem>>, %arg3: memref<1x32xf32, #tpu.memory_space<vmem>>, %arg4: memref<32x32xbf16, #tpu.memory_space<vmem>>, %arg5: memref<1x32xf32, #tpu.memory_space<vmem>>, %arg6: memref<32x96xbf16, #tpu.memory_space<vmem>>, %arg7: memref<1x96xf32, #tpu.memory_space<vmem>>, %arg8: memref<4x8x32xbf16, #tpu.memory_space<vmem>>, %arg9: memref<1x32xf32, #tpu.memory_space<vmem>>, %arg10: memref<1x32xf32, #tpu.memory_space<vmem>>, %arg11: memref<1x32xf32, #tpu.memory_space<vmem>>, %arg12: memref<32x64xbf16, #tpu.memory_space<vmem>>, %arg13: memref<1x64xf32, #tpu.memory_space<vmem>>, %arg14: memref<64x32xbf16, #tpu.memory_space<vmem>>, %arg15: memref<1x32xf32, #tpu.memory_space<vmem>>, %arg16: memref<1x32xf32, #tpu.memory_space<vmem>>, %arg17: memref<1x32xf32, #tpu.memory_space<vmem>>, %arg18: memref<32x96xbf16, #tpu.memory_space<vmem>>, %arg19: memref<1x96xf32, #tpu.memory_space<vmem>>, %arg20: memref<4x8x32xbf16, #tpu.memory_space<vmem>>, %arg21: memref<1x32xf32, #tpu.memory_space<vmem>>, %arg22: memref<1x32xf32, #tpu.memory_space<vmem>>, %arg23: memref<1x32xf32, #tpu.memory_space<vmem>>, %arg24: memref<32x64xbf16, #tpu.memory_space<vmem>>, %arg25: memref<1x64xf32, #tpu.memory_space<vmem>>, %arg26: memref<64x32xbf16, #tpu.memory_space<vmem>>, %arg27: memref<1x32xf32, #tpu.memory_space<vmem>>, %arg28: memref<1x32xf32, #tpu.memory_space<vmem>>, %arg29: memref<1x32xf32, #tpu.memory_space<vmem>>, %arg30: memref<32x1xbf16, #tpu.memory_space<vmem>>, %arg31: memref<1x1xf32, #tpu.memory_space<vmem>>, %arg32: memref<2x1xf32, #tpu.memory_space<vmem>>) attributes {dimension_semantics = [#tpu.dimension_semantics<parallel>], iteration_bounds = array<i64: 1>, scalar_prefetch = 0 : i64, scratch_operands = 0 : i64, tpu.core_type = #tpu.core_type<tc>, window_params = [{transform_indices = @transform_0, window_bounds = array<i64: 2, 8, 16>}, {pipeline_mode = #tpu.pipeline_mode<synchronous>, transform_indices = @transform_1, window_bounds = array<i64: 16, 32>}, {pipeline_mode = #tpu.pipeline_mode<synchronous>, transform_indices = @transform_2, window_bounds = array<i64: 1, 32>}, {pipeline_mode = #tpu.pipeline_mode<synchronous>, transform_indices = @transform_3, window_bounds = array<i64: 32, 32>}, {pipeline_mode = #tpu.pipeline_mode<synchronous>, transform_indices = @transform_4, window_bounds = array<i64: 1, 32>}, {pipeline_mode = #tpu.pipeline_mode<synchronous>, transform_indices = @transform_5, window_bounds = array<i64: 32, 96>}, {pipeline_mode = #tpu.pipeline_mode<synchronous>, transform_indices = @transform_6, window_bounds = array<i64: 1, 96>}, {pipeline_mode = #tpu.pipeline_mode<synchronous>, transform_indices = @transform_7, window_bounds = array<i64: 4, 8, 32>}, {pipeline_mode = #tpu.pipeline_mode<synchronous>, transform_indices = @transform_8, window_bounds = array<i64: 1, 32>}, {pipeline_mode = #tpu.pipeline_mode<synchronous>, transform_indices = @transform_9, window_bounds = array<i64: 1, 32>}, {pipeline_mode = #tpu.pipeline_mode<synchronous>, transform_indices = @transform_10, window_bounds = array<i64: 1, 32>}, {pipeline_mode = #tpu.pipeline_mode<synchronous>, transform_indices = @transform_11, window_bounds = array<i64: 32, 64>}, {pipeline_mode = #tpu.pipeline_mode<synchronous>, transform_indices = @transform_12, window_bounds = array<i64: 1, 64>}, {pipeline_mode = #tpu.pipeline_mode<synchronous>, transform_indices = @transform_13, window_bounds = array<i64: 64, 32>}, {pipeline_mode = #tpu.pipeline_mode<synchronous>, transform_indices = @transform_14, window_bounds = array<i64: 1, 32>}, {pipeline_mode = #tpu.pipeline_mode<synchronous>, transform_indices = @transform_15, window_bounds = array<i64: 1, 32>}, {pipeline_mode = #tpu.pipeline_mode<synchronous>, transform_indices = @transform_16, window_bounds = array<i64: 1, 32>}, {pipeline_mode = #tpu.pipeline_mode<synchronous>, transform_indices = @transform_17, window_bounds = array<i64: 32, 96>}, {pipeline_mode = #tpu.pipeline_mode<synchronous>, transform_indices = @transform_18, window_bounds = array<i64: 1, 96>}, {pipeline_mode = #tpu.pipeline_mode<synchronous>, transform_indices = @transform_19, window_bounds = array<i64: 4, 8, 32>}, {pipeline_mode = #tpu.pipeline_mode<synchronous>, transform_indices = @transform_20, window_bounds = array<i64: 1, 32>}, {pipeline_mode = #tpu.pipeline_mode<synchronous>, transform_indices = @transform_21, window_bounds = array<i64: 1, 32>}, {pipeline_mode = #tpu.pipeline_mode<synchronous>, transform_indices = @transform_22, window_bounds = array<i64: 1, 32>}, {pipeline_mode = #tpu.pipeline_mode<synchronous>, transform_indices = @transform_23, window_bounds = array<i64: 32, 64>}, {pipeline_mode = #tpu.pipeline_mode<synchronous>, transform_indices = @transform_24, window_bounds = array<i64: 1, 64>}, {pipeline_mode = #tpu.pipeline_mode<synchronous>, transform_indices = @transform_25, window_bounds = array<i64: 64, 32>}, {pipeline_mode = #tpu.pipeline_mode<synchronous>, transform_indices = @transform_26, window_bounds = array<i64: 1, 32>}, {pipeline_mode = #tpu.pipeline_mode<synchronous>, transform_indices = @transform_27, window_bounds = array<i64: 1, 32>}, {pipeline_mode = #tpu.pipeline_mode<synchronous>, transform_indices = @transform_28, window_bounds = array<i64: 1, 32>}, {pipeline_mode = #tpu.pipeline_mode<synchronous>, transform_indices = @transform_29, window_bounds = array<i64: 32, 1>}, {pipeline_mode = #tpu.pipeline_mode<synchronous>, transform_indices = @transform_30, window_bounds = array<i64: 1, 1>}, {transform_indices = @transform_31, window_bounds = array<i64: 2, 1>}]} {
    %c0 = arith.constant 0 : index
    %c0_0 = arith.constant 0 : index
    %c0_1 = arith.constant 0 : index
    %0 = vector.load %arg1[%c0, %c0_0, %c0_1] : memref<2x8x16xf32, #tpu.memory_space<vmem>>, vector<2x8x16xf32>
    %1 = vector.shape_cast %0 : vector<2x8x16xf32> to vector<16x16xf32>
    %c0_2 = arith.constant 0 : index
    %c0_3 = arith.constant 0 : index
    %2 = vector.load %arg2[%c0_2, %c0_3] : memref<16x32xbf16, #tpu.memory_space<vmem>>, vector<16x32xbf16>
    %c0_4 = arith.constant 0 : index
    %c0_5 = arith.constant 0 : index
    %3 = vector.load %arg3[%c0_4, %c0_5] : memref<1x32xf32, #tpu.memory_space<vmem>>, vector<1x32xf32>
    %4 = arith.truncf %1 : vector<16x16xf32> to vector<16x16xbf16>
    %cst = arith.constant dense<0.000000e+00> : vector<16x32xf32>
    %5 = tpu.matmul %4, %2, %cst {dimension_numbers = #tpu.dot_dimension_numbers<[1], [0], [0], [1], [0, 0, 1, 1], [], []>} : vector<16x16xbf16>, vector<16x32xbf16>, vector<16x32xf32> -> vector<16x32xf32>
    %6 = vector.broadcast %3 : vector<1x32xf32> to vector<16x32xf32>
    %7 = arith.addf %5, %6 : vector<16x32xf32>
    %cst_6 = arith.constant 0.000000e+00 : f32
    %8 = vector.broadcast %cst_6 : f32 to vector<16x32xf32>
    %9 = arith.maximumf %7, %8 : vector<16x32xf32>
    %c0_7 = arith.constant 0 : index
    %c0_8 = arith.constant 0 : index
    %10 = vector.load %arg4[%c0_7, %c0_8] : memref<32x32xbf16, #tpu.memory_space<vmem>>, vector<32x32xbf16>
    %c0_9 = arith.constant 0 : index
    %c0_10 = arith.constant 0 : index
    %11 = vector.load %arg5[%c0_9, %c0_10] : memref<1x32xf32, #tpu.memory_space<vmem>>, vector<1x32xf32>
    %12 = arith.truncf %9 : vector<16x32xf32> to vector<16x32xbf16>
    %cst_11 = arith.constant dense<0.000000e+00> : vector<16x32xf32>
    %13 = tpu.matmul %12, %10, %cst_11 {dimension_numbers = #tpu.dot_dimension_numbers<[1], [0], [0], [1], [0, 0, 1, 1], [], []>} : vector<16x32xbf16>, vector<32x32xbf16>, vector<16x32xf32> -> vector<16x32xf32>
    %14 = vector.broadcast %11 : vector<1x32xf32> to vector<16x32xf32>
    %15 = arith.addf %13, %14 : vector<16x32xf32>
    %16 = arith.truncf %15 : vector<16x32xf32> to vector<16x32xbf16>
    %c0_12 = arith.constant 0 : index
    %c0_13 = arith.constant 0 : index
    %17 = vector.load %arg6[%c0_12, %c0_13] : memref<32x96xbf16, #tpu.memory_space<vmem>>, vector<32x96xbf16>
    %cst_14 = arith.constant dense<0.000000e+00> : vector<16x96xf32>
    %18 = tpu.matmul %16, %17, %cst_14 {dimension_numbers = #tpu.dot_dimension_numbers<[1], [0], [0], [1], [0, 0, 1, 1], [], []>} : vector<16x32xbf16>, vector<32x96xbf16>, vector<16x96xf32> -> vector<16x96xf32>
    %c0_15 = arith.constant 0 : index
    %c0_16 = arith.constant 0 : index
    %19 = vector.load %arg7[%c0_15, %c0_16] : memref<1x96xf32, #tpu.memory_space<vmem>>, vector<1x96xf32>
    %20 = vector.broadcast %19 : vector<1x96xf32> to vector<16x96xf32>
    %21 = arith.addf %18, %20 : vector<16x96xf32>
    %22 = arith.truncf %21 : vector<16x96xf32> to vector<16x96xbf16>
    %23 = vector.shape_cast %22 : vector<16x96xbf16> to vector<2x8x96xbf16>
    %cst_17 = arith.constant 0.000000e+00 : f32
    %24 = vector.broadcast %cst_17 : f32 to vector<16x32xf32>
    %25 = vector.extract_strided_slice %23 {offsets = [0, 0, 0], sizes = [2, 8, 8], strides = [1, 1, 1]} : vector<2x8x96xbf16> to vector<2x8x8xbf16>
    %26 = vector.extract_strided_slice %23 {offsets = [0, 0, 32], sizes = [2, 8, 8], strides = [1, 1, 1]} : vector<2x8x96xbf16> to vector<2x8x8xbf16>
    %27 = vector.extract_strided_slice %23 {offsets = [0, 0, 64], sizes = [2, 8, 8], strides = [1, 1, 1]} : vector<2x8x96xbf16> to vector<2x8x8xbf16>
    %cst_18 = arith.constant dense<0.000000e+00> : vector<2x8x8xf32>
    %28 = tpu.matmul %25, %26, %cst_18 {dimension_numbers = #tpu.dot_dimension_numbers<[2], [2], [1], [1], [0, 0, 0, 1, 1, 1], [0], [0]>} : vector<2x8x8xbf16>, vector<2x8x8xbf16>, vector<2x8x8xf32> -> vector<2x8x8xf32>
    %cst_19 = arith.constant dense<0xFF800000> : vector<2x8xf32>
    %29 = vector.multi_reduction <maximumf>, %28, %cst_19 [2] : vector<2x8x8xf32> to vector<2x8xf32>
    %30 = vector.shape_cast %29 : vector<2x8xf32> to vector<2x8x1xf32>
    %31 = vector.broadcast %30 : vector<2x8x1xf32> to vector<2x8x8xf32>
    %32 = arith.subf %28, %31 : vector<2x8x8xf32>
    %33 = math.exp %32 : vector<2x8x8xf32>
    %cst_20 = arith.constant dense<0.000000e+00> : vector<2x8xf32>
    %34 = vector.multi_reduction <add>, %33, %cst_20 [2] : vector<2x8x8xf32> to vector<2x8xf32>
    %35 = vector.shape_cast %34 : vector<2x8xf32> to vector<2x8x1xf32>
    %36 = tpu.reciprocal %35 {approx = true} : vector<2x8x1xf32> -> vector<2x8x1xf32>
    %37 = vector.broadcast %36 : vector<2x8x1xf32> to vector<2x8x8xf32>
    %38 = arith.mulf %33, %37 : vector<2x8x8xf32>
    %39 = arith.truncf %38 : vector<2x8x8xf32> to vector<2x8x8xbf16>
    %cst_21 = arith.constant dense<0.000000e+00> : vector<2x8x8xf32>
    %40 = tpu.matmul %39, %27, %cst_21 {dimension_numbers = #tpu.dot_dimension_numbers<[2], [1], [1], [2], [0, 0, 0, 1, 1, 2], [0], [0]>} : vector<2x8x8xbf16>, vector<2x8x8xbf16>, vector<2x8x8xf32> -> vector<2x8x8xf32>
    %41 = vector.shape_cast %40 : vector<2x8x8xf32> to vector<16x8xf32>
    %42 = arith.truncf %41 : vector<16x8xf32> to vector<16x8xbf16>
    %c0_22 = arith.constant 0 : index
    %c0_23 = arith.constant 0 : index
    %c0_24 = arith.constant 0 : index
    %43 = vector.load %arg8[%c0_22, %c0_23, %c0_24] : memref<4x8x32xbf16, #tpu.memory_space<vmem>>, vector<1x8x32xbf16>
    %44 = vector.shape_cast %43 : vector<1x8x32xbf16> to vector<8x32xbf16>
    %cst_25 = arith.constant dense<0.000000e+00> : vector<16x32xf32>
    %45 = tpu.matmul %42, %44, %cst_25 {dimension_numbers = #tpu.dot_dimension_numbers<[1], [0], [0], [1], [0, 0, 1, 1], [], []>} : vector<16x8xbf16>, vector<8x32xbf16>, vector<16x32xf32> -> vector<16x32xf32>
    %46 = arith.addf %24, %45 : vector<16x32xf32>
    %47 = vector.extract_strided_slice %23 {offsets = [0, 0, 8], sizes = [2, 8, 8], strides = [1, 1, 1]} : vector<2x8x96xbf16> to vector<2x8x8xbf16>
    %48 = vector.extract_strided_slice %23 {offsets = [0, 0, 40], sizes = [2, 8, 8], strides = [1, 1, 1]} : vector<2x8x96xbf16> to vector<2x8x8xbf16>
    %49 = vector.extract_strided_slice %23 {offsets = [0, 0, 72], sizes = [2, 8, 8], strides = [1, 1, 1]} : vector<2x8x96xbf16> to vector<2x8x8xbf16>
    %cst_26 = arith.constant dense<0.000000e+00> : vector<2x8x8xf32>
    %50 = tpu.matmul %47, %48, %cst_26 {dimension_numbers = #tpu.dot_dimension_numbers<[2], [2], [1], [1], [0, 0, 0, 1, 1, 1], [0], [0]>} : vector<2x8x8xbf16>, vector<2x8x8xbf16>, vector<2x8x8xf32> -> vector<2x8x8xf32>
    %cst_27 = arith.constant dense<0xFF800000> : vector<2x8xf32>
    %51 = vector.multi_reduction <maximumf>, %50, %cst_27 [2] : vector<2x8x8xf32> to vector<2x8xf32>
    %52 = vector.shape_cast %51 : vector<2x8xf32> to vector<2x8x1xf32>
    %53 = vector.broadcast %52 : vector<2x8x1xf32> to vector<2x8x8xf32>
    %54 = arith.subf %50, %53 : vector<2x8x8xf32>
    %55 = math.exp %54 : vector<2x8x8xf32>
    %cst_28 = arith.constant dense<0.000000e+00> : vector<2x8xf32>
    %56 = vector.multi_reduction <add>, %55, %cst_28 [2] : vector<2x8x8xf32> to vector<2x8xf32>
    %57 = vector.shape_cast %56 : vector<2x8xf32> to vector<2x8x1xf32>
    %58 = tpu.reciprocal %57 {approx = true} : vector<2x8x1xf32> -> vector<2x8x1xf32>
    %59 = vector.broadcast %58 : vector<2x8x1xf32> to vector<2x8x8xf32>
    %60 = arith.mulf %55, %59 : vector<2x8x8xf32>
    %61 = arith.truncf %60 : vector<2x8x8xf32> to vector<2x8x8xbf16>
    %cst_29 = arith.constant dense<0.000000e+00> : vector<2x8x8xf32>
    %62 = tpu.matmul %61, %49, %cst_29 {dimension_numbers = #tpu.dot_dimension_numbers<[2], [1], [1], [2], [0, 0, 0, 1, 1, 2], [0], [0]>} : vector<2x8x8xbf16>, vector<2x8x8xbf16>, vector<2x8x8xf32> -> vector<2x8x8xf32>
    %63 = vector.shape_cast %62 : vector<2x8x8xf32> to vector<16x8xf32>
    %64 = arith.truncf %63 : vector<16x8xf32> to vector<16x8xbf16>
    %c1 = arith.constant 1 : index
    %c0_30 = arith.constant 0 : index
    %c0_31 = arith.constant 0 : index
    %65 = vector.load %arg8[%c1, %c0_30, %c0_31] : memref<4x8x32xbf16, #tpu.memory_space<vmem>>, vector<1x8x32xbf16>
    %66 = vector.shape_cast %65 : vector<1x8x32xbf16> to vector<8x32xbf16>
    %cst_32 = arith.constant dense<0.000000e+00> : vector<16x32xf32>
    %67 = tpu.matmul %64, %66, %cst_32 {dimension_numbers = #tpu.dot_dimension_numbers<[1], [0], [0], [1], [0, 0, 1, 1], [], []>} : vector<16x8xbf16>, vector<8x32xbf16>, vector<16x32xf32> -> vector<16x32xf32>
    %68 = arith.addf %46, %67 : vector<16x32xf32>
    %69 = vector.extract_strided_slice %23 {offsets = [0, 0, 16], sizes = [2, 8, 8], strides = [1, 1, 1]} : vector<2x8x96xbf16> to vector<2x8x8xbf16>
    %70 = vector.extract_strided_slice %23 {offsets = [0, 0, 48], sizes = [2, 8, 8], strides = [1, 1, 1]} : vector<2x8x96xbf16> to vector<2x8x8xbf16>
    %71 = vector.extract_strided_slice %23 {offsets = [0, 0, 80], sizes = [2, 8, 8], strides = [1, 1, 1]} : vector<2x8x96xbf16> to vector<2x8x8xbf16>
    %cst_33 = arith.constant dense<0.000000e+00> : vector<2x8x8xf32>
    %72 = tpu.matmul %69, %70, %cst_33 {dimension_numbers = #tpu.dot_dimension_numbers<[2], [2], [1], [1], [0, 0, 0, 1, 1, 1], [0], [0]>} : vector<2x8x8xbf16>, vector<2x8x8xbf16>, vector<2x8x8xf32> -> vector<2x8x8xf32>
    %cst_34 = arith.constant dense<0xFF800000> : vector<2x8xf32>
    %73 = vector.multi_reduction <maximumf>, %72, %cst_34 [2] : vector<2x8x8xf32> to vector<2x8xf32>
    %74 = vector.shape_cast %73 : vector<2x8xf32> to vector<2x8x1xf32>
    %75 = vector.broadcast %74 : vector<2x8x1xf32> to vector<2x8x8xf32>
    %76 = arith.subf %72, %75 : vector<2x8x8xf32>
    %77 = math.exp %76 : vector<2x8x8xf32>
    %cst_35 = arith.constant dense<0.000000e+00> : vector<2x8xf32>
    %78 = vector.multi_reduction <add>, %77, %cst_35 [2] : vector<2x8x8xf32> to vector<2x8xf32>
    %79 = vector.shape_cast %78 : vector<2x8xf32> to vector<2x8x1xf32>
    %80 = tpu.reciprocal %79 {approx = true} : vector<2x8x1xf32> -> vector<2x8x1xf32>
    %81 = vector.broadcast %80 : vector<2x8x1xf32> to vector<2x8x8xf32>
    %82 = arith.mulf %77, %81 : vector<2x8x8xf32>
    %83 = arith.truncf %82 : vector<2x8x8xf32> to vector<2x8x8xbf16>
    %cst_36 = arith.constant dense<0.000000e+00> : vector<2x8x8xf32>
    %84 = tpu.matmul %83, %71, %cst_36 {dimension_numbers = #tpu.dot_dimension_numbers<[2], [1], [1], [2], [0, 0, 0, 1, 1, 2], [0], [0]>} : vector<2x8x8xbf16>, vector<2x8x8xbf16>, vector<2x8x8xf32> -> vector<2x8x8xf32>
    %85 = vector.shape_cast %84 : vector<2x8x8xf32> to vector<16x8xf32>
    %86 = arith.truncf %85 : vector<16x8xf32> to vector<16x8xbf16>
    %c2 = arith.constant 2 : index
    %c0_37 = arith.constant 0 : index
    %c0_38 = arith.constant 0 : index
    %87 = vector.load %arg8[%c2, %c0_37, %c0_38] : memref<4x8x32xbf16, #tpu.memory_space<vmem>>, vector<1x8x32xbf16>
    %88 = vector.shape_cast %87 : vector<1x8x32xbf16> to vector<8x32xbf16>
    %cst_39 = arith.constant dense<0.000000e+00> : vector<16x32xf32>
    %89 = tpu.matmul %86, %88, %cst_39 {dimension_numbers = #tpu.dot_dimension_numbers<[1], [0], [0], [1], [0, 0, 1, 1], [], []>} : vector<16x8xbf16>, vector<8x32xbf16>, vector<16x32xf32> -> vector<16x32xf32>
    %90 = arith.addf %68, %89 : vector<16x32xf32>
    %91 = vector.extract_strided_slice %23 {offsets = [0, 0, 24], sizes = [2, 8, 8], strides = [1, 1, 1]} : vector<2x8x96xbf16> to vector<2x8x8xbf16>
    %92 = vector.extract_strided_slice %23 {offsets = [0, 0, 56], sizes = [2, 8, 8], strides = [1, 1, 1]} : vector<2x8x96xbf16> to vector<2x8x8xbf16>
    %93 = vector.extract_strided_slice %23 {offsets = [0, 0, 88], sizes = [2, 8, 8], strides = [1, 1, 1]} : vector<2x8x96xbf16> to vector<2x8x8xbf16>
    %cst_40 = arith.constant dense<0.000000e+00> : vector<2x8x8xf32>
    %94 = tpu.matmul %91, %92, %cst_40 {dimension_numbers = #tpu.dot_dimension_numbers<[2], [2], [1], [1], [0, 0, 0, 1, 1, 1], [0], [0]>} : vector<2x8x8xbf16>, vector<2x8x8xbf16>, vector<2x8x8xf32> -> vector<2x8x8xf32>
    %cst_41 = arith.constant dense<0xFF800000> : vector<2x8xf32>
    %95 = vector.multi_reduction <maximumf>, %94, %cst_41 [2] : vector<2x8x8xf32> to vector<2x8xf32>
    %96 = vector.shape_cast %95 : vector<2x8xf32> to vector<2x8x1xf32>
    %97 = vector.broadcast %96 : vector<2x8x1xf32> to vector<2x8x8xf32>
    %98 = arith.subf %94, %97 : vector<2x8x8xf32>
    %99 = math.exp %98 : vector<2x8x8xf32>
    %cst_42 = arith.constant dense<0.000000e+00> : vector<2x8xf32>
    %100 = vector.multi_reduction <add>, %99, %cst_42 [2] : vector<2x8x8xf32> to vector<2x8xf32>
    %101 = vector.shape_cast %100 : vector<2x8xf32> to vector<2x8x1xf32>
    %102 = tpu.reciprocal %101 {approx = true} : vector<2x8x1xf32> -> vector<2x8x1xf32>
    %103 = vector.broadcast %102 : vector<2x8x1xf32> to vector<2x8x8xf32>
    %104 = arith.mulf %99, %103 : vector<2x8x8xf32>
    %105 = arith.truncf %104 : vector<2x8x8xf32> to vector<2x8x8xbf16>
    %cst_43 = arith.constant dense<0.000000e+00> : vector<2x8x8xf32>
    %106 = tpu.matmul %105, %93, %cst_43 {dimension_numbers = #tpu.dot_dimension_numbers<[2], [1], [1], [2], [0, 0, 0, 1, 1, 2], [0], [0]>} : vector<2x8x8xbf16>, vector<2x8x8xbf16>, vector<2x8x8xf32> -> vector<2x8x8xf32>
    %107 = vector.shape_cast %106 : vector<2x8x8xf32> to vector<16x8xf32>
    %108 = arith.truncf %107 : vector<16x8xf32> to vector<16x8xbf16>
    %c3 = arith.constant 3 : index
    %c0_44 = arith.constant 0 : index
    %c0_45 = arith.constant 0 : index
    %109 = vector.load %arg8[%c3, %c0_44, %c0_45] : memref<4x8x32xbf16, #tpu.memory_space<vmem>>, vector<1x8x32xbf16>
    %110 = vector.shape_cast %109 : vector<1x8x32xbf16> to vector<8x32xbf16>
    %cst_46 = arith.constant dense<0.000000e+00> : vector<16x32xf32>
    %111 = tpu.matmul %108, %110, %cst_46 {dimension_numbers = #tpu.dot_dimension_numbers<[1], [0], [0], [1], [0, 0, 1, 1], [], []>} : vector<16x8xbf16>, vector<8x32xbf16>, vector<16x32xf32> -> vector<16x32xf32>
    %112 = arith.addf %90, %111 : vector<16x32xf32>
    %c0_47 = arith.constant 0 : index
    %c0_48 = arith.constant 0 : index
    %113 = vector.load %arg9[%c0_47, %c0_48] : memref<1x32xf32, #tpu.memory_space<vmem>>, vector<1x32xf32>
    %114 = vector.broadcast %113 : vector<1x32xf32> to vector<16x32xf32>
    %115 = arith.addf %112, %114 : vector<16x32xf32>
    %116 = arith.addf %15, %115 : vector<16x32xf32>
    %cst_49 = arith.constant dense<0.000000e+00> : vector<16xf32>
    %117 = vector.multi_reduction <add>, %116, %cst_49 [1] : vector<16x32xf32> to vector<16xf32>
    %118 = vector.shape_cast %117 : vector<16xf32> to vector<16x1xf32>
    %cst_50 = arith.constant 3.200000e+01 : f32
    %119 = vector.broadcast %cst_50 : f32 to vector<16x1xf32>
    %120 = arith.divf %118, %119 : vector<16x1xf32>
    %121 = vector.broadcast %120 : vector<16x1xf32> to vector<16x32xf32>
    %122 = arith.subf %116, %121 : vector<16x32xf32>
    %123 = arith.mulf %122, %122 : vector<16x32xf32>
    %cst_51 = arith.constant dense<0.000000e+00> : vector<16xf32>
    %124 = vector.multi_reduction <add>, %123, %cst_51 [1] : vector<16x32xf32> to vector<16xf32>
    %125 = vector.shape_cast %124 : vector<16xf32> to vector<16x1xf32>
    %cst_52 = arith.constant 3.200000e+01 : f32
    %126 = vector.broadcast %cst_52 : f32 to vector<16x1xf32>
    %127 = arith.divf %125, %126 : vector<16x1xf32>
    %128 = vector.broadcast %120 : vector<16x1xf32> to vector<16x32xf32>
    %129 = arith.subf %116, %128 : vector<16x32xf32>
    %cst_53 = arith.constant 9.99999974E-6 : f32
    %130 = vector.broadcast %cst_53 : f32 to vector<16x1xf32>
    %131 = arith.addf %127, %130 : vector<16x1xf32>
    %132 = math.rsqrt %131 : vector<16x1xf32>
    %133 = vector.broadcast %132 : vector<16x1xf32> to vector<16x32xf32>
    %134 = arith.mulf %129, %133 : vector<16x32xf32>
    %c0_54 = arith.constant 0 : index
    %c0_55 = arith.constant 0 : index
    %135 = vector.load %arg10[%c0_54, %c0_55] : memref<1x32xf32, #tpu.memory_space<vmem>>, vector<1x32xf32>
    %136 = vector.broadcast %135 : vector<1x32xf32> to vector<16x32xf32>
    %137 = arith.mulf %134, %136 : vector<16x32xf32>
    %c0_56 = arith.constant 0 : index
    %c0_57 = arith.constant 0 : index
    %138 = vector.load %arg11[%c0_56, %c0_57] : memref<1x32xf32, #tpu.memory_space<vmem>>, vector<1x32xf32>
    %139 = vector.broadcast %138 : vector<1x32xf32> to vector<16x32xf32>
    %140 = arith.addf %137, %139 : vector<16x32xf32>
    %141 = arith.truncf %140 : vector<16x32xf32> to vector<16x32xbf16>
    %c0_58 = arith.constant 0 : index
    %c0_59 = arith.constant 0 : index
    %142 = vector.load %arg12[%c0_58, %c0_59] : memref<32x64xbf16, #tpu.memory_space<vmem>>, vector<32x64xbf16>
    %cst_60 = arith.constant dense<0.000000e+00> : vector<16x64xf32>
    %143 = tpu.matmul %141, %142, %cst_60 {dimension_numbers = #tpu.dot_dimension_numbers<[1], [0], [0], [1], [0, 0, 1, 1], [], []>} : vector<16x32xbf16>, vector<32x64xbf16>, vector<16x64xf32> -> vector<16x64xf32>
    %c0_61 = arith.constant 0 : index
    %c0_62 = arith.constant 0 : index
    %144 = vector.load %arg13[%c0_61, %c0_62] : memref<1x64xf32, #tpu.memory_space<vmem>>, vector<1x64xf32>
    %145 = vector.broadcast %144 : vector<1x64xf32> to vector<16x64xf32>
    %146 = arith.addf %143, %145 : vector<16x64xf32>
    %cst_63 = arith.constant 0.000000e+00 : f32
    %147 = vector.broadcast %cst_63 : f32 to vector<16x64xf32>
    %148 = arith.maximumf %146, %147 : vector<16x64xf32>
    %149 = arith.truncf %148 : vector<16x64xf32> to vector<16x64xbf16>
    %c0_64 = arith.constant 0 : index
    %c0_65 = arith.constant 0 : index
    %150 = vector.load %arg14[%c0_64, %c0_65] : memref<64x32xbf16, #tpu.memory_space<vmem>>, vector<64x32xbf16>
    %cst_66 = arith.constant dense<0.000000e+00> : vector<16x32xf32>
    %151 = tpu.matmul %149, %150, %cst_66 {dimension_numbers = #tpu.dot_dimension_numbers<[1], [0], [0], [1], [0, 0, 1, 1], [], []>} : vector<16x64xbf16>, vector<64x32xbf16>, vector<16x32xf32> -> vector<16x32xf32>
    %c0_67 = arith.constant 0 : index
    %c0_68 = arith.constant 0 : index
    %152 = vector.load %arg15[%c0_67, %c0_68] : memref<1x32xf32, #tpu.memory_space<vmem>>, vector<1x32xf32>
    %153 = vector.broadcast %152 : vector<1x32xf32> to vector<16x32xf32>
    %154 = arith.addf %151, %153 : vector<16x32xf32>
    %155 = arith.addf %140, %154 : vector<16x32xf32>
    %cst_69 = arith.constant dense<0.000000e+00> : vector<16xf32>
    %156 = vector.multi_reduction <add>, %155, %cst_69 [1] : vector<16x32xf32> to vector<16xf32>
    %157 = vector.shape_cast %156 : vector<16xf32> to vector<16x1xf32>
    %cst_70 = arith.constant 3.200000e+01 : f32
    %158 = vector.broadcast %cst_70 : f32 to vector<16x1xf32>
    %159 = arith.divf %157, %158 : vector<16x1xf32>
    %160 = vector.broadcast %159 : vector<16x1xf32> to vector<16x32xf32>
    %161 = arith.subf %155, %160 : vector<16x32xf32>
    %162 = arith.mulf %161, %161 : vector<16x32xf32>
    %cst_71 = arith.constant dense<0.000000e+00> : vector<16xf32>
    %163 = vector.multi_reduction <add>, %162, %cst_71 [1] : vector<16x32xf32> to vector<16xf32>
    %164 = vector.shape_cast %163 : vector<16xf32> to vector<16x1xf32>
    %cst_72 = arith.constant 3.200000e+01 : f32
    %165 = vector.broadcast %cst_72 : f32 to vector<16x1xf32>
    %166 = arith.divf %164, %165 : vector<16x1xf32>
    %167 = vector.broadcast %159 : vector<16x1xf32> to vector<16x32xf32>
    %168 = arith.subf %155, %167 : vector<16x32xf32>
    %cst_73 = arith.constant 9.99999974E-6 : f32
    %169 = vector.broadcast %cst_73 : f32 to vector<16x1xf32>
    %170 = arith.addf %166, %169 : vector<16x1xf32>
    %171 = math.rsqrt %170 : vector<16x1xf32>
    %172 = vector.broadcast %171 : vector<16x1xf32> to vector<16x32xf32>
    %173 = arith.mulf %168, %172 : vector<16x32xf32>
    %c0_74 = arith.constant 0 : index
    %c0_75 = arith.constant 0 : index
    %174 = vector.load %arg16[%c0_74, %c0_75] : memref<1x32xf32, #tpu.memory_space<vmem>>, vector<1x32xf32>
    %175 = vector.broadcast %174 : vector<1x32xf32> to vector<16x32xf32>
    %176 = arith.mulf %173, %175 : vector<16x32xf32>
    %c0_76 = arith.constant 0 : index
    %c0_77 = arith.constant 0 : index
    %177 = vector.load %arg17[%c0_76, %c0_77] : memref<1x32xf32, #tpu.memory_space<vmem>>, vector<1x32xf32>
    %178 = vector.broadcast %177 : vector<1x32xf32> to vector<16x32xf32>
    %179 = arith.addf %176, %178 : vector<16x32xf32>
    %180 = arith.truncf %179 : vector<16x32xf32> to vector<16x32xbf16>
    %c0_78 = arith.constant 0 : index
    %c0_79 = arith.constant 0 : index
    %181 = vector.load %arg18[%c0_78, %c0_79] : memref<32x96xbf16, #tpu.memory_space<vmem>>, vector<32x96xbf16>
    %cst_80 = arith.constant dense<0.000000e+00> : vector<16x96xf32>
    %182 = tpu.matmul %180, %181, %cst_80 {dimension_numbers = #tpu.dot_dimension_numbers<[1], [0], [0], [1], [0, 0, 1, 1], [], []>} : vector<16x32xbf16>, vector<32x96xbf16>, vector<16x96xf32> -> vector<16x96xf32>
    %c0_81 = arith.constant 0 : index
    %c0_82 = arith.constant 0 : index
    %183 = vector.load %arg19[%c0_81, %c0_82] : memref<1x96xf32, #tpu.memory_space<vmem>>, vector<1x96xf32>
    %184 = vector.broadcast %183 : vector<1x96xf32> to vector<16x96xf32>
    %185 = arith.addf %182, %184 : vector<16x96xf32>
    %186 = arith.truncf %185 : vector<16x96xf32> to vector<16x96xbf16>
    %187 = vector.shape_cast %186 : vector<16x96xbf16> to vector<2x8x96xbf16>
    %cst_83 = arith.constant 0.000000e+00 : f32
    %188 = vector.broadcast %cst_83 : f32 to vector<16x32xf32>
    %189 = vector.extract_strided_slice %187 {offsets = [0, 0, 0], sizes = [2, 8, 8], strides = [1, 1, 1]} : vector<2x8x96xbf16> to vector<2x8x8xbf16>
    %190 = vector.extract_strided_slice %187 {offsets = [0, 0, 32], sizes = [2, 8, 8], strides = [1, 1, 1]} : vector<2x8x96xbf16> to vector<2x8x8xbf16>
    %191 = vector.extract_strided_slice %187 {offsets = [0, 0, 64], sizes = [2, 8, 8], strides = [1, 1, 1]} : vector<2x8x96xbf16> to vector<2x8x8xbf16>
    %cst_84 = arith.constant dense<0.000000e+00> : vector<2x8x8xf32>
    %192 = tpu.matmul %189, %190, %cst_84 {dimension_numbers = #tpu.dot_dimension_numbers<[2], [2], [1], [1], [0, 0, 0, 1, 1, 1], [0], [0]>} : vector<2x8x8xbf16>, vector<2x8x8xbf16>, vector<2x8x8xf32> -> vector<2x8x8xf32>
    %cst_85 = arith.constant dense<0xFF800000> : vector<2x8xf32>
    %193 = vector.multi_reduction <maximumf>, %192, %cst_85 [2] : vector<2x8x8xf32> to vector<2x8xf32>
    %194 = vector.shape_cast %193 : vector<2x8xf32> to vector<2x8x1xf32>
    %195 = vector.broadcast %194 : vector<2x8x1xf32> to vector<2x8x8xf32>
    %196 = arith.subf %192, %195 : vector<2x8x8xf32>
    %197 = math.exp %196 : vector<2x8x8xf32>
    %cst_86 = arith.constant dense<0.000000e+00> : vector<2x8xf32>
    %198 = vector.multi_reduction <add>, %197, %cst_86 [2] : vector<2x8x8xf32> to vector<2x8xf32>
    %199 = vector.shape_cast %198 : vector<2x8xf32> to vector<2x8x1xf32>
    %200 = tpu.reciprocal %199 {approx = true} : vector<2x8x1xf32> -> vector<2x8x1xf32>
    %201 = vector.broadcast %200 : vector<2x8x1xf32> to vector<2x8x8xf32>
    %202 = arith.mulf %197, %201 : vector<2x8x8xf32>
    %203 = arith.truncf %202 : vector<2x8x8xf32> to vector<2x8x8xbf16>
    %cst_87 = arith.constant dense<0.000000e+00> : vector<2x8x8xf32>
    %204 = tpu.matmul %203, %191, %cst_87 {dimension_numbers = #tpu.dot_dimension_numbers<[2], [1], [1], [2], [0, 0, 0, 1, 1, 2], [0], [0]>} : vector<2x8x8xbf16>, vector<2x8x8xbf16>, vector<2x8x8xf32> -> vector<2x8x8xf32>
    %205 = vector.shape_cast %204 : vector<2x8x8xf32> to vector<16x8xf32>
    %206 = arith.truncf %205 : vector<16x8xf32> to vector<16x8xbf16>
    %c0_88 = arith.constant 0 : index
    %c0_89 = arith.constant 0 : index
    %c0_90 = arith.constant 0 : index
    %207 = vector.load %arg20[%c0_88, %c0_89, %c0_90] : memref<4x8x32xbf16, #tpu.memory_space<vmem>>, vector<1x8x32xbf16>
    %208 = vector.shape_cast %207 : vector<1x8x32xbf16> to vector<8x32xbf16>
    %cst_91 = arith.constant dense<0.000000e+00> : vector<16x32xf32>
    %209 = tpu.matmul %206, %208, %cst_91 {dimension_numbers = #tpu.dot_dimension_numbers<[1], [0], [0], [1], [0, 0, 1, 1], [], []>} : vector<16x8xbf16>, vector<8x32xbf16>, vector<16x32xf32> -> vector<16x32xf32>
    %210 = arith.addf %188, %209 : vector<16x32xf32>
    %211 = vector.extract_strided_slice %187 {offsets = [0, 0, 8], sizes = [2, 8, 8], strides = [1, 1, 1]} : vector<2x8x96xbf16> to vector<2x8x8xbf16>
    %212 = vector.extract_strided_slice %187 {offsets = [0, 0, 40], sizes = [2, 8, 8], strides = [1, 1, 1]} : vector<2x8x96xbf16> to vector<2x8x8xbf16>
    %213 = vector.extract_strided_slice %187 {offsets = [0, 0, 72], sizes = [2, 8, 8], strides = [1, 1, 1]} : vector<2x8x96xbf16> to vector<2x8x8xbf16>
    %cst_92 = arith.constant dense<0.000000e+00> : vector<2x8x8xf32>
    %214 = tpu.matmul %211, %212, %cst_92 {dimension_numbers = #tpu.dot_dimension_numbers<[2], [2], [1], [1], [0, 0, 0, 1, 1, 1], [0], [0]>} : vector<2x8x8xbf16>, vector<2x8x8xbf16>, vector<2x8x8xf32> -> vector<2x8x8xf32>
    %cst_93 = arith.constant dense<0xFF800000> : vector<2x8xf32>
    %215 = vector.multi_reduction <maximumf>, %214, %cst_93 [2] : vector<2x8x8xf32> to vector<2x8xf32>
    %216 = vector.shape_cast %215 : vector<2x8xf32> to vector<2x8x1xf32>
    %217 = vector.broadcast %216 : vector<2x8x1xf32> to vector<2x8x8xf32>
    %218 = arith.subf %214, %217 : vector<2x8x8xf32>
    %219 = math.exp %218 : vector<2x8x8xf32>
    %cst_94 = arith.constant dense<0.000000e+00> : vector<2x8xf32>
    %220 = vector.multi_reduction <add>, %219, %cst_94 [2] : vector<2x8x8xf32> to vector<2x8xf32>
    %221 = vector.shape_cast %220 : vector<2x8xf32> to vector<2x8x1xf32>
    %222 = tpu.reciprocal %221 {approx = true} : vector<2x8x1xf32> -> vector<2x8x1xf32>
    %223 = vector.broadcast %222 : vector<2x8x1xf32> to vector<2x8x8xf32>
    %224 = arith.mulf %219, %223 : vector<2x8x8xf32>
    %225 = arith.truncf %224 : vector<2x8x8xf32> to vector<2x8x8xbf16>
    %cst_95 = arith.constant dense<0.000000e+00> : vector<2x8x8xf32>
    %226 = tpu.matmul %225, %213, %cst_95 {dimension_numbers = #tpu.dot_dimension_numbers<[2], [1], [1], [2], [0, 0, 0, 1, 1, 2], [0], [0]>} : vector<2x8x8xbf16>, vector<2x8x8xbf16>, vector<2x8x8xf32> -> vector<2x8x8xf32>
    %227 = vector.shape_cast %226 : vector<2x8x8xf32> to vector<16x8xf32>
    %228 = arith.truncf %227 : vector<16x8xf32> to vector<16x8xbf16>
    %c1_96 = arith.constant 1 : index
    %c0_97 = arith.constant 0 : index
    %c0_98 = arith.constant 0 : index
    %229 = vector.load %arg20[%c1_96, %c0_97, %c0_98] : memref<4x8x32xbf16, #tpu.memory_space<vmem>>, vector<1x8x32xbf16>
    %230 = vector.shape_cast %229 : vector<1x8x32xbf16> to vector<8x32xbf16>
    %cst_99 = arith.constant dense<0.000000e+00> : vector<16x32xf32>
    %231 = tpu.matmul %228, %230, %cst_99 {dimension_numbers = #tpu.dot_dimension_numbers<[1], [0], [0], [1], [0, 0, 1, 1], [], []>} : vector<16x8xbf16>, vector<8x32xbf16>, vector<16x32xf32> -> vector<16x32xf32>
    %232 = arith.addf %210, %231 : vector<16x32xf32>
    %233 = vector.extract_strided_slice %187 {offsets = [0, 0, 16], sizes = [2, 8, 8], strides = [1, 1, 1]} : vector<2x8x96xbf16> to vector<2x8x8xbf16>
    %234 = vector.extract_strided_slice %187 {offsets = [0, 0, 48], sizes = [2, 8, 8], strides = [1, 1, 1]} : vector<2x8x96xbf16> to vector<2x8x8xbf16>
    %235 = vector.extract_strided_slice %187 {offsets = [0, 0, 80], sizes = [2, 8, 8], strides = [1, 1, 1]} : vector<2x8x96xbf16> to vector<2x8x8xbf16>
    %cst_100 = arith.constant dense<0.000000e+00> : vector<2x8x8xf32>
    %236 = tpu.matmul %233, %234, %cst_100 {dimension_numbers = #tpu.dot_dimension_numbers<[2], [2], [1], [1], [0, 0, 0, 1, 1, 1], [0], [0]>} : vector<2x8x8xbf16>, vector<2x8x8xbf16>, vector<2x8x8xf32> -> vector<2x8x8xf32>
    %cst_101 = arith.constant dense<0xFF800000> : vector<2x8xf32>
    %237 = vector.multi_reduction <maximumf>, %236, %cst_101 [2] : vector<2x8x8xf32> to vector<2x8xf32>
    %238 = vector.shape_cast %237 : vector<2x8xf32> to vector<2x8x1xf32>
    %239 = vector.broadcast %238 : vector<2x8x1xf32> to vector<2x8x8xf32>
    %240 = arith.subf %236, %239 : vector<2x8x8xf32>
    %241 = math.exp %240 : vector<2x8x8xf32>
    %cst_102 = arith.constant dense<0.000000e+00> : vector<2x8xf32>
    %242 = vector.multi_reduction <add>, %241, %cst_102 [2] : vector<2x8x8xf32> to vector<2x8xf32>
    %243 = vector.shape_cast %242 : vector<2x8xf32> to vector<2x8x1xf32>
    %244 = tpu.reciprocal %243 {approx = true} : vector<2x8x1xf32> -> vector<2x8x1xf32>
    %245 = vector.broadcast %244 : vector<2x8x1xf32> to vector<2x8x8xf32>
    %246 = arith.mulf %241, %245 : vector<2x8x8xf32>
    %247 = arith.truncf %246 : vector<2x8x8xf32> to vector<2x8x8xbf16>
    %cst_103 = arith.constant dense<0.000000e+00> : vector<2x8x8xf32>
    %248 = tpu.matmul %247, %235, %cst_103 {dimension_numbers = #tpu.dot_dimension_numbers<[2], [1], [1], [2], [0, 0, 0, 1, 1, 2], [0], [0]>} : vector<2x8x8xbf16>, vector<2x8x8xbf16>, vector<2x8x8xf32> -> vector<2x8x8xf32>
    %249 = vector.shape_cast %248 : vector<2x8x8xf32> to vector<16x8xf32>
    %250 = arith.truncf %249 : vector<16x8xf32> to vector<16x8xbf16>
    %c2_104 = arith.constant 2 : index
    %c0_105 = arith.constant 0 : index
    %c0_106 = arith.constant 0 : index
    %251 = vector.load %arg20[%c2_104, %c0_105, %c0_106] : memref<4x8x32xbf16, #tpu.memory_space<vmem>>, vector<1x8x32xbf16>
    %252 = vector.shape_cast %251 : vector<1x8x32xbf16> to vector<8x32xbf16>
    %cst_107 = arith.constant dense<0.000000e+00> : vector<16x32xf32>
    %253 = tpu.matmul %250, %252, %cst_107 {dimension_numbers = #tpu.dot_dimension_numbers<[1], [0], [0], [1], [0, 0, 1, 1], [], []>} : vector<16x8xbf16>, vector<8x32xbf16>, vector<16x32xf32> -> vector<16x32xf32>
    %254 = arith.addf %232, %253 : vector<16x32xf32>
    %255 = vector.extract_strided_slice %187 {offsets = [0, 0, 24], sizes = [2, 8, 8], strides = [1, 1, 1]} : vector<2x8x96xbf16> to vector<2x8x8xbf16>
    %256 = vector.extract_strided_slice %187 {offsets = [0, 0, 56], sizes = [2, 8, 8], strides = [1, 1, 1]} : vector<2x8x96xbf16> to vector<2x8x8xbf16>
    %257 = vector.extract_strided_slice %187 {offsets = [0, 0, 88], sizes = [2, 8, 8], strides = [1, 1, 1]} : vector<2x8x96xbf16> to vector<2x8x8xbf16>
    %cst_108 = arith.constant dense<0.000000e+00> : vector<2x8x8xf32>
    %258 = tpu.matmul %255, %256, %cst_108 {dimension_numbers = #tpu.dot_dimension_numbers<[2], [2], [1], [1], [0, 0, 0, 1, 1, 1], [0], [0]>} : vector<2x8x8xbf16>, vector<2x8x8xbf16>, vector<2x8x8xf32> -> vector<2x8x8xf32>
    %cst_109 = arith.constant dense<0xFF800000> : vector<2x8xf32>
    %259 = vector.multi_reduction <maximumf>, %258, %cst_109 [2] : vector<2x8x8xf32> to vector<2x8xf32>
    %260 = vector.shape_cast %259 : vector<2x8xf32> to vector<2x8x1xf32>
    %261 = vector.broadcast %260 : vector<2x8x1xf32> to vector<2x8x8xf32>
    %262 = arith.subf %258, %261 : vector<2x8x8xf32>
    %263 = math.exp %262 : vector<2x8x8xf32>
    %cst_110 = arith.constant dense<0.000000e+00> : vector<2x8xf32>
    %264 = vector.multi_reduction <add>, %263, %cst_110 [2] : vector<2x8x8xf32> to vector<2x8xf32>
    %265 = vector.shape_cast %264 : vector<2x8xf32> to vector<2x8x1xf32>
    %266 = tpu.reciprocal %265 {approx = true} : vector<2x8x1xf32> -> vector<2x8x1xf32>
    %267 = vector.broadcast %266 : vector<2x8x1xf32> to vector<2x8x8xf32>
    %268 = arith.mulf %263, %267 : vector<2x8x8xf32>
    %269 = arith.truncf %268 : vector<2x8x8xf32> to vector<2x8x8xbf16>
    %cst_111 = arith.constant dense<0.000000e+00> : vector<2x8x8xf32>
    %270 = tpu.matmul %269, %257, %cst_111 {dimension_numbers = #tpu.dot_dimension_numbers<[2], [1], [1], [2], [0, 0, 0, 1, 1, 2], [0], [0]>} : vector<2x8x8xbf16>, vector<2x8x8xbf16>, vector<2x8x8xf32> -> vector<2x8x8xf32>
    %271 = vector.shape_cast %270 : vector<2x8x8xf32> to vector<16x8xf32>
    %272 = arith.truncf %271 : vector<16x8xf32> to vector<16x8xbf16>
    %c3_112 = arith.constant 3 : index
    %c0_113 = arith.constant 0 : index
    %c0_114 = arith.constant 0 : index
    %273 = vector.load %arg20[%c3_112, %c0_113, %c0_114] : memref<4x8x32xbf16, #tpu.memory_space<vmem>>, vector<1x8x32xbf16>
    %274 = vector.shape_cast %273 : vector<1x8x32xbf16> to vector<8x32xbf16>
    %cst_115 = arith.constant dense<0.000000e+00> : vector<16x32xf32>
    %275 = tpu.matmul %272, %274, %cst_115 {dimension_numbers = #tpu.dot_dimension_numbers<[1], [0], [0], [1], [0, 0, 1, 1], [], []>} : vector<16x8xbf16>, vector<8x32xbf16>, vector<16x32xf32> -> vector<16x32xf32>
    %276 = arith.addf %254, %275 : vector<16x32xf32>
    %c0_116 = arith.constant 0 : index
    %c0_117 = arith.constant 0 : index
    %277 = vector.load %arg21[%c0_116, %c0_117] : memref<1x32xf32, #tpu.memory_space<vmem>>, vector<1x32xf32>
    %278 = vector.broadcast %277 : vector<1x32xf32> to vector<16x32xf32>
    %279 = arith.addf %276, %278 : vector<16x32xf32>
    %280 = arith.addf %179, %279 : vector<16x32xf32>
    %cst_118 = arith.constant dense<0.000000e+00> : vector<16xf32>
    %281 = vector.multi_reduction <add>, %280, %cst_118 [1] : vector<16x32xf32> to vector<16xf32>
    %282 = vector.shape_cast %281 : vector<16xf32> to vector<16x1xf32>
    %cst_119 = arith.constant 3.200000e+01 : f32
    %283 = vector.broadcast %cst_119 : f32 to vector<16x1xf32>
    %284 = arith.divf %282, %283 : vector<16x1xf32>
    %285 = vector.broadcast %284 : vector<16x1xf32> to vector<16x32xf32>
    %286 = arith.subf %280, %285 : vector<16x32xf32>
    %287 = arith.mulf %286, %286 : vector<16x32xf32>
    %cst_120 = arith.constant dense<0.000000e+00> : vector<16xf32>
    %288 = vector.multi_reduction <add>, %287, %cst_120 [1] : vector<16x32xf32> to vector<16xf32>
    %289 = vector.shape_cast %288 : vector<16xf32> to vector<16x1xf32>
    %cst_121 = arith.constant 3.200000e+01 : f32
    %290 = vector.broadcast %cst_121 : f32 to vector<16x1xf32>
    %291 = arith.divf %289, %290 : vector<16x1xf32>
    %292 = vector.broadcast %284 : vector<16x1xf32> to vector<16x32xf32>
    %293 = arith.subf %280, %292 : vector<16x32xf32>
    %cst_122 = arith.constant 9.99999974E-6 : f32
    %294 = vector.broadcast %cst_122 : f32 to vector<16x1xf32>
    %295 = arith.addf %291, %294 : vector<16x1xf32>
    %296 = math.rsqrt %295 : vector<16x1xf32>
    %297 = vector.broadcast %296 : vector<16x1xf32> to vector<16x32xf32>
    %298 = arith.mulf %293, %297 : vector<16x32xf32>
    %c0_123 = arith.constant 0 : index
    %c0_124 = arith.constant 0 : index
    %299 = vector.load %arg22[%c0_123, %c0_124] : memref<1x32xf32, #tpu.memory_space<vmem>>, vector<1x32xf32>
    %300 = vector.broadcast %299 : vector<1x32xf32> to vector<16x32xf32>
    %301 = arith.mulf %298, %300 : vector<16x32xf32>
    %c0_125 = arith.constant 0 : index
    %c0_126 = arith.constant 0 : index
    %302 = vector.load %arg23[%c0_125, %c0_126] : memref<1x32xf32, #tpu.memory_space<vmem>>, vector<1x32xf32>
    %303 = vector.broadcast %302 : vector<1x32xf32> to vector<16x32xf32>
    %304 = arith.addf %301, %303 : vector<16x32xf32>
    %305 = arith.truncf %304 : vector<16x32xf32> to vector<16x32xbf16>
    %c0_127 = arith.constant 0 : index
    %c0_128 = arith.constant 0 : index
    %306 = vector.load %arg24[%c0_127, %c0_128] : memref<32x64xbf16, #tpu.memory_space<vmem>>, vector<32x64xbf16>
    %cst_129 = arith.constant dense<0.000000e+00> : vector<16x64xf32>
    %307 = tpu.matmul %305, %306, %cst_129 {dimension_numbers = #tpu.dot_dimension_numbers<[1], [0], [0], [1], [0, 0, 1, 1], [], []>} : vector<16x32xbf16>, vector<32x64xbf16>, vector<16x64xf32> -> vector<16x64xf32>
    %c0_130 = arith.constant 0 : index
    %c0_131 = arith.constant 0 : index
    %308 = vector.load %arg25[%c0_130, %c0_131] : memref<1x64xf32, #tpu.memory_space<vmem>>, vector<1x64xf32>
    %309 = vector.broadcast %308 : vector<1x64xf32> to vector<16x64xf32>
    %310 = arith.addf %307, %309 : vector<16x64xf32>
    %cst_132 = arith.constant 0.000000e+00 : f32
    %311 = vector.broadcast %cst_132 : f32 to vector<16x64xf32>
    %312 = arith.maximumf %310, %311 : vector<16x64xf32>
    %313 = arith.truncf %312 : vector<16x64xf32> to vector<16x64xbf16>
    %c0_133 = arith.constant 0 : index
    %c0_134 = arith.constant 0 : index
    %314 = vector.load %arg26[%c0_133, %c0_134] : memref<64x32xbf16, #tpu.memory_space<vmem>>, vector<64x32xbf16>
    %cst_135 = arith.constant dense<0.000000e+00> : vector<16x32xf32>
    %315 = tpu.matmul %313, %314, %cst_135 {dimension_numbers = #tpu.dot_dimension_numbers<[1], [0], [0], [1], [0, 0, 1, 1], [], []>} : vector<16x64xbf16>, vector<64x32xbf16>, vector<16x32xf32> -> vector<16x32xf32>
    %c0_136 = arith.constant 0 : index
    %c0_137 = arith.constant 0 : index
    %316 = vector.load %arg27[%c0_136, %c0_137] : memref<1x32xf32, #tpu.memory_space<vmem>>, vector<1x32xf32>
    %317 = vector.broadcast %316 : vector<1x32xf32> to vector<16x32xf32>
    %318 = arith.addf %315, %317 : vector<16x32xf32>
    %319 = arith.addf %304, %318 : vector<16x32xf32>
    %cst_138 = arith.constant dense<0.000000e+00> : vector<16xf32>
    %320 = vector.multi_reduction <add>, %319, %cst_138 [1] : vector<16x32xf32> to vector<16xf32>
    %321 = vector.shape_cast %320 : vector<16xf32> to vector<16x1xf32>
    %cst_139 = arith.constant 3.200000e+01 : f32
    %322 = vector.broadcast %cst_139 : f32 to vector<16x1xf32>
    %323 = arith.divf %321, %322 : vector<16x1xf32>
    %324 = vector.broadcast %323 : vector<16x1xf32> to vector<16x32xf32>
    %325 = arith.subf %319, %324 : vector<16x32xf32>
    %326 = arith.mulf %325, %325 : vector<16x32xf32>
    %cst_140 = arith.constant dense<0.000000e+00> : vector<16xf32>
    %327 = vector.multi_reduction <add>, %326, %cst_140 [1] : vector<16x32xf32> to vector<16xf32>
    %328 = vector.shape_cast %327 : vector<16xf32> to vector<16x1xf32>
    %cst_141 = arith.constant 3.200000e+01 : f32
    %329 = vector.broadcast %cst_141 : f32 to vector<16x1xf32>
    %330 = arith.divf %328, %329 : vector<16x1xf32>
    %331 = vector.broadcast %323 : vector<16x1xf32> to vector<16x32xf32>
    %332 = arith.subf %319, %331 : vector<16x32xf32>
    %cst_142 = arith.constant 9.99999974E-6 : f32
    %333 = vector.broadcast %cst_142 : f32 to vector<16x1xf32>
    %334 = arith.addf %330, %333 : vector<16x1xf32>
    %335 = math.rsqrt %334 : vector<16x1xf32>
    %336 = vector.broadcast %335 : vector<16x1xf32> to vector<16x32xf32>
    %337 = arith.mulf %332, %336 : vector<16x32xf32>
    %c0_143 = arith.constant 0 : index
    %c0_144 = arith.constant 0 : index
    %338 = vector.load %arg28[%c0_143, %c0_144] : memref<1x32xf32, #tpu.memory_space<vmem>>, vector<1x32xf32>
    %339 = vector.broadcast %338 : vector<1x32xf32> to vector<16x32xf32>
    %340 = arith.mulf %337, %339 : vector<16x32xf32>
    %c0_145 = arith.constant 0 : index
    %c0_146 = arith.constant 0 : index
    %341 = vector.load %arg29[%c0_145, %c0_146] : memref<1x32xf32, #tpu.memory_space<vmem>>, vector<1x32xf32>
    %342 = vector.broadcast %341 : vector<1x32xf32> to vector<16x32xf32>
    %343 = arith.addf %340, %342 : vector<16x32xf32>
    %344 = vector.shape_cast %343 : vector<16x32xf32> to vector<2x8x32xf32>
    %cst_147 = arith.constant dense<0.000000e+00> : vector<2x32xf32>
    %345 = vector.multi_reduction <add>, %344, %cst_147 [1] : vector<2x8x32xf32> to vector<2x32xf32>
    %cst_148 = arith.constant 8.000000e+00 : f32
    %346 = vector.broadcast %cst_148 : f32 to vector<2x32xf32>
    %347 = arith.divf %345, %346 : vector<2x32xf32>
    %348 = arith.truncf %347 : vector<2x32xf32> to vector<2x32xbf16>
    %c0_149 = arith.constant 0 : index
    %c0_150 = arith.constant 0 : index
    %349 = vector.load %arg30[%c0_149, %c0_150] : memref<32x1xbf16, #tpu.memory_space<vmem>>, vector<32x1xbf16>
    %cst_151 = arith.constant dense<0.000000e+00> : vector<2x1xf32>
    %350 = tpu.matmul %348, %349, %cst_151 {dimension_numbers = #tpu.dot_dimension_numbers<[1], [0], [0], [1], [0, 0, 1, 1], [], []>} : vector<2x32xbf16>, vector<32x1xbf16>, vector<2x1xf32> -> vector<2x1xf32>
    %c0_152 = arith.constant 0 : index
    %c0_153 = arith.constant 0 : index
    %351 = vector.load %arg31[%c0_152, %c0_153] : memref<1x1xf32, #tpu.memory_space<vmem>>, vector<1x1xf32>
    %352 = vector.broadcast %351 : vector<1x1xf32> to vector<2x1xf32>
    %353 = arith.addf %350, %352 : vector<2x1xf32>
    %c0_154 = arith.constant 0 : index
    %c0_155 = arith.constant 0 : index
    %354 = vector.load %arg32[%c0_154, %c0_155] : memref<2x1xf32, #tpu.memory_space<vmem>>, vector<2x1xf32>
    tpu.vector_store %arg32[%c0_154, %c0_155], %353 {strides = array<i32>} : memref<2x1xf32, #tpu.memory_space<vmem>>, vector<2x1xf32>,
    return
  }
  func.func @transform_0(%arg0: i32) -> (i32, i32, i32) {
    %c0_i32 = arith.constant 0 : i32
    %c0_i32_0 = arith.constant 0 : i32
    %c0_i32_1 = arith.constant 0 : i32
    return %arg0, %c0_i32, %c0_i32_0 : i32, i32, i32
  }
  func.func @transform_1(%arg0: i32) -> (i32, i32) {
    %c0_i32 = arith.constant 0 : i32
    %c0_i32_0 = arith.constant 0 : i32
    %c0_i32_1 = arith.constant 0 : i32
    return %c0_i32, %c0_i32_0 : i32, i32
  }
  func.func @transform_2(%arg0: i32) -> (i32, i32) {
    %c0_i32 = arith.constant 0 : i32
    %c0_i32_0 = arith.constant 0 : i32
    %c0_i32_1 = arith.constant 0 : i32
    return %c0_i32, %c0_i32_0 : i32, i32
  }
  func.func @transform_3(%arg0: i32) -> (i32, i32) {
    %c0_i32 = arith.constant 0 : i32
    %c0_i32_0 = arith.constant 0 : i32
    %c0_i32_1 = arith.constant 0 : i32
    return %c0_i32, %c0_i32_0 : i32, i32
  }
  func.func @transform_4(%arg0: i32) -> (i32, i32) {
    %c0_i32 = arith.constant 0 : i32
    %c0_i32_0 = arith.constant 0 : i32
    %c0_i32_1 = arith.constant 0 : i32
    return %c0_i32, %c0_i32_0 : i32, i32
  }
  func.func @transform_5(%arg0: i32) -> (i32, i32) {
    %c0_i32 = arith.constant 0 : i32
    %c0_i32_0 = arith.constant 0 : i32
    %c0_i32_1 = arith.constant 0 : i32
    return %c0_i32, %c0_i32_0 : i32, i32
  }
  func.func @transform_6(%arg0: i32) -> (i32, i32) {
    %c0_i32 = arith.constant 0 : i32
    %c0_i32_0 = arith.constant 0 : i32
    %c0_i32_1 = arith.constant 0 : i32
    return %c0_i32, %c0_i32_0 : i32, i32
  }
  func.func @transform_7(%arg0: i32) -> (i32, i32, i32) {
    %c0_i32 = arith.constant 0 : i32
    %c0_i32_0 = arith.constant 0 : i32
    %c0_i32_1 = arith.constant 0 : i32
    %c0_i32_2 = arith.constant 0 : i32
    return %c0_i32, %c0_i32_0, %c0_i32_1 : i32, i32, i32
  }
  func.func @transform_8(%arg0: i32) -> (i32, i32) {
    %c0_i32 = arith.constant 0 : i32
    %c0_i32_0 = arith.constant 0 : i32
    %c0_i32_1 = arith.constant 0 : i32
    return %c0_i32, %c0_i32_0 : i32, i32
  }
  func.func @transform_9(%arg0: i32) -> (i32, i32) {
    %c0_i32 = arith.constant 0 : i32
    %c0_i32_0 = arith.constant 0 : i32
    %c0_i32_1 = arith.constant 0 : i32
    return %c0_i32, %c0_i32_0 : i32, i32
  }
  func.func @transform_10(%arg0: i32) -> (i32, i32) {
    %c0_i32 = arith.constant 0 : i32
    %c0_i32_0 = arith.constant 0 : i32
    %c0_i32_1 = arith.constant 0 : i32
    return %c0_i32, %c0_i32_0 : i32, i32
  }
  func.func @transform_11(%arg0: i32) -> (i32, i32) {
    %c0_i32 = arith.constant 0 : i32
    %c0_i32_0 = arith.constant 0 : i32
    %c0_i32_1 = arith.constant 0 : i32
    return %c0_i32, %c0_i32_0 : i32, i32
  }
  func.func @transform_12(%arg0: i32) -> (i32, i32) {
    %c0_i32 = arith.constant 0 : i32
    %c0_i32_0 = arith.constant 0 : i32
    %c0_i32_1 = arith.constant 0 : i32
    return %c0_i32, %c0_i32_0 : i32, i32
  }
  func.func @transform_13(%arg0: i32) -> (i32, i32) {
    %c0_i32 = arith.constant 0 : i32
    %c0_i32_0 = arith.constant 0 : i32
    %c0_i32_1 = arith.constant 0 : i32
    return %c0_i32, %c0_i32_0 : i32, i32
  }
  func.func @transform_14(%arg0: i32) -> (i32, i32) {
    %c0_i32 = arith.constant 0 : i32
    %c0_i32_0 = arith.constant 0 : i32
    %c0_i32_1 = arith.constant 0 : i32
    return %c0_i32, %c0_i32_0 : i32, i32
  }
  func.func @transform_15(%arg0: i32) -> (i32, i32) {
    %c0_i32 = arith.constant 0 : i32
    %c0_i32_0 = arith.constant 0 : i32
    %c0_i32_1 = arith.constant 0 : i32
    return %c0_i32, %c0_i32_0 : i32, i32
  }
  func.func @transform_16(%arg0: i32) -> (i32, i32) {
    %c0_i32 = arith.constant 0 : i32
    %c0_i32_0 = arith.constant 0 : i32
    %c0_i32_1 = arith.constant 0 : i32
    return %c0_i32, %c0_i32_0 : i32, i32
  }
  func.func @transform_17(%arg0: i32) -> (i32, i32) {
    %c0_i32 = arith.constant 0 : i32
    %c0_i32_0 = arith.constant 0 : i32
    %c0_i32_1 = arith.constant 0 : i32
    return %c0_i32, %c0_i32_0 : i32, i32
  }
  func.func @transform_18(%arg0: i32) -> (i32, i32) {
    %c0_i32 = arith.constant 0 : i32
    %c0_i32_0 = arith.constant 0 : i32
    %c0_i32_1 = arith.constant 0 : i32
    return %c0_i32, %c0_i32_0 : i32, i32
  }
  func.func @transform_19(%arg0: i32) -> (i32, i32, i32) {
    %c0_i32 = arith.constant 0 : i32
    %c0_i32_0 = arith.constant 0 : i32
    %c0_i32_1 = arith.constant 0 : i32
    %c0_i32_2 = arith.constant 0 : i32
    return %c0_i32, %c0_i32_0, %c0_i32_1 : i32, i32, i32
  }
  func.func @transform_20(%arg0: i32) -> (i32, i32) {
    %c0_i32 = arith.constant 0 : i32
    %c0_i32_0 = arith.constant 0 : i32
    %c0_i32_1 = arith.constant 0 : i32
    return %c0_i32, %c0_i32_0 : i32, i32
  }
  func.func @transform_21(%arg0: i32) -> (i32, i32) {
    %c0_i32 = arith.constant 0 : i32
    %c0_i32_0 = arith.constant 0 : i32
    %c0_i32_1 = arith.constant 0 : i32
    return %c0_i32, %c0_i32_0 : i32, i32
  }
  func.func @transform_22(%arg0: i32) -> (i32, i32) {
    %c0_i32 = arith.constant 0 : i32
    %c0_i32_0 = arith.constant 0 : i32
    %c0_i32_1 = arith.constant 0 : i32
    return %c0_i32, %c0_i32_0 : i32, i32
  }
  func.func @transform_23(%arg0: i32) -> (i32, i32) {
    %c0_i32 = arith.constant 0 : i32
    %c0_i32_0 = arith.constant 0 : i32
    %c0_i32_1 = arith.constant 0 : i32
    return %c0_i32, %c0_i32_0 : i32, i32
  }
  func.func @transform_24(%arg0: i32) -> (i32, i32) {
    %c0_i32 = arith.constant 0 : i32
    %c0_i32_0 = arith.constant 0 : i32
    %c0_i32_1 = arith.constant 0 : i32
    return %c0_i32, %c0_i32_0 : i32, i32
  }
  func.func @transform_25(%arg0: i32) -> (i32, i32) {
    %c0_i32 = arith.constant 0 : i32
    %c0_i32_0 = arith.constant 0 : i32
    %c0_i32_1 = arith.constant 0 : i32
    return %c0_i32, %c0_i32_0 : i32, i32
  }
  func.func @transform_26(%arg0: i32) -> (i32, i32) {
    %c0_i32 = arith.constant 0 : i32
    %c0_i32_0 = arith.constant 0 : i32
    %c0_i32_1 = arith.constant 0 : i32
    return %c0_i32, %c0_i32_0 : i32, i32
  }
  func.func @transform_27(%arg0: i32) -> (i32, i32) {
    %c0_i32 = arith.constant 0 : i32
    %c0_i32_0 = arith.constant 0 : i32
    %c0_i32_1 = arith.constant 0 : i32
    return %c0_i32, %c0_i32_0 : i32, i32
  }
  func.func @transform_28(%arg0: i32) -> (i32, i32) {
    %c0_i32 = arith.constant 0 : i32
    %c0_i32_0 = arith.constant 0 : i32
    %c0_i32_1 = arith.constant 0 : i32
    return %c0_i32, %c0_i32_0 : i32, i32
  }
  func.func @transform_29(%arg0: i32) -> (i32, i32) {
    %c0_i32 = arith.constant 0 : i32
    %c0_i32_0 = arith.constant 0 : i32
    %c0_i32_1 = arith.constant 0 : i32
    return %c0_i32, %c0_i32_0 : i32, i32
  }
  func.func @transform_30(%arg0: i32) -> (i32, i32) {
    %c0_i32 = arith.constant 0 : i32
    %c0_i32_0 = arith.constant 0 : i32
    %c0_i32_1 = arith.constant 0 : i32
    return %c0_i32, %c0_i32_0 : i32, i32
  }
  func.func @transform_31(%arg0: i32) -> (i32, i32) {
    %c0_i32 = arith.constant 0 : i32
    %c0_i32_0 = arith.constant 0 : i32
    return %arg0, %c0_i32 : i32, i32
  }
}

</mosaic_0001>

<bundles_post_ra>
// kernel: exchangeable_potential_forward.1
= control target key start
LH: loop header
LB: loop body
LE: loop exit
PB: predicated region body
PF: predicated region fallthrough
CT: control target
= control target key end

     0   :  { %s2957_s6 = smov 1   ;;  %s2958_s10 = smov 2   ;;  %s3572_s0 = inlined_call_operand.smem [shape: u32[32], index: -1, kind: input, shape index: {}] }
   0x1   :  { %s3028_s5 = sld [smem:[%s3572_s0]]   ;;  %s2959_s14 = smov 3  }
   0x2   :  { %s3033_s9 = sld [smem:[%s3572_s0 + %s2957_s6]]   ;;  %s2960_s18 = smov 4  }
   0x3   :  { %s3038_s13 = sld [smem:[%s3572_s0 + %s2958_s10]]   ;;  %s2961_s22 = smov 5  }
   0x4   :  { %s3043_s17 = sld [smem:[%s3572_s0 + %s2959_s14]]   ;;  %s2962_s26 = smov 6  }
   0x5   :  { %s3048_s21 = sld [smem:[%s3572_s0 + %s2960_s18]]   ;;  %s2963_s30 = smov 7  }
   0x6   :  { %s3053_s25 = sld [smem:[%s3572_s0 + %s2961_s22]]   ;;  %s2964_s4 = smov 8  }
   0x7   :  { %3584 = sst [smem:[#allocation41_spill]] %s3028_s5  ;;  %s2965_s10 = smov 9  }
   0x8   :  { %3585 = sst [smem:[#allocation42_spill]] %s3033_s9  ;;  %s2966_s15 = smov 10  }
   0x9   :  { %3586 = sst [smem:[#allocation43_spill]] %s3038_s13  ;;  %s2967_s20 = smov 11  }
   0xa   :  { %3587 = sst [smem:[#allocation44_spill]] %s3043_s17  ;;  %s2969_s1 = smov 13  }
   0xb   :  { %3588 = sst [smem:[#allocation45_spill]] %s3048_s21  ;;  %s2970_s7 = smov 14  }
   0xc   :  { %3589 = sst [smem:[#allocation46_spill]] %s3053_s25  ;;  %s2972_s22 = smov 16  }
   0xd   :  { %s3058_s29 = sld [smem:[%s3572_s0 + %s2962_s26]]   ;;  %s2968_s26 = smov 12  }
   0xe   :  { %s3063_s3 = sld [smem:[%s3572_s0 + %s2963_s30]]   ;;  %s2973_s28 = smov 17  }
   0xf   :  { %s3068_s8 = sld [smem:[%s3572_s0 + %s2964_s4]]   ;;  %s2987_s16 = smov 31  }
  0x10   :  { %s3073_s14 = sld [smem:[%s3572_s0 + %s2965_s10]]  }
  0x11   :  { %s3078_s19 = sld [smem:[%s3572_s0 + %s2966_s15]]   ;;  %s2971_s15 = smov 15  }
  0x12   :  { %s3083_s24 = sld [smem:[%s3572_s0 + %s2967_s20]]  }
  0x13   :  { %s3088_s30 = sld [smem:[%s3572_s0 + %s2968_s26]]  }
  0x14   :  { %3590 = sst [smem:[#allocation47_spill]] %s3063_s3 }
  0x15   :  { %s3093_s6 = sld [smem:[%s3572_s0 + %s2969_s1]]  }
  0x16   :  { %s3098_s12 = sld [smem:[%s3572_s0 + %s2970_s7]]   ;;  %s2974_s7 = smov 18  }
  0x17   :  { %s3103_s20 = sld [smem:[%s3572_s0 + %s2971_s15]]   ;;  %s2975_s15 = smov 19  }
  0x18   :  { %3591 = sst [smem:[#allocation48_spill]] %s3083_s24 }
  0x19   :  { %s3108_s27 = sld [smem:[%s3572_s0 + %s2972_s22]]   ;;  %s2976_s22 = smov 20  }
  0x1a   :  { %s3113_s4 = sld [smem:[%s3572_s0 + %s2973_s28]]   ;;  %s2977_s28 = smov 21  }
  0x1b   :  { %3592 = sst [smem:[#allocation49_spill]] %s3093_s6 }
  0x1c   :  { %s3118_s6 = sld [smem:[%s3572_s0 + %s2974_s7]]   ;;  %s2978_s7 = smov 22  }
  0x1d   :  { %s3123_s24 = sld [smem:[%s3572_s0 + %s2975_s15]]   ;;  %s2979_s15 = smov 23  }
  0x1e   :  { %s3128_s3 = sld [smem:[%s3572_s0 + %s2976_s22]]   ;;  %s2980_s22 = smov 24  }
  0x1f   :  { %s3138_s21 = sld [smem:[%s3572_s0 + %s2978_s7]]   ;;  %s2982_s7 = smov 26  }
  0x20   :  { %3593 = sst [smem:[#allocation50_spill]] %s3113_s4 }
  0x21   :  { %s3133_s4 = sld [smem:[%s3572_s0 + %s2977_s28]]   ;;  %s2981_s28 = smov 25  }
  0x22   :  { %s3143_s25 = sld [smem:[%s3572_s0 + %s2979_s15]]   ;;  %s2983_s15 = smov 27  }
  0x23   :  { %s3148_s13 = sld [smem:[%s3572_s0 + %s2980_s22]]   ;;  %s2984_s22 = smov 28  }
  0x24   :  { %s3153_s17 = sld [smem:[%s3572_s0 + %s2981_s28]]   ;;  %s2985_s28 = smov 29  }
  0x25   :  { %3594 = sst [smem:[#allocation51_spill]] %s3138_s21 }
  0x26   :  { %s3158_s5 = sld [smem:[%s3572_s0 + %s2982_s7]]   ;;  %s2986_s7 = smov 30  }
  0x27   :  { %s3163_s9 = sld [smem:[%s3572_s0 + %s2983_s15]]  }
  0x28   :  { %s2180_s21 = sld [smem:[%s3572_s0 + %s2986_s7]]  }
  0x29   :  { %3595 = sst [smem:[#allocation52_spill]] %s3148_s13 }
  0x2a   :  { %3596 = sst [smem:[#allocation53_spill]] %s3153_s17 }
  0x2b   :  { %s3168_s13 = sld [smem:[%s3572_s0 + %s2984_s22]]  }
  0x2c   :  { %s3173_s17 = sld [smem:[%s3572_s0 + %s2985_s28]]  }
  0x2d   :  { %3597 = sst [smem:[#allocation54_spill]] %s3163_s9 }
  0x2e   :  { %s3181_s9 = sld [smem:[%s3572_s0 + %s2987_s16]]   ;;  %v68_v0 = vstv %s2180_s21 }
  0x2f   :  { %69 = vst [vmem:[#allocation2] sm:$0x1] %v68_v0 }
  0x30   :  { %70 = vsyncpa [#allocation4], 0 }
  0x31   :  { %71 = vsyncpa [#allocation6], 0 }
  0x32   :  { %72 = vsyncpa [#allocation9], 0 }
  0x33   :  { %73 = vsyncpa [#allocation12], 0 }
  0x34   :  { %74 = vsyncpa [#allocation15], 0 }
  0x35   :  { %75 = vsyncpa [#allocation18], 0 }
  0x36   :  { %76 = vsyncpa [#allocation21], 0 }
  0x37   :  { %77 = vsyncpa [#allocation24], 0 }
  0x38   :  { %78 = vsyncpa [#allocation27], 0  ;;  %s110_s22 = sshll.u32 %s3068_s8, 4  ;;  %s111_s22 = int_to_ptr.hbm [resolvable:$true] %s110_s22 }
  0x39   :  { %79 = vsyncpa [#allocation30], 0  ;;  %s2988_s0 = smov [#allocation5]   ;;  %s132_s21 = sshll.u32 %s3078_s19, 4  ;;  %s133_s21 = int_to_ptr.hbm [resolvable:$true] %s132_s21 }
  0x3a   :  { %s112_s23 = sshll.u32 %s2988_s0, 4  ;;  %s2505_s26 = sshra.s32 %s111_s22, 4  ;;  %s113_s23 = int_to_ptr.vmem [resolvable:$true] %s112_s23  ;;  %s2506_s26 = int_to_ptr.hbm [resolvable:$true] %s2505_s26 }
  0x3b   :  { %s2507_s28 = scalar_lea.hbm %s2506_s26, 1  ;;  %s2509_s1 = scalar_lea.hbm %s3068_s8, 1 }
  0x3c   :  { %p2508_p0 = scmp.ne.s32.totalorder %s2506_s26, %s2507_s28  ;;  %p2510_p1 = scmp.lt.s32.totalorder %s2506_s26, %s3068_s8 }
  0x3d   :  { %p2511_p2 = scmp.lt.s32.totalorder %s2509_s1, %s2507_s28 }
  0x3f   :  { %p2512_p3 = por %p2511_p2, %p2510_p1 }
  0x41   :  { %p2513_p4 = pnand %p2512_p3, %p2508_p0 }
  0x43   :  { %2516 = shalt.err (!%p2513_p4)
}
  0x44   :  { %115 = dma.hbm_to_vmem [thread:$0]  %s111_s22, 16, %s113_s23, [#allocation6]  }
  0x45   :  { %s2989_s2 = smov [#allocation8]   ;;  %s158_s10 = sshll.u32 %s3098_s12, 4  ;;  %s159_s10 = int_to_ptr.hbm [resolvable:$true] %s158_s10 }
  0x46   :  { %s134_s7 = sshll.u32 %s2989_s2, 4  ;;  %s2529_s11 = sshra.s32 %s133_s21, 4  ;;  %s135_s7 = int_to_ptr.vmem [resolvable:$true] %s134_s7  ;;  %s2530_s11 = int_to_ptr.hbm [resolvable:$true] %s2529_s11 }
  0x47   :  { %s2531_s16 = scalar_lea.hbm %s2530_s11, 1  ;;  %s2533_s15 = scalar_lea.hbm %s3078_s19, 1 }
  0x48   :  { %p2532_p5 = scmp.ne.s32.totalorder %s2530_s11, %s2531_s16  ;;  %p2534_p6 = scmp.lt.s32.totalorder %s2530_s11, %s3078_s19 }
  0x49   :  { %p2535_p7 = scmp.lt.s32.totalorder %s2533_s15, %s2531_s16 }
  0x4b   :  { %p2536_p8 = por %p2535_p7, %p2534_p6 }
  0x4d   :  { %p2537_p9 = pnand %p2536_p8, %p2532_p5 }
  0x4f   :  { %2540 = shalt.err (!%p2537_p9)
}
  0x50   :  { %137 = dma.hbm_to_vmem [thread:$0]  %s133_s21, 16, %s135_s7, [#allocation9]  }
  0x51   :  { %s180_s8 = sshll.u32 %s3108_s27, 4  ;;  %s2990_s18 = smov [#allocation11]   ;;  %s181_s8 = int_to_ptr.hbm [resolvable:$true] %s180_s8 }
  0x52   :  { %s160_s22 = sshll.u32 %s2990_s18, 4  ;;  %s2553_s0 = sshra.s32 %s159_s10, 4  ;;  %s161_s22 = int_to_ptr.vmem [resolvable:$true] %s160_s22  ;;  %s2554_s0 = int_to_ptr.hbm [resolvable:$true] %s2553_s0 }
  0x53   :  { %s2555_s23 = scalar_lea.hbm %s2554_s0, 1  ;;  %s2557_s26 = scalar_lea.hbm %s3098_s12, 1 }
  0x54   :  { %p2556_p10 = scmp.ne.s32.totalorder %s2554_s0, %s2555_s23  ;;  %p2558_p11 = scmp.lt.s32.totalorder %s2554_s0, %s3098_s12 }
  0x55   :  { %p2559_p12 = scmp.lt.s32.totalorder %s2557_s26, %s2555_s23 }
  0x57   :  { %p2560_p13 = por %p2559_p12, %p2558_p11 }
  0x59   :  { %p2561_p0 = pnand %p2560_p13, %p2556_p10 }
  0x5b   :  { %2564 = shalt.err (!%p2561_p0)
}
  0x5c   :  { %163 = dma.hbm_to_vmem [thread:$0]  %s159_s10, 16, %s161_s22, [#allocation12]  }
  0x5d   :  { %s2991_s19 = smov [#allocation14]   ;;  %s203_s28 = sshll.u32 %s3123_s24, 4  ;;  %s3194_s28 = int_to_ptr.hbm [resolvable:$true] %s203_s28 }
  0x5e   :  { %s182_s21 = sshll.u32 %s2991_s19, 4  ;;  %s2577_s1 = sshra.s32 %s181_s8, 4  ;;  %s183_s21 = int_to_ptr.vmem [resolvable:$true] %s182_s21  ;;  %s2578_s1 = int_to_ptr.hbm [resolvable:$true] %s2577_s1 }
  0x5f   :  { %s2579_s2 = scalar_lea.hbm %s2578_s1, 1  ;;  %s2581_s7 = scalar_lea.hbm %s3108_s27, 1 }
  0x60   :  { %p2580_p1 = scmp.ne.s32.totalorder %s2578_s1, %s2579_s2  ;;  %p2582_p2 = scmp.lt.s32.totalorder %s2578_s1, %s3108_s27 }
  0x61   :  { %p2583_p3 = scmp.lt.s32.totalorder %s2581_s7, %s2579_s2 }
  0x63   :  { %p2584_p4 = por %p2583_p3, %p2582_p2 }
  0x65   :  { %p2585_p5 = pnand %p2584_p4, %p2580_p1 }
  0x67   :  { %2588 = shalt.err (!%p2585_p5)
}
  0x68   :  { %185 = dma.hbm_to_vmem [thread:$0]  %s181_s8, 16, %s183_s21, [#allocation15]  }
  0x69   :  { %s2992_s12 = smov [#allocation17]   ;;  %s228_s11 = sshll.u32 %s3133_s4, 4  ;;  %s229_s11 = int_to_ptr.hbm [resolvable:$true] %s228_s11 }
  0x6a   :  { %s205_s10 = sshll.u32 %s2992_s12, 4  ;;  %s2601_s16 = sshra.s32 %s3194_s28, 4  ;;  %s206_s10 = int_to_ptr.vmem [resolvable:$true] %s205_s10  ;;  %s2602_s16 = int_to_ptr.hbm [resolvable:$true] %s2601_s16 }
  0x6b   :  { %s2603_s15 = scalar_lea.hbm %s2602_s16, 16  ;;  %s2605_s18 = scalar_lea.hbm %s3123_s24, 16 }
  0x6c   :  { %p2604_p6 = scmp.ne.s32.totalorder %s2602_s16, %s2603_s15  ;;  %p2606_p7 = scmp.lt.s32.totalorder %s2602_s16, %s3123_s24 }
  0x6d   :  { %p2607_p8 = scmp.lt.s32.totalorder %s2605_s18, %s2603_s15 }
  0x6f   :  { %p2608_p9 = por %p2607_p8, %p2606_p7 }
  0x71   :  { %p2609_p10 = pnand %p2608_p9, %p2604_p6 }
  0x73   :  { %2612 = shalt.err (!%p2609_p10)
}
  0x74   :  { %s2993_s27 = smov 64   ;;  %s2994_s8 = smov 4  }
  0x75   :  { %211 = dma.hbm_to_vmem [thread:$0]  %s3194_s28, 256, %s206_s10, [#allocation18], %s2993_s27, %s2993_s27, %s2994_s8  }
  0x76   :  { %s2995_s22 = smov [#allocation20]   ;;  %s249_s23 = sshll.u32 %s3143_s25, 4  ;;  %s3207_s23 = int_to_ptr.hbm [resolvable:$true] %s249_s23 }
  0x77   :  { %s230_s0 = sshll.u32 %s2995_s22, 4  ;;  %s2625_s24 = sshra.s32 %s229_s11, 4  ;;  %s231_s0 = int_to_ptr.vmem [resolvable:$true] %s230_s0  ;;  %s2626_s24 = int_to_ptr.hbm [resolvable:$true] %s2625_s24 }
  0x78   :  { %s2627_s26 = scalar_lea.hbm %s2626_s24, 1  ;;  %s2629_s19 = scalar_lea.hbm %s3133_s4, 1 }
  0x79   :  { %p2628_p11 = scmp.ne.s32.totalorder %s2626_s24, %s2627_s26  ;;  %p2630_p12 = scmp.lt.s32.totalorder %s2626_s24, %s3133_s4 }
  0x7a   :  { %p2631_p13 = scmp.lt.s32.totalorder %s2629_s19, %s2627_s26 }
  0x7c   :  { %p2632_p0 = por %p2631_p13, %p2630_p12 }
  0x7e   :  { %p2633_p1 = pnand %p2632_p0, %p2628_p11 }
  0x80   :  { %2636 = shalt.err (!%p2633_p1)
}
  0x81   :  { %233 = dma.hbm_to_vmem [thread:$0]  %s229_s11, 16, %s231_s0, [#allocation21]  }
  0x82   :  { %s276_s21 = sshll.u32 %s3158_s5, 4  ;;  %s2996_s28 = smov [#allocation23]   ;;  %s277_s21 = int_to_ptr.hbm [resolvable:$true] %s276_s21 }
  0x83   :  { %s251_s1 = sshll.u32 %s2996_s28, 4  ;;  %s2649_s2 = sshra.s32 %s3207_s23, 4  ;;  %s252_s1 = int_to_ptr.vmem [resolvable:$true] %s251_s1  ;;  %s2650_s2 = int_to_ptr.hbm [resolvable:$true] %s2649_s2 }
  0x84   :  { %s2651_s7 = scalar_lea.hbm %s2650_s2, 16  ;;  %s2653_s12 = scalar_lea.hbm %s3143_s25, 16 }
  0x85   :  { %p2652_p2 = scmp.ne.s32.totalorder %s2650_s2, %s2651_s7  ;;  %p2654_p3 = scmp.lt.s32.totalorder %s2650_s2, %s3143_s25 }
  0x86   :  { %p2655_p4 = scmp.lt.s32.totalorder %s2653_s12, %s2651_s7 }
  0x88   :  { %p2656_p5 = por %p2655_p4, %p2654_p3 }
  0x8a   :  { %p2657_p6 = pnand %p2656_p5, %p2652_p2 }
  0x8c   :  { %2660 = shalt.err (!%p2657_p6)
}
  0x8d   :  { %257 = dma.hbm_to_vmem [thread:$0]  %s3207_s23, 256, %s252_s1, [#allocation24], %s2993_s27, %s2993_s27, %s2994_s8  }
  0x8e   :  { %s2997_s4 = smov [#allocation26]   ;;  %s97_s11 = sshll.u32 %s3058_s29, 4  ;;  %s98_s11 = int_to_ptr.hbm [resolvable:$true] %s97_s11 }
  0x8f   :  { %s278_s10 = sshll.u32 %s2997_s4, 4  ;;  %s2673_s16 = sshra.s32 %s277_s21, 4  ;;  %s279_s10 = int_to_ptr.vmem [resolvable:$true] %s278_s10  ;;  %s2674_s16 = int_to_ptr.hbm [resolvable:$true] %s2673_s16 }
  0x90   :  { %s2675_s25 = scalar_lea.hbm %s2674_s16, 1  ;;  %s2677_s15 = scalar_lea.hbm %s3158_s5, 1 }
  0x91   :  { %p2676_p7 = scmp.ne.s32.totalorder %s2674_s16, %s2675_s25  ;;  %p2678_p8 = scmp.lt.s32.totalorder %s2674_s16, %s3158_s5 }
  0x92   :  { %p2679_p9 = scmp.lt.s32.totalorder %s2677_s15, %s2675_s25 }
  0x94   :  { %p2680_p10 = por %p2679_p9, %p2678_p8 }
  0x96   :  { %p2681_p11 = pnand %p2680_p10, %p2676_p7 }
  0x98   :  { %2684 = shalt.err (!%p2681_p11)
}
  0x99   :  { %281 = dma.hbm_to_vmem [thread:$0]  %s277_s21, 16, %s279_s10, [#allocation27]  }
  0x9a   :  { %s121_s18 = sshll.u32 %s3073_s14, 4  ;;  %s2998_s8 = smov [#allocation3]   ;;  %s122_s18 = int_to_ptr.hbm [resolvable:$true] %s121_s18 }
  0x9b   :  { %s99_s22 = sshll.u32 %s2998_s8, 4  ;;  %s2697_s0 = sshra.s32 %s98_s11, 4  ;;  %s100_s22 = int_to_ptr.vmem [resolvable:$true] %s99_s22  ;;  %s2698_s0 = int_to_ptr.hbm [resolvable:$true] %s2697_s0 }
  0x9c   :  { %s2699_s23 = scalar_lea.hbm %s2698_s0, 1  ;;  %s2701_s24 = scalar_lea.hbm %s3058_s29, 1 }
  0x9d   :  { %p2700_p12 = scmp.ne.s32.totalorder %s2698_s0, %s2699_s23  ;;  %p2702_p13 = scmp.lt.s32.totalorder %s2698_s0, %s3058_s29 }
  0x9e   :  { %p2703_p0 = scmp.lt.s32.totalorder %s2701_s24, %s2699_s23 }
  0xa0   :  { %p2704_p1 = por %p2703_p0, %p2702_p13 }
  0xa2   :  { %p2705_p2 = pnand %p2704_p1, %p2700_p12 }
  0xa4   :  { %2708 = shalt.err (!%p2705_p2)
}
  0xa5   :  { %102 = dma.hbm_to_vmem [thread:$0]  %s98_s11, 16, %s100_s22, [#allocation4]  }
  0xa6   :  { %s2999_s5 = smov [#allocation7]   ;;  %s145_s19 = sshll.u32 %s3088_s30, 4  ;;  %s146_s19 = int_to_ptr.hbm [resolvable:$true] %s145_s19 }
  0xa7   :  { %s123_s26 = sshll.u32 %s2999_s5, 4  ;;  %s2721_s21 = sshra.s32 %s122_s18, 4  ;;  %s124_s26 = int_to_ptr.vmem [resolvable:$true] %s123_s26  ;;  %s2722_s21 = int_to_ptr.hbm [resolvable:$true] %s2721_s21 }
  0xa8   :  { %s2723_s28 = scalar_lea.hbm %s2722_s21, 1  ;;  %s2725_s1 = scalar_lea.hbm %s3073_s14, 1 }
  0xa9   :  { %p2724_p3 = scmp.ne.s32.totalorder %s2722_s21, %s2723_s28  ;;  %p2726_p4 = scmp.lt.s32.totalorder %s2722_s21, %s3073_s14 }
  0xaa   :  { %p2727_p5 = scmp.lt.s32.totalorder %s2725_s1, %s2723_s28 }
  0xac   :  { %p2728_p6 = por %p2727_p5, %p2726_p4 }
  0xae   :  { %p2729_p7 = pnand %p2728_p6, %p2724_p3 }
  0xb0   :  { %2732 = shalt.err (!%p2729_p7)
}
  0xb1   :  { %126 = dma.hbm_to_vmem [thread:$0]  %s122_s18, 16, %s124_s26, [#allocation6]  }
  0xb2   :  { %s169_s29 = sshll.u32 %s3103_s20, 4  ;;  %s3000_s2 = smov [#allocation10]   ;;  %s170_s29 = int_to_ptr.hbm [resolvable:$true] %s169_s29 }
  0xb3   :  { %s147_s7 = sshll.u32 %s3000_s2, 4  ;;  %s2745_s12 = sshra.s32 %s146_s19, 4  ;;  %s148_s7 = int_to_ptr.vmem [resolvable:$true] %s147_s7  ;;  %s2746_s12 = int_to_ptr.hbm [resolvable:$true] %s2745_s12 }
  0xb4   :  { %s2747_s4 = scalar_lea.hbm %s2746_s12, 1  ;;  %s2749_s10 = scalar_lea.hbm %s3088_s30, 1 }
  0xb5   :  { %p2748_p8 = scmp.ne.s32.totalorder %s2746_s12, %s2747_s4  ;;  %p2750_p9 = scmp.lt.s32.totalorder %s2746_s12, %s3088_s30 }
  0xb6   :  { %p2751_p10 = scmp.lt.s32.totalorder %s2749_s10, %s2747_s4 }
  0xb8   :  { %p2752_p11 = por %p2751_p10, %p2750_p9 }
  0xba   :  { %p2753_p12 = pnand %p2752_p11, %p2748_p8 }
  0xbc   :  { %2756 = shalt.err (!%p2753_p12)
}
  0xbd   :  { %150 = dma.hbm_to_vmem [thread:$0]  %s146_s19, 16, %s148_s7, [#allocation9]  }
  0xbe   :  { %s3001_s14 = smov [#allocation13]   ;;  %s193_s16 = sshll.u32 %s3118_s6, 4  ;;  %s194_s16 = int_to_ptr.hbm [resolvable:$true] %s193_s16 }
  0xbf   :  { %s171_s11 = sshll.u32 %s3001_s14, 4  ;;  %s2769_s25 = sshra.s32 %s170_s29, 4  ;;  %s172_s11 = int_to_ptr.vmem [resolvable:$true] %s171_s11  ;;  %s2770_s25 = int_to_ptr.hbm [resolvable:$true] %s2769_s25 }
  0xc0   :  { %s2771_s15 = scalar_lea.hbm %s2770_s25, 1  ;;  %s2773_s18 = scalar_lea.hbm %s3103_s20, 1 }
  0xc1   :  { %p2772_p13 = scmp.ne.s32.totalorder %s2770_s25, %s2771_s15  ;;  %p2774_p0 = scmp.lt.s32.totalorder %s2770_s25, %s3103_s20 }
  0xc2   :  { %p2775_p1 = scmp.lt.s32.totalorder %s2773_s18, %s2771_s15 }
  0xc4   :  { %p2776_p2 = por %p2775_p1, %p2774_p0 }
  0xc6   :  { %p2777_p3 = pnand %p2776_p2, %p2772_p13 }
  0xc8   :  { %2780 = shalt.err (!%p2777_p3)
}
  0xc9   :  { %174 = dma.hbm_to_vmem [thread:$0]  %s170_s29, 16, %s172_s11, [#allocation12]  }
  0xca   :  { %s217_s30 = sshll.u32 %s3128_s3, 4  ;;  %s3002_s8 = smov [#allocation16]   ;;  %s218_s30 = int_to_ptr.hbm [resolvable:$true] %s217_s30 }
  0xcb   :  { %s195_s22 = sshll.u32 %s3002_s8, 4  ;;  %s2793_s0 = sshra.s32 %s194_s16, 4  ;;  %s196_s22 = int_to_ptr.vmem [resolvable:$true] %s195_s22  ;;  %s2794_s0 = int_to_ptr.hbm [resolvable:$true] %s2793_s0 }
  0xcc   :  { %s2795_s23 = scalar_lea.hbm %s2794_s0, 1  ;;  %s2797_s24 = scalar_lea.hbm %s3118_s6, 1 }
  0xcd   :  { %p2796_p4 = scmp.ne.s32.totalorder %s2794_s0, %s2795_s23  ;;  %p2798_p5 = scmp.lt.s32.totalorder %s2794_s0, %s3118_s6 }
  0xce   :  { %p2799_p6 = scmp.lt.s32.totalorder %s2797_s24, %s2795_s23 }
  0xd0   :  { %p2800_p7 = por %p2799_p6, %p2798_p5 }
  0xd2   :  { %p2801_p8 = pnand %p2800_p7, %p2796_p4 }
  0xd4   :  { %2804 = shalt.err (!%p2801_p8)
}
  0xd5   :  { %198 = dma.hbm_to_vmem [thread:$0]  %s194_s16, 16, %s196_s22, [#allocation15]  }
  0xd6   :  { %s3598_s20 = sld [smem:[#allocation51_spill]]  ;;  %s3003_s5 = smov [#allocation19]  }
  0xd7   :  { %s219_s26 = sshll.u32 %s3003_s5, 4  ;;  %s2817_s21 = sshra.s32 %s218_s30, 4  ;;  %s220_s26 = int_to_ptr.vmem [resolvable:$true] %s219_s26  ;;  %s2818_s21 = int_to_ptr.hbm [resolvable:$true] %s2817_s21 }
  0xd8   :  { %s2819_s28 = scalar_lea.hbm %s2818_s21, 1  ;;  %s2821_s1 = scalar_lea.hbm %s3128_s3, 1 }
  0xd9   :  { %p2820_p9 = scmp.ne.s32.totalorder %s2818_s21, %s2819_s28  ;;  %p2822_p10 = scmp.lt.s32.totalorder %s2818_s21, %s3128_s3 }
  0xda   :  { %p2823_p11 = scmp.lt.s32.totalorder %s2821_s1, %s2819_s28 }
  0xdc   :  { %s239_s19 = sshll.u32 %s3598_s20, 4  ;;  %p2824_p12 = por %p2823_p11, %p2822_p10  ;;  %s240_s19 = int_to_ptr.hbm [resolvable:$true] %s239_s19 }
  0xde   :  { %p2825_p13 = pnand %p2824_p12, %p2820_p9 }
  0xe0   :  { %2828 = shalt.err (!%p2825_p13)
}
  0xe1   :  { %222 = dma.hbm_to_vmem [thread:$0]  %s218_s30, 16, %s220_s26, [#allocation18]  }
  0xe2   :  { %s3599_s6 = sld [smem:[#allocation52_spill]]  ;;  %s3004_s2 = smov [#allocation22]  }
  0xe3   :  { %s241_s7 = sshll.u32 %s3004_s2, 4  ;;  %s2841_s12 = sshra.s32 %s240_s19, 4  ;;  %s242_s7 = int_to_ptr.vmem [resolvable:$true] %s241_s7  ;;  %s2842_s12 = int_to_ptr.hbm [resolvable:$true] %s2841_s12 }
  0xe4   :  { %s2843_s4 = scalar_lea.hbm %s2842_s12, 1  ;;  %s2845_s10 = scalar_lea.hbm %s3598_s20, 1 }
  0xe5   :  { %p2844_p0 = scmp.ne.s32.totalorder %s2842_s12, %s2843_s4  ;;  %p2846_p1 = scmp.lt.s32.totalorder %s2842_s12, %s3598_s20 }
  0xe6   :  { %p2847_p2 = scmp.lt.s32.totalorder %s2845_s10, %s2843_s4 }
  0xe8   :  { %s263_s29 = sshll.u32 %s3599_s6, 4  ;;  %p2848_p3 = por %p2847_p2, %p2846_p1  ;;  %s264_s29 = int_to_ptr.hbm [resolvable:$true] %s263_s29 }
  0xea   :  { %p2849_p4 = pnand %p2848_p3, %p2844_p0 }
  0xec   :  { %2852 = shalt.err (!%p2849_p4)
}
  0xed   :  { %244 = dma.hbm_to_vmem [thread:$0]  %s240_s19, 16, %s242_s7, [#allocation21]  }
  0xee   :  { %s3600_s3 = sld [smem:[#allocation54_spill]]  ;;  %s3005_s14 = smov [#allocation25]  }
  0xef   :  { %s265_s11 = sshll.u32 %s3005_s14, 4  ;;  %s2865_s25 = sshra.s32 %s264_s29, 4  ;;  %s266_s11 = int_to_ptr.vmem [resolvable:$true] %s265_s11  ;;  %s2866_s25 = int_to_ptr.hbm [resolvable:$true] %s2865_s25 }
  0xf0   :  { %s2867_s15 = scalar_lea.hbm %s2866_s25, 1  ;;  %s2869_s18 = scalar_lea.hbm %s3599_s6, 1 }
  0xf1   :  { %p2868_p5 = scmp.ne.s32.totalorder %s2866_s25, %s2867_s15  ;;  %p2870_p6 = scmp.lt.s32.totalorder %s2866_s25, %s3599_s6 }
  0xf2   :  { %p2871_p7 = scmp.lt.s32.totalorder %s2869_s18, %s2867_s15 }
  0xf4   :  { %s287_s16 = sshll.u32 %s3600_s3, 4  ;;  %p2872_p8 = por %p2871_p7, %p2870_p6  ;;  %s288_s16 = int_to_ptr.hbm [resolvable:$true] %s287_s16 }
  0xf6   :  { %p2873_p9 = pnand %p2872_p8, %p2868_p5 }
  0xf8   :  { %2876 = shalt.err (!%p2873_p9)
}
  0xf9   :  { %268 = dma.hbm_to_vmem [thread:$0]  %s264_s29, 16, %s266_s11, [#allocation24]  }
  0xfa   :  { %s298_s30 = sshll.u32 %s3168_s13, 4  ;;  %s3006_s8 = smov [#allocation28]   ;;  %s299_s30 = int_to_ptr.hbm [resolvable:$true] %s298_s30 }
  0xfb   :  { %s289_s22 = sshll.u32 %s3006_s8, 4  ;;  %s2889_s0 = sshra.s32 %s288_s16, 4  ;;  %s290_s22 = int_to_ptr.vmem [resolvable:$true] %s289_s22  ;;  %s2890_s0 = int_to_ptr.hbm [resolvable:$true] %s2889_s0 }
  0xfc   :  { %s2891_s23 = scalar_lea.hbm %s2890_s0, 1  ;;  %s2893_s24 = scalar_lea.hbm %s3600_s3, 1 }
  0xfd   :  { %p2892_p10 = scmp.ne.s32.totalorder %s2890_s0, %s2891_s23  ;;  %p2894_p11 = scmp.lt.s32.totalorder %s2890_s0, %s3600_s3 }
  0xfe   :  { %p2895_p12 = scmp.lt.s32.totalorder %s2893_s24, %s2891_s23 }
 0x100   :  { %p2896_p13 = por %p2895_p12, %p2894_p11 }
 0x102   :  { %p2897_p0 = pnand %p2896_p13, %p2892_p10 }
 0x104   :  { %2900 = shalt.err (!%p2897_p0)
}
 0x105   :  { %292 = dma.hbm_to_vmem [thread:$0]  %s288_s16, 16, %s290_s22, [#allocation27]  }
 0x106   :  { %s3007_s20 = smov [#allocation29]   ;;  %s2913_s26 = sshra.s32 %s299_s30, 4  ;;  %s2914_s26 = int_to_ptr.hbm [resolvable:$true] %s2913_s26 }
 0x107   :  { %s300_s5 = sshll.u32 %s3007_s20, 4  ;;  %s2915_s19 = scalar_lea.hbm %s2914_s26, 1  ;;  %s301_s5 = int_to_ptr.vmem [resolvable:$true] %s300_s5 }
 0x108   :  { %p2916_p1 = scmp.ne.s32.totalorder %s2914_s26, %s2915_s19  ;;  %s2917_s21 = scalar_lea.hbm %s3168_s13, 1 }
 0x109   :  { %p2918_p2 = scmp.lt.s32.totalorder %s2914_s26, %s3168_s13  ;;  %p2919_p3 = scmp.lt.s32.totalorder %s2917_s21, %s2915_s19 }
 0x10b   :  { %p2920_p4 = por %p2919_p3, %p2918_p2 }
 0x10d   :  { %p2921_p5 = pnand %p2920_p4, %p2916_p1 }
 0x10f   :  { %2924 = shalt.err (!%p2921_p5)
}
 0x110   :  { %303 = dma.hbm_to_vmem [thread:$0]  %s299_s30, 16, %s301_s5, [#allocation30]  }
 0x111   :  { %2937 = dma.done.wait [#allocation4], 16  }
 0x112   :  { %2938 = vsyncadd [#allocation4], 4294967280 }
 0x113   :  { %2939 = dma.done.wait [#allocation6], 32  }
 0x114   :  { %2940 = vsyncadd [#allocation6], 4294967264 }
 0x115   :  { %2941 = dma.done.wait [#allocation9], 32  }
 0x116   :  { %2942 = vsyncadd [#allocation9], 4294967264 }
 0x117   :  { %2943 = dma.done.wait [#allocation12], 32  }
 0x118   :  { %2944 = vsyncadd [#allocation12], 4294967264 }
 0x119   :  { %2945 = dma.done.wait [#allocation15], 32  }
 0x11a   :  { %2946 = vsyncadd [#allocation15], 4294967264 }
 0x11b   :  { %2947 = dma.done.wait [#allocation18], 272  }
 0x11c   :  { %2948 = vsyncadd [#allocation18], 4294967024 }
 0x11d   :  { %2949 = dma.done.wait [#allocation21], 32  }
 0x11e   :  { %2950 = vsyncadd [#allocation21], 4294967264 }
 0x11f   :  { %2951 = dma.done.wait [#allocation24], 272  }
 0x120   :  { %2952 = vsyncadd [#allocation24], 4294967024 }
 0x121   :  { %2953 = dma.done.wait [#allocation27], 32  }
 0x122   :  { %2954 = vsyncadd [#allocation27], 4294967264 }
 0x123   :  { %2955 = dma.done.wait [#allocation30], 16  }
 0x124   :  { %2956 = vsyncadd [#allocation30], 4294967280  ;;  %s3601_s13 = sld [smem:[#allocation42_spill]]  ;;  %vm396_vm0 = vcmask 130048   ;;  %vm437_vm1 = vcmask 261120   ;;  %s3008_s7 = smov 120  }
 0x125   :  { %s3602_s28 = sld [smem:[#allocation41_spill]]  ;;  %v2404_v23 = vld [vmem:[#allocation3] ss:$0 sm:$0xff]  ;;  %s3009_s12 = smov 96   ;;  %vm500_vm2 = vcmask 64512   ;;  %vm573_vm3 = vcmask 1043456  }
 0x126   :  { %s3603_s1 = sld [smem:[#allocation44_spill]]  ;;  %s3010_s4 = smov 88   ;;  %vm1190_vm11 = vcmask 523264  }
 0x127   :  { %s3604_s6 = sld [smem:[#allocation43_spill]]  ;;  %s3011_s10 = smov 56  }
 0x128   :  { %s3605_s29 = sld [smem:[#allocation46_spill]]  ;;  %s3012_s3 = smov 112  }
 0x129   :  { %s3606_s2 = sld [smem:[#allocation45_spill]]  ;;  %s3013_s14 = smov 80  }
 0x12a   :  { %v2318_v1 = vld [vmem:[%s3601_s13] sm:$0xff]  ;;  %s3014_s11 = smov 48   ;;  %s3015_s16 = smov 72  }
 0x12b   :  { %v381_v2 = vld [vmem:[%s3602_s28] sm:$0xff]  ;;  %v382_v3 = vld [vmem:[%s3602_s28 + $0x8] sm:$0xff]  ;;  %407 = vmatpush.bf16.msra.mxu0 %v2318_v1  ;;  %s3607_s25 = sld [smem:[#allocation47_spill]]  ;;  %s3016_s15 = smov 104  }
 0x12c   :  { %v386_v4 = vpack.c.bf16 %v382_v3, %v381_v2  ;;  %v2320_v5 = vld [vmem:[%s3603_s1 + $0x8] sm:$0xff]  ;;  %v2319_v6 = vld [vmem:[%s3603_s1] sm:$0xff]  ;;  %s3017_s18 = smov 40   ;;  %s3608_s30 = sld [smem:[#allocation48_spill]] }
 0x12d   :  { %447 = vmatpush.bf16.msra.mxu1 %v2320_v5  ;;  %v2402_v8 = vld [vmem:[%s3604_s6] ss:$0 sm:$0xff]  ;;  %s3609_s8 = sld [smem:[#allocation49_spill]] }
 0x12e   :  { %2186 = vmatmul.msk.bf16.vlgmr.msra.gmra.mxu0 %vm396_vm0, %v386_v4  ;;  %v2322_v15 = vld [vmem:[%s3605_s29 + $0x8] sm:$0xff]  ;;  %v2321_v16 = vld [vmem:[%s3605_s29] sm:$0xff]  ;;  %s3610_s22 = sld [smem:[#allocation50_spill]] }
 0x12f   :  { %485 = vmatpush.bf16.msra.mxu2 %v2322_v15  ;;  %v2403_v18 = vld [vmem:[%s3606_s2] ss:$0 sm:$0xff] }
 0x131   :  { %448 = vmatpush.bf16.msra.mxu1 %v2319_v6 }
 0x133   :  { %486 = vmatpush.bf16.msra.mxu2 %v2321_v16 }
 0x1ab   :  { %v409_v7 = vpop.f32.mrf.mxu0 }
 0x1ac   :  { %v410_v9 = vadd.f32 %v2402_v8, %v409_v7 }
 0x1ae   :  { %v414_v12 = vmax.f32 %v410_v9, 0.0 }
 0x1b3   :  { %v411_v10 = vpop.f32.mrf.mxu0 }
 0x1b4   :  { %v412_v11 = vadd.f32 %v2402_v8, %v411_v10 }
 0x1b6   :  { %v415_v13 = vmax.f32 %v412_v11, 0.0 }
 0x1b8   :  { %v421_v14 = vpack.c.bf16 %v415_v13, %v414_v12 }
 0x1ba   :  { %2195 = vmatmul.msk.bf16.vlgmr.msra.gmra.mxu1 %vm437_vm1, %v421_v14 }
 0x237   :  { %v450_v17 = vpop.f32.mrf.mxu1 }
 0x238   :  { %v3261_v20 = vadd.f32 %v2403_v18, %v450_v17 }
 0x23f   :  { %v452_v19 = vpop.f32.mrf.mxu1 }
 0x240   :  { %v3263_v21 = vadd.f32 %v2403_v18, %v452_v19 }
 0x242   :  { %v455_v22 = vpack.c.bf16 %v3263_v21, %v3261_v20 }
 0x244   :  { %2204 = vmatmul.msk.bf16.vlgmr.msra.gmra.mxu2 %vm437_vm1, %v455_v22 }
 0x2c7   :  { %v488_v24 = vpop.f32.mrf.mxu2 }
 0x2c8   :  { %v489_v25 = vadd.f32 %v2404_v23, %v488_v24 }
 0x2ca   :  { %v493_v26 = vpack.c.bf16 %v489_v25, %v489_v25 }
 0x2cc   :  { %v496_v27 = vunpack.c.l.b16 %v493_v26 }
 0x2ce   :  { %v3268_v28 = vpack.c.b16 %v496_v27, %v496_v27 }
 0x2cf   :  { %v490_v29 = vpop.f32.mrf.mxu2 }
 0x2d0   :  { %v491_v30 = vadd.f32 %v2404_v23, %v490_v29  ;;  %613 = vrot.lane.b32.xlu1 %v3268_v28, %s3008_s7  ;;  %498 = vrot.lane.b32.xlu0 %v3268_v28, %s3009_s12 }
 0x2d2   :  { %v494_v31 = vpack.c.bf16 %v491_v30, %v491_v30 }
 0x2d4   :  { %v521_v32 = vunpack.c.l.b16 %v494_v31 }
 0x2d6   :  { %v3274_v33 = vpack.c.b16 %v521_v32, %v521_v32 }
 0x2d8   :  { %638 = vrot.lane.b32.xlu2 %v3274_v33, %s3010_s4  ;;  %523 = vrot.lane.b32.xlu1 %v3274_v33, %s3009_s12 }
 0x2d9   :  { %615 = vrot.lane.b32.xlu0 %v3268_v28, %s3010_s4 }
 0x2e0   :  { %636 = vrot.lane.b32.xlu2 %v3274_v33, %s3008_s7 }
 0x332   :  { %v639_v37 = vpop.permute.xlu2 %638 }
 0x333   :  { %v644_v41 = vsel %vm500_vm2, %v639_v37, 0 }
 0x33a   :  { %v637_v43 = vpop.permute.xlu2 %636 }
 0x342   :  { %v614_v34 = vpop.permute.xlu1 %613  ;;  %v499_v35 = vpop.permute.xlu0 %498 }
 0x343   :  { %v505_v36 = vsel %vm500_vm2, %v499_v35, 0 }
 0x344   :  { %514 = vmatpush.bf16.xpose.msra.mxu3 %v505_v36 }
 0x34a   :  { %v524_v38 = vpop.permute.xlu1 %523 }
 0x34b   :  { %v616_v39 = vpop.permute.xlu0 %615  ;;  %2205 = vmatmul.msk.bf16.vlgmr.msra.gmra.mxu3 %vm500_vm2, %v493_v26  ;;  %v529_v40 = vsel %vm500_vm2, %v524_v38, 0 }
 0x34c   :  { %538 = vmatpush.bf16.xpose.msrb.mxu0 %v529_v40  ;;  %v621_v42 = vsel %vm500_vm2, %v616_v39, 0 }
 0x34d   :  { %630 = vmatpush.bf16.xpose.msrb.mxu3 %v621_v42 }
 0x353   :  { %2206 = vmatmul.msk.bf16.vlgmr.msrb.gmra.mxu0 %vm500_vm2, %v494_v31 }
 0x354   :  { %653 = vmatpush.bf16.xpose.msra.mxu0 %v644_v41  ;;  %v2213_v41 = vld [vmem:[%s3607_s25 + $0x4] sm:$0xf] }
 0x355   :  { %v732_v42 = vsel %vm573_vm3, %v2213_v41, 0 }
 0x356   :  { %741 = vmatpush.bf16.msra.mxu3 %v732_v42 }
 0x35b   :  { %2209 = vmatmul.msk.bf16.vlgmr.msrb.gmra.mxu3 %vm500_vm2, %v614_v34 }
 0x363   :  { %2210 = vmatmul.msk.bf16.vlgmr.msra.gmra.mxu0 %vm500_vm2, %v637_v43 }
 0x3ce   :  { %v516_v44 = vpop.f32.mrf.mxu3 }
 0x3cf   :  { %v544_v45 = vsel %vm500_vm2, %v516_v44, -inf }
 0x3d0   :  { %v3293_v46 = vpop.f32.mrf.mxu0  ;;  %545 = vmax.xlane.f32.xlu0 %v544_v45 }
 0x3d1   :  { %v547_v0 = vsel %vm500_vm2, %v3293_v46, -inf }
 0x3d6   :  { %v518_v47 = vpop.f32.mrf.mxu3 }
 0x3d8   :  { %v542_v48 = vpop.f32.mrf.mxu0 }
 0x3de   :  { %v632_v49 = vpop.f32.mrf.mxu3 }
 0x3df   :  { %v659_v50 = vsel %vm500_vm2, %v632_v49, -inf }
 0x3e0   :  { %v3296_v51 = vpop.f32.mrf.mxu0  ;;  %660 = vmax.xlane.f32.xlu1 %v659_v50 }
 0x3e1   :  { %v662_v1 = vsel %vm500_vm2, %v3296_v51, -inf }
 0x3e6   :  { %v634_v52 = vpop.f32.mrf.mxu3 }
 0x3e8   :  { %v657_v53 = vpop.f32.mrf.mxu0 }
 0x3f9   :  { %683 = vrot.lane.b32.xlu1 %v3268_v28, %s3011_s10 }
 0x401   :  { %768 = vrot.lane.b32.xlu1 %v3268_v28, %s3012_s3 }
 0x443   :  { %v546_v54 = vpop.xlane.xlu0 %545 }
 0x444   :  { %v550_v55 = vsub.f32 %v516_v44, %v546_v54 }
 0x446   :  { %v552_v56 = vmul.f32 1.442695, %v550_v55 }
 0x448   :  { %2421 = vpow2.f32 %v552_v56 }
 0x44e   :  { %v2422_v57 = vpop.eup %2421 }
 0x44f   :  { %v556_v58 = vsel %vm500_vm2, %v2422_v57, 0.0 }
 0x450   :  { %557 = vadd.xlane.f32.xlu2 %v556_v58 }
 0x453   :  { %v661_v59 = vpop.xlane.xlu1 %660 }
 0x454   :  { %v665_v60 = vsub.f32 %v632_v49, %v661_v59 }
 0x456   :  { %v667_v61 = vmul.f32 1.442695, %v665_v60 }
 0x458   :  { %2423 = vpow2.f32 %v667_v61 }
 0x45e   :  { %v2424_v62 = vpop.eup %2423 }
 0x45f   :  { %v671_v63 = vsel %vm500_vm2, %v2424_v62, 0.0 }
 0x460   :  { %672 = vadd.xlane.f32.xlu0 %v671_v63 }
 0x468   :  { %568 = vrot.lane.b32.xlu2 %v3268_v28, %s2993_s27 }
 0x46b   :  { %v684_v4 = vpop.permute.xlu1 %683 }
 0x46c   :  { %v689_v8 = vsel %vm573_vm3, %v684_v4, 0 }
 0x473   :  { %v769_v16 = vpop.permute.xlu1 %768 }
 0x474   :  { %770 = vrot.lane.b32.xlu0 %v3268_v28, %s3013_s14 }
 0x491   :  { %548 = vmax.xlane.f32.xlu2 %v547_v0 }
 0x49e   :  { %663 = vmax.xlane.f32.xlu0 %v662_v1 }
 0x4a9   :  { %590 = vrot.lane.b32.xlu2 %v3274_v33, %s2993_s27 }
 0x4b1   :  { %791 = vrot.lane.b32.xlu2 %v3274_v33, %s3012_s3 }
 0x4c3   :  { %v558_v2 = vpop.xlane.xlu2 %557 }
 0x4c4   :  { %2425 = vrcp.f32 %v558_v2 }
 0x4ca   :  { %v2426_v3 = vpop.eup %2425 }
 0x4cb   :  { %v564_v5 = vmul.f32 %v2426_v3, %v2422_v57  ;;  %v569_v6 = vpop.permute.xlu2 %568  ;;  %v612_v57 = vld [vmem:[%s3607_s25] sm:$0xf] }
 0x4cc   :  { %v575_v7 = vsel %vm573_vm3, %v569_v6, 0  ;;  %v752_v59 = vsel %vm573_vm3, %v612_v57, 0 }
 0x4cd   :  { %584 = vmatpush.bf16.msrb.mxu1 %v575_v7  ;;  %v566_v9 = vpack.c.bf16 %v564_v5, %v564_v5  ;;  %761 = vmatpush.bf16.msrb.mxu0 %v752_v59 }
 0x4d0   :  { %2207 = vmatmul.msk.bf16.vlgmr.msrb.gmra.mxu1 %vm500_vm2, %v566_v9 }
 0x4d1   :  { %698 = vmatpush.bf16.msra.mxu1 %v689_v8 }
 0x4d3   :  { %v673_v10 = vpop.xlane.xlu0 %672 }
 0x4d4   :  { %2427 = vrcp.f32 %v673_v10 }
 0x4da   :  { %v2428_v11 = vpop.eup %2427 }
 0x4db   :  { %v679_v12 = vmul.f32 %v2428_v11, %v2424_v62 }
 0x4dd   :  { %v681_v13 = vpack.c.bf16 %v679_v12, %v679_v12 }
 0x4e0   :  { %2211 = vmatmul.msk.bf16.vlgmr.msra.gmra.mxu1 %vm500_vm2, %v681_v13 }
 0x4e6   :  { %v771_v14 = vpop.permute.xlu0 %770 }
 0x4e7   :  { %v776_v15 = vsel %vm500_vm2, %v771_v14, 0 }
 0x4e8   :  { %785 = vmatpush.bf16.xpose.msrb.mxu1 %v776_v15 }
 0x4f0   :  { %2216 = vmatmul.msk.bf16.vlgmr.msrb.gmra.mxu1 %vm500_vm2, %v769_v16 }
 0x504   :  { %v549_v17 = vpop.xlane.xlu2 %548 }
 0x505   :  { %v551_v18 = vsub.f32 %v3293_v46, %v549_v17 }
 0x507   :  { %v554_v19 = vmul.f32 1.442695, %v551_v18 }
 0x509   :  { %2429 = vpow2.f32 %v554_v19 }
 0x50c   :  { %v591_v22 = vpop.permute.xlu2 %590 }
 0x50d   :  { %v596_v23 = vsel %vm573_vm3, %v591_v22, 0 }
 0x50e   :  { %605 = vmatpush.bf16.msrb.mxu2 %v596_v23 }
 0x50f   :  { %v2430_v24 = vpop.eup %2429 }
 0x510   :  { %v559_v25 = vsel %vm500_vm2, %v2430_v24, 0.0 }
 0x511   :  { %560 = vadd.xlane.f32.xlu1 %v559_v25  ;;  %v664_v26 = vpop.xlane.xlu0 %663 }
 0x512   :  { %v666_v27 = vsub.f32 %v3296_v51, %v664_v26 }
 0x514   :  { %v669_v29 = vmul.f32 1.442695, %v666_v27  ;;  %v792_v60 = vpop.permute.xlu2 %791 }
 0x516   :  { %2431 = vpow2.f32 %v669_v29 }
 0x51c   :  { %v2432_v30 = vpop.eup %2431 }
 0x51d   :  { %v674_v31 = vsel %vm500_vm2, %v2432_v30, 0.0 }
 0x51e   :  { %675 = vadd.xlane.f32.xlu0 %v674_v31 }
 0x52a   :  { %704 = vrot.lane.b32.xlu1 %v3274_v33, %s3011_s10 }
 0x532   :  { %838 = vrot.lane.b32.xlu1 %v3268_v28, %s3014_s11  ;;  %793 = vrot.lane.b32.xlu0 %v3274_v33, %s3013_s14 }
 0x53a   :  { %907 = vrot.lane.b32.xlu1 %v3268_v28, %s3015_s16 }
 0x542   :  { %930 = vrot.lane.b32.xlu1 %v3274_v33, %s3015_s16 }
 0x54a   :  { %905 = vrot.lane.b32.xlu1 %v3268_v28, %s3016_s15 }
 0x54d   :  { %v586_v32 = vpop.f32.mrf.mxu1 }
 0x552   :  { %928 = vrot.lane.b32.xlu1 %v3274_v33, %s3016_s15 }
 0x555   :  { %v588_v34 = vpop.f32.mrf.mxu1 }
 0x55a   :  { %859 = vrot.lane.b32.xlu1 %v3274_v33, %s3014_s11 }
 0x55d   :  { %v700_v35 = vpop.f32.mrf.mxu1 }
 0x565   :  { %v702_v36 = vpop.f32.mrf.mxu1 }
 0x56d   :  { %v787_v37 = vpop.f32.mrf.mxu1 }
 0x56e   :  { %v814_v38 = vsel %vm500_vm2, %v787_v37, -inf }
 0x56f   :  { %815 = vmax.xlane.f32.xlu2 %v814_v38 }
 0x575   :  { %v789_v39 = vpop.f32.mrf.mxu1 }
 0x584   :  { %v561_v40 = vpop.xlane.xlu1 %560 }
 0x585   :  { %2433 = vrcp.f32 %v561_v40 }
 0x58b   :  { %v2434_v43 = vpop.eup %2433 }
 0x58c   :  { %v565_v44 = vmul.f32 %v2434_v43, %v2430_v24 }
 0x58e   :  { %v567_v45 = vpack.c.bf16 %v565_v44, %v565_v44 }
 0x590   :  { %2208 = vmatmul.msk.bf16.vlgmr.msrb.gmra.mxu2 %vm500_vm2, %v567_v45 }
 0x591   :  { %v676_v46 = vpop.xlane.xlu0 %675 }
 0x592   :  { %2435 = vrcp.f32 %v676_v46 }
 0x598   :  { %v2436_v47 = vpop.eup %2435 }
 0x599   :  { %v680_v48 = vmul.f32 %v2436_v47, %v2432_v30 }
 0x59b   :  { %v682_v51 = vpack.c.bf16 %v680_v48, %v680_v48 }
 0x59c   :  { %v705_v49 = vpop.permute.xlu1 %704 }
 0x59d   :  { %v710_v50 = vsel %vm573_vm3, %v705_v49, 0 }
 0x59e   :  { %719 = vmatpush.bf16.msra.mxu2 %v710_v50 }
 0x5a1   :  { %2212 = vmatmul.msk.bf16.vlgmr.msra.gmra.mxu2 %vm500_vm2, %v682_v51 }
 0x5a4   :  { %v839_v52 = vpop.permute.xlu1 %838  ;;  %v794_v53 = vpop.permute.xlu0 %793 }
 0x5a5   :  { %v844_v54 = vsel %vm573_vm3, %v839_v52, 0  ;;  %v799_v55 = vsel %vm500_vm2, %v794_v53, 0 }
 0x5a6   :  { %808 = vmatpush.bf16.xpose.msrb.mxu2 %v799_v55  ;;  %853 = vmatpush.bf16.msrb.mxu3 %v844_v54 }
 0x5ac   :  { %v908_v56 = vpop.permute.xlu1 %907 }
 0x5ad   :  { %v913_v58 = vsel %vm500_vm2, %v908_v56, 0 }
 0x5ae   :  { %922 = vmatpush.bf16.xpose.msra.mxu2 %v913_v58 }
 0x5b1   :  { %2217 = vmatmul.msk.bf16.vlgmr.msrb.gmra.mxu2 %vm500_vm2, %v792_v60 }
 0x5b4   :  { %v931_v61 = vpop.permute.xlu1 %930 }
 0x5b5   :  { %v936_v12 = vsel %vm500_vm2, %v931_v61, 0  ;;  %v2220_v61 = vld [vmem:[%s3607_s25 + $0x8] sm:$0xf] }
 0x5bc   :  { %v906_v62 = vpop.permute.xlu1 %905 }
 0x5c1   :  { %2222 = vmatmul.msk.bf16.vlgmr.msra.gmra.mxu2 %vm500_vm2, %v906_v62  ;;  %v887_v62 = vsel %vm573_vm3, %v2220_v61, 0 }
 0x5c2   :  { %896 = vmatpush.bf16.msra.mxu1 %v887_v62 }
 0x5c4   :  { %v929_v63 = vpop.permute.xlu1 %928 }
 0x5cc   :  { %v860_v0 = vpop.permute.xlu1 %859 }
 0x5cd   :  { %v865_v1 = vsel %vm573_vm3, %v860_v0, 0 }
 0x5ce   :  { %874 = vmatpush.bf16.msra.mxu0 %v865_v1 }
 0x5e2   :  { %v816_v2 = vpop.xlane.xlu2 %815 }
 0x5e3   :  { %v820_v3 = vsub.f32 %v787_v37, %v816_v2 }
 0x5e5   :  { %v822_v4 = vmul.f32 1.442695, %v820_v3 }
 0x5e7   :  { %2437 = vpow2.f32 %v822_v4 }
 0x5ed   :  { %v2438_v5 = vpop.eup %2437 }
 0x5ee   :  { %v826_v6 = vsel %vm500_vm2, %v2438_v5, 0.0 }
 0x5ef   :  { %827 = vadd.xlane.f32.xlu0 %v826_v6 }
 0x613   :  { %v607_v7 = vpop.f32.mrf.mxu2 }
 0x614   :  { %v611_v8 = vpack.c.bf16 %v607_v7, %v586_v32 }
 0x616   :  { %2215 = vmatmul.msk.bf16.vlgmr.msrb.gmra.mxu0 %vm500_vm2, %v611_v8 }
 0x61b   :  { %v609_v9 = vpop.f32.mrf.mxu2 }
 0x624   :  { %v721_v10 = vpop.f32.mrf.mxu2 }
 0x625   :  { %v725_v11 = vpack.c.bf16 %v721_v10, %v700_v35 }
 0x627   :  { %2214 = vmatmul.msk.bf16.vlgmr.msra.gmra.mxu3 %vm500_vm2, %v725_v11 }
 0x628   :  { %945 = vmatpush.bf16.xpose.msra.mxu3 %v936_v12  ;;  %v2226_v12 = vld [vmem:[%s3607_s25 + $0xc] sm:$0xf] }
 0x62c   :  { %v723_v13 = vpop.f32.mrf.mxu2 }
 0x62d   :  { %v1024_v13 = vsel %vm573_vm3, %v2226_v12, 0 }
 0x62e   :  { %1033 = vmatpush.bf16.msrb.mxu2 %v1024_v13 }
 0x634   :  { %v810_v14 = vpop.f32.mrf.mxu2 }
 0x635   :  { %v817_v15 = vsel %vm500_vm2, %v810_v14, -inf }
 0x636   :  { %818 = vmax.xlane.f32.xlu2 %v817_v15 }
 0x63c   :  { %v812_v16 = vpop.f32.mrf.mxu2 }
 0x644   :  { %v924_v17 = vpop.f32.mrf.mxu2 }
 0x645   :  { %v951_v18 = vsel %vm500_vm2, %v924_v17, -inf }
 0x646   :  { %952 = vmax.xlane.f32.xlu2 %v951_v18  ;;  %v2405_v18 = vld [vmem:[#allocation5] ss:$0 sm:$0xff] }
 0x64c   :  { %v926_v19 = vpop.f32.mrf.mxu2 }
 0x662   :  { %v828_v22 = vpop.xlane.xlu0 %827 }
 0x663   :  { %2439 = vrcp.f32 %v828_v22 }
 0x669   :  { %v2440_v23 = vpop.eup %2439 }
 0x66a   :  { %v834_v24 = vmul.f32 %v2440_v23, %v2438_v5 }
 0x66c   :  { %v836_v25 = vpack.c.bf16 %v834_v24, %v834_v24 }
 0x66e   :  { %2218 = vmatmul.msk.bf16.vlgmr.msrb.gmra.mxu3 %vm500_vm2, %v836_v25 }
 0x67e   :  { %2223 = vmatmul.msk.bf16.vlgmr.msra.gmra.mxu3 %vm500_vm2, %v929_v63 }
 0x693   :  { %v763_v27 = vpop.f32.mrf.mxu0 }
 0x69b   :  { %v765_v63 = vpop.f32.mrf.mxu0 }
 0x6a9   :  { %v819_v26 = vpop.xlane.xlu2 %818 }
 0x6aa   :  { %v821_v29 = vsub.f32 %v810_v14, %v819_v26  ;;  %v743_v30 = vpop.f32.mrf.mxu3 }
 0x6ab   :  { %v3365_v31 = vadd.f32 %v763_v27, %v743_v30 }
 0x6ac   :  { %v824_v32 = vmul.f32 1.442695, %v821_v29 }
 0x6ae   :  { %2441 = vpow2.f32 %v824_v32 }
 0x6b2   :  { %v3369_v41 = vpop.f32.mrf.mxu3 }
 0x6b3   :  { %v766_v24 = vadd.f32 %v765_v63, %v3369_v41 }
 0x6b4   :  { %v2442_v34 = vpop.eup %2441 }
 0x6b5   :  { %v829_v35 = vsel %vm500_vm2, %v2442_v34, 0.0 }
 0x6b6   :  { %830 = vadd.xlane.f32.xlu0 %v829_v35  ;;  %v3018_v35 = vmov 32.0  }
 0x6b9   :  { %v953_v36 = vpop.xlane.xlu2 %952 }
 0x6ba   :  { %v957_v37 = vsub.f32 %v924_v17, %v953_v36 }
 0x6bc   :  { %v959_v38 = vmul.f32 1.442695, %v957_v37 }
 0x6be   :  { %2443 = vpow2.f32 %v959_v38 }
 0x6c4   :  { %v2444_v39 = vpop.eup %2443 }
 0x6c5   :  { %v963_v40 = vsel %vm500_vm2, %v2444_v39, 0.0 }
 0x6c6   :  { %964 = vadd.xlane.f32.xlu1 %v963_v40 }
 0x6f1   :  { %v855_v42 = vpop.f32.mrf.mxu3 }
 0x6f9   :  { %v857_v43 = vpop.f32.mrf.mxu3 }
 0x701   :  { %v947_v44 = vpop.f32.mrf.mxu3 }
 0x702   :  { %v954_v45 = vsel %vm500_vm2, %v947_v44, -inf }
 0x703   :  { %955 = vmax.xlane.f32.xlu0 %v954_v45 }
 0x709   :  { %v949_v46 = vpop.f32.mrf.mxu3 }
 0x717   :  { %975 = vrot.lane.b32.xlu0 %v3268_v28, %s3017_s18 }
 0x729   :  { %v831_v47 = vpop.xlane.xlu0 %830 }
 0x72a   :  { %2445 = vrcp.f32 %v831_v47 }
 0x730   :  { %v2446_v48 = vpop.eup %2445 }
 0x731   :  { %v835_v49 = vmul.f32 %v2446_v48, %v2442_v34 }
 0x733   :  { %v837_v50 = vpack.c.bf16 %v835_v49, %v835_v49 }
 0x735   :  { %2219 = vmatmul.msk.bf16.vlgmr.msra.gmra.mxu0 %vm500_vm2, %v837_v50  ;;  %v2324_v50 = vld [vmem:[%s3608_s30 + $0x8] sm:$0xff] }
 0x736   :  { %1143 = vmatpush.bf16.msrb.mxu3 %v2324_v50 }
 0x739   :  { %v965_v54 = vpop.xlane.xlu1 %964 }
 0x776   :  { %v956_v51 = vpop.xlane.xlu0 %955 }
 0x777   :  { %v958_v52 = vsub.f32 %v947_v44, %v956_v51 }
 0x779   :  { %v961_v53 = vmul.f32 1.442695, %v958_v52 }
 0x77b   :  { %2447 = vpow2.f32 %v961_v53 }
 0x77c   :  { %2449 = vrcp.f32 %v965_v54  ;;  %v2323_v54 = vld [vmem:[%s3608_s30] sm:$0xff] }
 0x77d   :  { %1144 = vmatpush.bf16.msrb.mxu3 %v2323_v54 }
 0x781   :  { %v2448_v55 = vpop.eup %2447 }
 0x782   :  { %v966_v56 = vsel %vm500_vm2, %v2448_v55, 0.0  ;;  %v2450_v57 = vpop.eup %2449 }
 0x783   :  { %967 = vadd.xlane.f32.xlu2 %v966_v56  ;;  %v971_v28 = vmul.f32 %v2450_v57, %v2444_v39 }
 0x785   :  { %v973_v60 = vpack.c.bf16 %v971_v28, %v971_v28 }
 0x789   :  { %v976_v58 = vpop.permute.xlu0 %975 }
 0x78a   :  { %v981_v59 = vsel %vm573_vm3, %v976_v58, 0 }
 0x78b   :  { %990 = vmatpush.bf16.msrb.mxu0 %v981_v59 }
 0x78e   :  { %2224 = vmatmul.msk.bf16.vlgmr.msrb.gmra.mxu0 %vm500_vm2, %v973_v60 }
 0x79b   :  { %996 = vrot.lane.b32.xlu2 %v3274_v33, %s3017_s18 }
 0x7b2   :  { %v876_v0 = vpop.f32.mrf.mxu0 }
 0x7b3   :  { %v880_v1 = vpack.c.bf16 %v876_v0, %v855_v42 }
 0x7b5   :  { %2221 = vmatmul.msk.bf16.vlgmr.msra.gmra.mxu1 %vm500_vm2, %v880_v1 }
 0x7ba   :  { %v878_v2 = vpop.f32.mrf.mxu0 }
 0x7f6   :  { %v968_v3 = vpop.xlane.xlu2 %967 }
 0x7f7   :  { %2451 = vrcp.f32 %v968_v3 }
 0x7f8   :  { %2453 = vrcp.f32 %v3018_v35 }
 0x7fd   :  { %v2452_v4 = vpop.eup %2451 }
 0x7fe   :  { %v972_v5 = vmul.f32 %v2452_v4, %v2448_v55  ;;  %v997_v6 = vpop.permute.xlu2 %996  ;;  %v2454_v36 = vpop.eup %2453 }
 0x7ff   :  { %v1002_v7 = vsel %vm573_vm3, %v997_v6, 0  ;;  %v1057_v37 = vmul.f32 32.0, %v2454_v36  ;;  %vm1061_vm4 = vweird.f32 %v2454_v36 }
 0x800   :  { %v974_v8 = vpack.c.bf16 %v972_v5, %v972_v5  ;;  %1011 = vmatpush.bf16.msrb.mxu1 %v1002_v7  ;;  %v2406_v5 = vld [vmem:[#allocation7] ss:$0 sm:$0xff] }
 0x801   :  { %v1058_v38 = vsub.f32 1.0, %v1057_v37 }
 0x803   :  { %2225 = vmatmul.msk.bf16.vlgmr.msrb.gmra.mxu1 %vm500_vm2, %v974_v8  ;;  %v1059_v39 = vmul.f32 %v2454_v36, %v1058_v38 }
 0x80b   :  { %v992_v9 = vpop.f32.mrf.mxu0 }
 0x813   :  { %v994_v33 = vpop.f32.mrf.mxu0 }
 0x832   :  { %v898_v10 = vpop.f32.mrf.mxu1 }
 0x833   :  { %v903_v11 = vadd.f32 %v898_v10, %v3365_v31 }
 0x83a   :  { %v900_v14 = vpop.f32.mrf.mxu1 }
 0x83b   :  { %v904_v26 = vadd.f32 %v900_v14, %v766_v24 }
 0x880   :  { %v1013_v15 = vpop.f32.mrf.mxu1 }
 0x881   :  { %v1017_v16 = vpack.c.bf16 %v1013_v15, %v992_v9  ;;  %v2407_v9 = vld [vmem:[#allocation8] ss:$0 sm:$0xff]  ;;  %v2328_v15 = vld [vmem:[%s3609_s8 + $0x18] sm:$0xff] }
 0x882   :  { %1198 = vmatpush.bf16.msra.mxu0 %v2328_v15 }
 0x883   :  { %2227 = vmatmul.msk.bf16.vlgmr.msrb.gmra.mxu2 %vm500_vm2, %v1017_v16  ;;  %v2327_v16 = vld [vmem:[%s3609_s8 + $0x10] sm:$0xff] }
 0x886   :  { %1199 = vmatpush.bf16.msra.mxu0 %v2327_v16 }
 0x888   :  { %v1015_v17 = vpop.f32.mrf.mxu1 }
 0x889   :  { %v2326_v17 = vld [vmem:[%s3609_s8 + $0x8] sm:$0xff] }
 0x88a   :  { %1200 = vmatpush.bf16.msra.mxu0 %v2326_v17 }
 0x906   :  { %v1035_v19 = vpop.f32.mrf.mxu2 }
 0x907   :  { %v1040_v22 = vadd.f32 %v1035_v19, %v903_v11 }
 0x909   :  { %v1046_v23 = vadd.f32 %v2405_v18, %v1040_v22  ;;  %v2408_v22 = vld [vmem:[#allocation10] ss:$0 sm:$0xff] }
 0x90b   :  { %v1048_v25 = vadd.f32 %v1046_v23, %v3261_v20  ;;  %v1060_v20 = vadd.f32 %v2454_v36, %v1059_v39 }
 0x90d   :  { %v1050_v27 = vsel %vm437_vm1, %v1048_v25, 0.0  ;;  %v3394_v40 = vsel %vm1061_vm4, %v2454_v36, %v1060_v20 }
 0x90e   :  { %1051 = vadd.xlane.f32.xlu0 %v1050_v27  ;;  %v1037_v29 = vpop.f32.mrf.mxu2 }
 0x90f   :  { %v1041_v30 = vadd.f32 %v1037_v29, %v904_v26 }
 0x911   :  { %v1047_v31 = vadd.f32 %v2405_v18, %v1041_v30  ;;  %v2325_v18 = vld [vmem:[%s3609_s8] sm:$0xff]  ;;  %v2409_v30 = vld [vmem:[#allocation11] ss:$0 sm:$0xff] }
 0x912   :  { %1201 = vmatpush.bf16.msra.mxu0 %v2325_v18 }
 0x913   :  { %v1049_v32 = vadd.f32 %v1047_v31, %v3263_v21 }
 0x915   :  { %v1053_v34 = vsel %vm437_vm1, %v1049_v32, 0.0 }
 0x916   :  { %1054 = vadd.xlane.f32.xlu2 %v1053_v34 }
 0x981   :  { %v1052_v41 = vpop.xlane.xlu0 %1051 }
 0x982   :  { %v1063_v42 = vmul.f32 %v3394_v40, %v1052_v41 }
 0x984   :  { %v1065_v43 = vsub.f32 %v1048_v25, %v1063_v42 }
 0x986   :  { %v1067_v21 = vmul.f32 %v1065_v43, %v1065_v43 }
 0x988   :  { %v1069_v44 = vsel %vm437_vm1, %v1067_v21, 0.0 }
 0x989   :  { %1070 = vadd.xlane.f32.xlu1 %v1069_v44  ;;  %v1055_v45 = vpop.xlane.xlu2 %1054 }
 0x98a   :  { %v1064_v46 = vmul.f32 %v3394_v40, %v1055_v45 }
 0x98c   :  { %v1066_v47 = vsub.f32 %v1049_v32, %v1064_v46 }
 0x98e   :  { %v1068_v48 = vmul.f32 %v1066_v47, %v1066_v47 }
 0x990   :  { %v1072_v49 = vsel %vm437_vm1, %v1068_v48, 0.0 }
 0x991   :  { %1073 = vadd.xlane.f32.xlu1 %v1072_v49  ;;  %v2330_v49 = vld [vmem:[%s3610_s22 + $0x8] sm:$0xff] }
 0x992   :  { %1296 = vmatpush.bf16.msra.mxu1 %v2330_v49 }
 0x9fc   :  { %v1071_v51 = vpop.xlane.xlu1 %1070 }
 0x9fd   :  { %v1075_v52 = vmul.f32 %v1071_v51, %v3394_v40 }
 0x9ff   :  { %v1077_v53 = vadd.f32 1e-05, %v1075_v52 }
 0xa01   :  { %2455 = vrsqrt.f32 %v1077_v53  ;;  %vm1085_vm6 = vweird.f32 %v1077_v53 }
 0xa04   :  { %v1074_v55 = vpop.xlane.xlu1 %1073 }
 0xa05   :  { %v1076_v56 = vmul.f32 %v1074_v55, %v3394_v40 }
 0xa07   :  { %v2456_v57 = vpop.eup %2455  ;;  %v1078_v28 = vadd.f32 1e-05, %v1076_v56 }
 0xa08   :  { %v1080_v58 = vmul.f32 %v2456_v57, %v1077_v53  ;;  %vm1086_vm5 = vweird.f32 %v2456_v57  ;;  %v2329_v53 = vld [vmem:[%s3610_s22] sm:$0xff] }
 0xa09   :  { %2457 = vrsqrt.f32 %v1078_v28  ;;  %vm1087_vm7 = vmor %vm1085_vm6, %vm1086_vm5  ;;  %vm1095_vm9 = vweird.f32 %v1078_v28  ;;  %1297 = vmatpush.bf16.msra.mxu1 %v2329_v53 }
 0xa0a   :  { %v1081_v59 = vmul.f32 %v2456_v57, %v1080_v58 }
 0xa0c   :  { %v1082_v60 = vmul.f32 0.5, %v1081_v59 }
 0xa0e   :  { %v1083_v61 = vsub.f32 1.5, %v1082_v60 }
 0xa0f   :  { %v2458_v62 = vpop.eup %2457 }
 0xa10   :  { %v1084_v63 = vmul.f32 %v2456_v57, %v1083_v61  ;;  %v1090_v0 = vmul.f32 %v2458_v62, %v1078_v28  ;;  %vm1096_vm8 = vweird.f32 %v2458_v62 }
 0xa11   :  { %vm1097_vm10 = vmor %vm1095_vm9, %vm1096_vm8 }
 0xa12   :  { %v1091_v1 = vmul.f32 %v2458_v62, %v1090_v0  ;;  %v1088_v2 = vsel %vm1087_vm7, %v2456_v57, %v1084_v63 }
 0xa13   :  { %v1099_v6 = vmul.f32 %v1088_v2, %v1065_v43 }
 0xa14   :  { %v1092_v3 = vmul.f32 0.5, %v1091_v1 }
 0xa15   :  { %v1105_v33 = vmul.f32 %v2406_v5, %v1099_v6 }
 0xa16   :  { %v1093_v4 = vsub.f32 1.5, %v1092_v3 }
 0xa17   :  { %v1111_v12 = vadd.f32 %v2407_v9, %v1105_v33 }
 0xa18   :  { %v1094_v7 = vmul.f32 %v2458_v62, %v1093_v4  ;;  %v2410_v4 = vld [vmem:[#allocation13] ss:$0 sm:$0xff] }
 0xa1a   :  { %v1098_v8 = vsel %vm1097_vm10, %v2458_v62, %v1094_v7 }
 0xa1b   :  { %v1100_v10 = vmul.f32 %v1098_v8, %v1066_v47  ;;  %v2411_v8 = vld [vmem:[#allocation14] ss:$0 sm:$0xff] }
 0xa1d   :  { %v1106_v11 = vmul.f32 %v2406_v5, %v1100_v10 }
 0xa1f   :  { %v1112_v13 = vadd.f32 %v2407_v9, %v1106_v11 }
 0xa21   :  { %v1113_v14 = vpack.c.bf16 %v1112_v13, %v1111_v12 }
 0xa23   :  { %2236 = vmatmul.msk.bf16.vlgmr.msrb.gmra.mxu3 %vm437_vm1, %v1113_v14  ;;  %v2412_v14 = vld [vmem:[#allocation16] ss:$0 sm:$0xff] }
 0xaa6   :  { %v1146_v19 = vpop.f32.mrf.mxu3 }
 0xaa7   :  { %v1147_v23 = vadd.f32 %v2408_v22, %v1146_v19 }
 0xaa9   :  { %v1151_v26 = vmax.f32 %v1147_v23, 0.0 }
 0xaae   :  { %v1148_v24 = vpop.f32.mrf.mxu3 }
 0xaaf   :  { %v1149_v25 = vadd.f32 %v2408_v22, %v1148_v24 }
 0xab1   :  { %v1152_v27 = vmax.f32 %v1149_v25, 0.0 }
 0xab3   :  { %v1153_v29 = vpack.c.bf16 %v1152_v27, %v1151_v26 }
 0xab5   :  { %2253 = vmatmul.msk.bf16.vlgmr.msra.gmra.mxu0 %vm1190_vm11, %v1153_v29 }
 0xb32   :  { %v1203_v31 = vpop.f32.mrf.mxu0 }
 0xb33   :  { %v1204_v32 = vadd.f32 %v2409_v30, %v1203_v31 }
 0xb35   :  { %v1208_v34 = vadd.f32 %v1204_v32, %v1111_v12 }
 0xb37   :  { %v1210_v35 = vsel %vm437_vm1, %v1208_v34, 0.0 }
 0xb38   :  { %1211 = vadd.xlane.f32.xlu1 %v1210_v35 }
 0xb3a   :  { %v1205_v36 = vpop.f32.mrf.mxu0 }
 0xb3b   :  { %v1206_v37 = vadd.f32 %v2409_v30, %v1205_v36 }
 0xb3d   :  { %v1209_v38 = vadd.f32 %v1206_v37, %v1112_v13 }
 0xb3f   :  { %v1213_v39 = vsel %vm437_vm1, %v1209_v38, 0.0 }
 0xb40   :  { %1214 = vadd.xlane.f32.xlu1 %v1213_v39 }
 0xbab   :  { %v1212_v20 = vpop.xlane.xlu1 %1211 }
 0xbac   :  { %v1216_v41 = vmul.f32 %v1212_v20, %v3394_v40 }
 0xbae   :  { %v1218_v42 = vsub.f32 %v1208_v34, %v1216_v41 }
 0xbb0   :  { %v1220_v43 = vmul.f32 %v1218_v42, %v1218_v42 }
 0xbb2   :  { %v1222_v21 = vsel %vm437_vm1, %v1220_v43, 0.0 }
 0xbb3   :  { %1223 = vadd.xlane.f32.xlu0 %v1222_v21  ;;  %v1215_v44 = vpop.xlane.xlu1 %1214 }
 0xbb4   :  { %v1217_v45 = vmul.f32 %v1215_v44, %v3394_v40 }
 0xbb6   :  { %v1219_v46 = vsub.f32 %v1209_v38, %v1217_v45 }
 0xbb8   :  { %v1221_v47 = vmul.f32 %v1219_v46, %v1219_v46 }
 0xbba   :  { %v1225_v48 = vsel %vm437_vm1, %v1221_v47, 0.0 }
 0xbbb   :  { %1226 = vadd.xlane.f32.xlu1 %v1225_v48 }
 0xc26   :  { %v1224_v50 = vpop.xlane.xlu0 %1223 }
 0xc27   :  { %v1228_v51 = vmul.f32 %v1224_v50, %v3394_v40 }
 0xc29   :  { %v1230_v52 = vadd.f32 1e-05, %v1228_v51 }
 0xc2b   :  { %2459 = vrsqrt.f32 %v1230_v52  ;;  %vm1238_vm13 = vweird.f32 %v1230_v52 }
 0xc2e   :  { %v1227_v54 = vpop.xlane.xlu1 %1226 }
 0xc2f   :  { %v1229_v55 = vmul.f32 %v1227_v54, %v3394_v40 }
 0xc31   :  { %v2460_v56 = vpop.eup %2459  ;;  %v1231_v57 = vadd.f32 1e-05, %v1229_v55 }
 0xc32   :  { %v1233_v28 = vmul.f32 %v2460_v56, %v1230_v52  ;;  %vm1239_vm12 = vweird.f32 %v2460_v56 }
 0xc33   :  { %2461 = vrsqrt.f32 %v1231_v57  ;;  %vm1240_vm14 = vmor %vm1238_vm13, %vm1239_vm12  ;;  %vm1248_vm0 = vweird.f32 %v1231_v57 }
 0xc34   :  { %v1234_v58 = vmul.f32 %v2460_v56, %v1233_v28 }
 0xc36   :  { %v1235_v59 = vmul.f32 0.5, %v1234_v58 }
 0xc38   :  { %v1236_v60 = vsub.f32 1.5, %v1235_v59 }
 0xc39   :  { %v2462_v61 = vpop.eup %2461 }
 0xc3a   :  { %v1237_v62 = vmul.f32 %v2460_v56, %v1236_v60  ;;  %v1243_v63 = vmul.f32 %v2462_v61, %v1231_v57  ;;  %vm1249_vm15 = vweird.f32 %v2462_v61 }
 0xc3b   :  { %vm1250_vm4 = vmor %vm1248_vm0, %vm1249_vm15  ;;  %vm2104_vm0 = vcmask 1041409  }
 0xc3c   :  { %v1244_v0 = vmul.f32 %v2462_v61, %v1243_v63  ;;  %v1241_v1 = vsel %vm1240_vm14, %v2460_v56, %v1237_v62 }
 0xc3d   :  { %v1252_v5 = vmul.f32 %v1241_v1, %v1218_v42 }
 0xc3e   :  { %v1245_v2 = vmul.f32 0.5, %v1244_v0 }
 0xc3f   :  { %v1258_v9 = vmul.f32 %v2410_v4, %v1252_v5 }
 0xc40   :  { %v1246_v3 = vsub.f32 1.5, %v1245_v2 }
 0xc41   :  { %v3420_v11 = vadd.f32 %v2411_v8, %v1258_v9 }
 0xc42   :  { %v1247_v6 = vmul.f32 %v2462_v61, %v1246_v3 }
 0xc44   :  { %v1251_v7 = vsel %vm1250_vm4, %v2462_v61, %v1247_v6  ;;  %vm2135_vm4 = vcmask 1024  }
 0xc45   :  { %v1253_v33 = vmul.f32 %v1251_v7, %v1219_v46 }
 0xc47   :  { %v1259_v10 = vmul.f32 %v2410_v4, %v1253_v33 }
 0xc49   :  { %v3422_v12 = vadd.f32 %v2411_v8, %v1259_v10 }
 0xc4b   :  { %v1266_v13 = vpack.c.bf16 %v3422_v12, %v3420_v11 }
 0xc4d   :  { %2262 = vmatmul.msk.bf16.vlgmr.msra.gmra.mxu1 %vm437_vm1, %v1266_v13 }
 0xcca   :  { %v1299_v15 = vpop.f32.mrf.mxu1 }
 0xccb   :  { %v1300_v16 = vadd.f32 %v2412_v14, %v1299_v15 }
 0xccd   :  { %v1304_v17 = vpack.c.bf16 %v1300_v16, %v1300_v16 }
 0xccf   :  { %v1307_v18 = vunpack.c.l.b16 %v1304_v17 }
 0xcd1   :  { %v3427_v19 = vpack.c.b16 %v1307_v18, %v1307_v18 }
 0xcd2   :  { %v1301_v22 = vpop.f32.mrf.mxu1 }
 0xcd3   :  { %v1302_v23 = vadd.f32 %v2412_v14, %v1301_v22  ;;  %1422 = vrot.lane.b32.xlu1 %v3427_v19, %s3008_s7  ;;  %1424 = vrot.lane.b32.xlu2 %v3427_v19, %s3010_s4 }
 0xcd4   :  { %1309 = vrot.lane.b32.xlu0 %v3427_v19, %s3009_s12 }
 0xcd5   :  { %v1305_v24 = vpack.c.bf16 %v1302_v23, %v1302_v23 }
 0xcd7   :  { %v1331_v25 = vunpack.c.l.b16 %v1305_v24 }
 0xcd9   :  { %v3435_v26 = vpack.c.b16 %v1331_v25, %v1331_v25 }
 0xcdb   :  { %1447 = vrot.lane.b32.xlu2 %v3435_v26, %s3010_s4 }
 0xcdc   :  { %1333 = vrot.lane.b32.xlu0 %v3435_v26, %s3009_s12 }
 0xce4   :  { %1445 = vrot.lane.b32.xlu0 %v3435_v26, %s3008_s7 }
 0xd2d   :  { %v1425_v27 = vpop.permute.xlu2 %1424 }
 0xd2e   :  { %v1430_v31 = vsel %vm500_vm2, %v1425_v27, 0 }
 0xd35   :  { %v1448_v32 = vpop.permute.xlu2 %1447 }
 0xd36   :  { %v1453_v36 = vsel %vm500_vm2, %v1448_v32, 0 }
 0xd45   :  { %v1423_v37 = vpop.permute.xlu1 %1422 }
 0xd46   :  { %v1310_v29 = vpop.permute.xlu0 %1309 }
 0xd47   :  { %v1315_v30 = vsel %vm500_vm2, %v1310_v29, 0 }
 0xd48   :  { %1324 = vmatpush.bf16.xpose.msra.mxu2 %v1315_v30 }
 0xd4e   :  { %v1334_v34 = vpop.permute.xlu0 %1333 }
 0xd4f   :  { %v1339_v35 = vsel %vm500_vm2, %v1334_v34, 0  ;;  %2263 = vmatmul.msk.bf16.vlgmr.msra.gmra.mxu2 %vm500_vm2, %v1304_v17 }
 0xd50   :  { %1439 = vmatpush.bf16.xpose.msrb.mxu2 %v1430_v31  ;;  %1348 = vmatpush.bf16.xpose.msra.mxu3 %v1339_v35 }
 0xd56   :  { %v1446_v38 = vpop.permute.xlu0 %1445 }
 0xd57   :  { %2264 = vmatmul.msk.bf16.vlgmr.msra.gmra.mxu3 %vm500_vm2, %v1305_v24  ;;  %v1536_v24 = vld [vmem:[#allocation17 + $0x4] sm:$0xf] }
 0xd58   :  { %1462 = vmatpush.bf16.xpose.msrb.mxu3 %v1453_v36  ;;  %v1541_v25 = vsel %vm573_vm3, %v1536_v24, 0 }
 0xd59   :  { %1550 = vmatpush.bf16.msra.mxu2 %v1541_v25 }
 0xd5f   :  { %2267 = vmatmul.msk.bf16.vlgmr.msrb.gmra.mxu2 %vm500_vm2, %v1423_v37 }
 0xd67   :  { %2268 = vmatmul.msk.bf16.vlgmr.msrb.gmra.mxu3 %vm500_vm2, %v1446_v38 }
 0xdd2   :  { %v1326_v39 = vpop.f32.mrf.mxu2 }
 0xdd3   :  { %v1354_v20 = vsel %vm500_vm2, %v1326_v39, -inf }
 0xdd4   :  { %1355 = vmax.xlane.f32.xlu1 %v1354_v20 }
 0xdda   :  { %v1328_v41 = vpop.f32.mrf.mxu2  ;;  %v3452_v42 = vpop.f32.mrf.mxu3 }
 0xddb   :  { %v1357_v61 = vsel %vm500_vm2, %v3452_v42, -inf }
 0xde2   :  { %v1352_v43 = vpop.f32.mrf.mxu3  ;;  %v1441_v21 = vpop.f32.mrf.mxu2 }
 0xde3   :  { %v1468_v44 = vsel %vm500_vm2, %v1441_v21, -inf }
 0xde4   :  { %1469 = vmax.xlane.f32.xlu2 %v1468_v44 }
 0xdea   :  { %v1443_v45 = vpop.f32.mrf.mxu2  ;;  %v1464_v46 = vpop.f32.mrf.mxu3 }
 0xdeb   :  { %v1471_v48 = vsel %vm500_vm2, %v1464_v46, -inf }
 0xded   :  { %1378 = vrot.lane.b32.xlu1 %v3427_v19, %s2993_s27 }
 0xdf2   :  { %v1466_v47 = vpop.f32.mrf.mxu3 }
 0xdf5   :  { %1577 = vrot.lane.b32.xlu1 %v3427_v19, %s3012_s3 }
 0xe1f   :  { %1472 = vmax.xlane.f32.xlu1 %v1471_v48 }
 0xe47   :  { %v1356_v49 = vpop.xlane.xlu1 %1355 }
 0xe48   :  { %v1360_v50 = vsub.f32 %v1326_v39, %v1356_v49 }
 0xe4a   :  { %v1362_v51 = vmul.f32 1.442695, %v1360_v50 }
 0xe4c   :  { %2463 = vpow2.f32 %v1362_v51 }
 0xe52   :  { %v2464_v52 = vpop.eup %2463 }
 0xe53   :  { %v1366_v53 = vsel %vm500_vm2, %v2464_v52, 0.0 }
 0xe54   :  { %1367 = vadd.xlane.f32.xlu0 %v1366_v53 }
 0xe57   :  { %v1470_v54 = vpop.xlane.xlu2 %1469 }
 0xe58   :  { %v1474_v55 = vsub.f32 %v1441_v21, %v1470_v54 }
 0xe5a   :  { %v1476_v56 = vmul.f32 1.442695, %v1474_v55 }
 0xe5c   :  { %2465 = vpow2.f32 %v1476_v56 }
 0xe5f   :  { %v1379_v57 = vpop.permute.xlu1 %1378 }
 0xe60   :  { %v1384_v28 = vsel %vm573_vm3, %v1379_v57, 0 }
 0xe61   :  { %1393 = vmatpush.bf16.msrb.mxu0 %v1384_v28 }
 0xe62   :  { %v2466_v58 = vpop.eup %2465 }
 0xe63   :  { %v1480_v59 = vsel %vm500_vm2, %v2466_v58, 0.0 }
 0xe64   :  { %1481 = vadd.xlane.f32.xlu2 %v1480_v59 }
 0xe67   :  { %v1578_v60 = vpop.permute.xlu1 %1577 }
 0xe68   :  { %1492 = vrot.lane.b32.xlu0 %v3427_v19, %s3011_s10 }
 0xe7c   :  { %1579 = vrot.lane.b32.xlu2 %v3427_v19, %s3013_s14 }
 0xe92   :  { %1358 = vmax.xlane.f32.xlu0 %v1357_v61  ;;  %v1473_v62 = vpop.xlane.xlu1 %1472 }
 0xe93   :  { %v1475_v63 = vsub.f32 %v1464_v46, %v1473_v62 }
 0xe95   :  { %v1478_v0 = vmul.f32 1.442695, %v1475_v63 }
 0xe97   :  { %2467 = vpow2.f32 %v1478_v0 }
 0xe9d   :  { %v3469_v1 = vpop.eup %2467 }
 0xe9e   :  { %v1483_v2 = vsel %vm500_vm2, %v3469_v1, 0.0 }
 0xe9f   :  { %1484 = vadd.xlane.f32.xlu1 %v1483_v2 }
 0xea6   :  { %1399 = vrot.lane.b32.xlu0 %v3435_v26, %s2993_s27  ;;  %s3611_s27 = sld [smem:[#allocation53_spill]] }
 0xeae   :  { %1600 = vrot.lane.b32.xlu0 %v3435_v26, %s3012_s3 }
 0xeb8   :  { %1602 = vrot.lane.b32.xlu1 %v3435_v26, %s3013_s14 }
 0xec0   :  { %1647 = vrot.lane.b32.xlu1 %v3427_v19, %s3014_s11 }
 0xec7   :  { %v1368_v3 = vpop.xlane.xlu0 %1367 }
 0xec8   :  { %2469 = vrcp.f32 %v1368_v3  ;;  %1716 = vrot.lane.b32.xlu1 %v3427_v19, %s3015_s16 }
 0xece   :  { %v2470_v4 = vpop.eup %2469 }
 0xecf   :  { %v1374_v5 = vmul.f32 %v2470_v4, %v2464_v52 }
 0xed0   :  { %1739 = vrot.lane.b32.xlu1 %v3435_v26, %s3015_s16 }
 0xed1   :  { %v1376_v6 = vpack.c.bf16 %v1374_v5, %v1374_v5 }
 0xed3   :  { %2265 = vmatmul.msk.bf16.vlgmr.msrb.gmra.mxu0 %vm500_vm2, %v1376_v6 }
 0xed7   :  { %v1482_v7 = vpop.xlane.xlu2 %1481 }
 0xed8   :  { %2471 = vrcp.f32 %v1482_v7  ;;  %1714 = vrot.lane.b32.xlu1 %v3427_v19, %s3016_s15 }
 0xeda   :  { %v1493_v8 = vpop.permute.xlu0 %1492 }
 0xedb   :  { %v1498_v9 = vsel %vm573_vm3, %v1493_v8, 0 }
 0xedc   :  { %1507 = vmatpush.bf16.msra.mxu0 %v1498_v9 }
 0xede   :  { %v2472_v33 = vpop.eup %2471 }
 0xedf   :  { %v1488_v10 = vmul.f32 %v2472_v33, %v2466_v58  ;;  %v1580_v13 = vpop.permute.xlu2 %1579  ;;  %v1421_v58 = vld [vmem:[#allocation17] sm:$0xf] }
 0xee0   :  { %v1585_v14 = vsel %vm500_vm2, %v1580_v13, 0  ;;  %v1561_v59 = vsel %vm573_vm3, %v1421_v58, 0 }
 0xee1   :  { %v1490_v15 = vpack.c.bf16 %v1488_v10, %v1488_v10  ;;  %1594 = vmatpush.bf16.xpose.msrb.mxu0 %v1585_v14  ;;  %1570 = vmatpush.bf16.msra.mxu3 %v1561_v59 }
 0xee3   :  { %2269 = vmatmul.msk.bf16.vlgmr.msra.gmra.mxu0 %vm500_vm2, %v1490_v15 }
 0xef3   :  { %2273 = vmatmul.msk.bf16.vlgmr.msrb.gmra.mxu0 %vm500_vm2, %v1578_v60 }
 0xf05   :  { %v1359_v16 = vpop.xlane.xlu0 %1358 }
 0xf06   :  { %v1361_v17 = vsub.f32 %v3452_v42, %v1359_v16 }
 0xf08   :  { %v1364_v18 = vmul.f32 1.442695, %v1361_v17 }
 0xf0a   :  { %2473 = vpow2.f32 %v1364_v18 }
 0xf10   :  { %v2474_v22 = vpop.eup %2473 }
 0xf11   :  { %v1369_v23 = vsel %vm500_vm2, %v2474_v22, 0.0 }
 0xf12   :  { %1370 = vadd.xlane.f32.xlu2 %v1369_v23  ;;  %v1485_v30 = vpop.xlane.xlu1 %1484 }
 0xf18   :  { %v1400_v27 = vpop.permute.xlu0 %1399 }
 0xf19   :  { %v1405_v29 = vsel %vm573_vm3, %v1400_v27, 0  ;;  %v1691_v27 = vld [vmem:[#allocation17 + $0x8] sm:$0xf] }
 0xf1a   :  { %1414 = vmatpush.bf16.msrb.mxu1 %v1405_v29  ;;  %v1696_v29 = vsel %vm573_vm3, %v1691_v27, 0 }
 0xf1b   :  { %1705 = vmatpush.bf16.msra.mxu0 %v1696_v29 }
 0xf20   :  { %v1601_v53 = vpop.permute.xlu0 %1600 }
 0xf2a   :  { %v1603_v31 = vpop.permute.xlu1 %1602  ;;  %1513 = vrot.lane.b32.xlu2 %v3435_v26, %s3011_s10 }
 0xf2b   :  { %v1608_v47 = vsel %vm500_vm2, %v1603_v31, 0 }
 0xf32   :  { %v1648_v32 = vpop.permute.xlu1 %1647 }
 0xf33   :  { %v1653_v34 = vsel %vm573_vm3, %v1648_v32, 0 }
 0xf34   :  { %1662 = vmatpush.bf16.msrb.mxu2 %v1653_v34 }
 0xf3a   :  { %v1717_v50 = vpop.permute.xlu1 %1716 }
 0xf3b   :  { %v1722_v52 = vsel %vm500_vm2, %v1717_v50, 0 }
 0xf42   :  { %v1740_v54 = vpop.permute.xlu1 %1739 }
 0xf43   :  { %v1745_v3 = vsel %vm500_vm2, %v1740_v54, 0 }
 0xf4a   :  { %v1715_v55 = vpop.permute.xlu1 %1714 }
 0xf50   :  { %v1395_v35 = vpop.f32.mrf.mxu0 }
 0xf58   :  { %v1397_v36 = vpop.f32.mrf.mxu0 }
 0xf60   :  { %v1509_v37 = vpop.f32.mrf.mxu0 }
 0xf68   :  { %v1511_v38 = vpop.f32.mrf.mxu0 }
 0xf70   :  { %v1596_v39 = vpop.f32.mrf.mxu0 }
 0xf71   :  { %v1623_v20 = vsel %vm500_vm2, %v1596_v39, -inf }
 0xf72   :  { %1624 = vmax.xlane.f32.xlu0 %v1623_v20 }
 0xf78   :  { %v1598_v41 = vpop.f32.mrf.mxu0 }
 0xf85   :  { %v1371_v42 = vpop.xlane.xlu2 %1370 }
 0xf86   :  { %2475 = vrcp.f32 %v1371_v42  ;;  %1737 = vrot.lane.b32.xlu0 %v3435_v26, %s3016_s15 }
 0xf87   :  { %2477 = vrcp.f32 %v1485_v30 }
 0xf8c   :  { %v2476_v43 = vpop.eup %2475 }
 0xf8d   :  { %v1375_v21 = vmul.f32 %v2476_v43, %v2474_v22  ;;  %v1514_v44 = vpop.permute.xlu2 %1513  ;;  %v2478_v48 = vpop.eup %2477 }
 0xf8e   :  { %v1519_v45 = vsel %vm573_vm3, %v1514_v44, 0  ;;  %v1489_v49 = vmul.f32 %v2478_v48, %v3469_v1 }
 0xf8f   :  { %v1377_v46 = vpack.c.bf16 %v1375_v21, %v1375_v21  ;;  %1528 = vmatpush.bf16.msra.mxu1 %v1519_v45 }
 0xf90   :  { %v1491_v51 = vpack.c.bf16 %v1489_v49, %v1489_v49 }
 0xf91   :  { %2266 = vmatmul.msk.bf16.vlgmr.msrb.gmra.mxu1 %vm500_vm2, %v1377_v46 }
 0xf93   :  { %1617 = vmatpush.bf16.xpose.msrb.mxu1 %v1608_v47 }
 0xfa1   :  { %2270 = vmatmul.msk.bf16.vlgmr.msra.gmra.mxu1 %vm500_vm2, %v1491_v51 }
 0xfa2   :  { %1731 = vmatpush.bf16.xpose.msra.mxu1 %v1722_v52 }
 0xfb1   :  { %2274 = vmatmul.msk.bf16.vlgmr.msrb.gmra.mxu1 %vm500_vm2, %v1601_v53 }
 0xfc1   :  { %2278 = vmatmul.msk.bf16.vlgmr.msra.gmra.mxu1 %vm500_vm2, %v1715_v55 }
 0xfe5   :  { %v1625_v56 = vpop.xlane.xlu0 %1624 }
 0xfe6   :  { %v1629_v57 = vsub.f32 %v1596_v39, %v1625_v56 }
 0xfe8   :  { %v1631_v28 = vmul.f32 1.442695, %v1629_v57 }
 0xfea   :  { %2479 = vpow2.f32 %v1631_v28 }
 0xff0   :  { %v2480_v60 = vpop.eup %2479 }
 0xff1   :  { %v1635_v61 = vsel %vm500_vm2, %v2480_v60, 0.0 }
 0xff2   :  { %1636 = vadd.xlane.f32.xlu2 %v1635_v61 }
 0xff8   :  { %v1738_v16 = vpop.permute.xlu0 %1737 }
0x100e   :  { %v1416_v62 = vpop.f32.mrf.mxu1 }
0x100f   :  { %v1420_v63 = vpack.c.bf16 %v1416_v62, %v1395_v35 }
0x1011   :  { %2272 = vmatmul.msk.bf16.vlgmr.msra.gmra.mxu3 %vm500_vm2, %v1420_v63 }
0x1016   :  { %v1418_v0 = vpop.f32.mrf.mxu1 }
0x101e   :  { %v1530_v1 = vpop.f32.mrf.mxu1 }
0x101f   :  { %v1534_v2 = vpack.c.bf16 %v1530_v1, %v1509_v37 }
0x1021   :  { %2271 = vmatmul.msk.bf16.vlgmr.msra.gmra.mxu2 %vm500_vm2, %v1534_v2 }
0x1022   :  { %1754 = vmatpush.bf16.xpose.msra.mxu2 %v1745_v3 }
0x1026   :  { %v1532_v4 = vpop.f32.mrf.mxu1 }
0x102e   :  { %v1619_v5 = vpop.f32.mrf.mxu1 }
0x102f   :  { %v1626_v6 = vsel %vm500_vm2, %v1619_v5, -inf }
0x1030   :  { %1627 = vmax.xlane.f32.xlu1 %v1626_v6 }
0x1036   :  { %v1621_v7 = vpop.f32.mrf.mxu1 }
0x103e   :  { %v1733_v8 = vpop.f32.mrf.mxu1 }
0x103f   :  { %v1760_v9 = vsel %vm500_vm2, %v1733_v8, -inf }
0x1040   :  { %1761 = vmax.xlane.f32.xlu0 %v1760_v9 }
0x1046   :  { %v1735_v33 = vpop.f32.mrf.mxu1 }
0x1054   :  { %1805 = vrot.lane.b32.xlu0 %v3435_v26, %s3017_s18 }
0x1065   :  { %v1637_v10 = vpop.xlane.xlu2 %1636 }
0x1066   :  { %2481 = vrcp.f32 %v1637_v10 }
0x106c   :  { %v2482_v13 = vpop.eup %2481 }
0x106d   :  { %v1643_v14 = vmul.f32 %v2482_v13, %v2480_v60 }
0x106f   :  { %v1645_v15 = vpack.c.bf16 %v1643_v14, %v1643_v14  ;;  %v2413_v14 = vld [vmem:[#allocation19] ss:$0 sm:$0xff] }
0x1071   :  { %2275 = vmatmul.msk.bf16.vlgmr.msrb.gmra.mxu2 %vm500_vm2, %v1645_v15 }
0x1081   :  { %2279 = vmatmul.msk.bf16.vlgmr.msra.gmra.mxu2 %vm500_vm2, %v1738_v16 }
0x1094   :  { %v1572_v18 = vpop.f32.mrf.mxu3 }
0x109c   :  { %v1574_v55 = vpop.f32.mrf.mxu3 }
0x10a3   :  { %v1628_v17 = vpop.xlane.xlu1 %1627 }
0x10a4   :  { %v1630_v22 = vsub.f32 %v1619_v5, %v1628_v17  ;;  %v1552_v23 = vpop.f32.mrf.mxu2  ;;  %v1828_v5 = vld [vmem:[#allocation17 + $0xc] sm:$0xf] }
0x10a5   :  { %v3521_v24 = vadd.f32 %v1572_v18, %v1552_v23  ;;  %v1833_v6 = vsel %vm573_vm3, %v1828_v5, 0  ;;  %v2335_v5 = vld [vmem:[%s3611_s27 + $0x10] sm:$0xff] }
0x10a6   :  { %v1633_v25 = vmul.f32 1.442695, %v1630_v22  ;;  %1842 = vmatpush.bf16.msrb.mxu1 %v1833_v6  ;;  %v2334_v6 = vld [vmem:[%s3611_s27 + $0x8] sm:$0xff] }
0x10a8   :  { %2483 = vpow2.f32 %v1633_v25 }
0x10ac   :  { %v1554_v20 = vpop.f32.mrf.mxu2 }
0x10ad   :  { %v1575_v18 = vadd.f32 %v1574_v55, %v1554_v20 }
0x10ae   :  { %v2484_v30 = vpop.eup %2483 }
0x10af   :  { %v1638_v31 = vsel %vm500_vm2, %v2484_v30, 0.0 }
0x10b0   :  { %1639 = vadd.xlane.f32.xlu2 %v1638_v31 }
0x10b3   :  { %v1762_v32 = vpop.xlane.xlu0 %1761 }
0x10b4   :  { %v1766_v34 = vsub.f32 %v1733_v8, %v1762_v32 }
0x10b6   :  { %v1768_v35 = vmul.f32 1.442695, %v1766_v34 }
0x10b8   :  { %2485 = vpow2.f32 %v1768_v35 }
0x10be   :  { %v2486_v36 = vpop.eup %2485 }
0x10bf   :  { %v1772_v37 = vsel %vm500_vm2, %v2486_v36, 0.0 }
0x10c0   :  { %1773 = vadd.xlane.f32.xlu1 %v1772_v37 }
0x10c6   :  { %v1806_v38 = vpop.permute.xlu0 %1805 }
0x10c7   :  { %v1811_v39 = vsel %vm573_vm3, %v1806_v38, 0 }
0x10c8   :  { %1668 = vrot.lane.b32.xlu2 %v3435_v26, %s3014_s11  ;;  %1820 = vmatpush.bf16.msrb.mxu0 %v1811_v39 }
0x10f4   :  { %v1664_v41 = vpop.f32.mrf.mxu2 }
0x10fc   :  { %v1666_v42 = vpop.f32.mrf.mxu2 }
0x1104   :  { %v1756_v43 = vpop.f32.mrf.mxu2 }
0x1105   :  { %v1763_v21 = vsel %vm500_vm2, %v1756_v43, -inf }
0x1106   :  { %1764 = vmax.xlane.f32.xlu2 %v1763_v21 }
0x110c   :  { %v1758_v44 = vpop.f32.mrf.mxu2 }
0x110d   :  { %v2331_v44 = vld [vmem:[#allocation23] sm:$0xff] }
0x1123   :  { %v1640_v45 = vpop.xlane.xlu2 %1639 }
0x1124   :  { %2487 = vrcp.f32 %v1640_v45 }
0x112a   :  { %v2488_v46 = vpop.eup %2487 }
0x112b   :  { %v1644_v47 = vmul.f32 %v2488_v46, %v2484_v30  ;;  %v1669_v48 = vpop.permute.xlu2 %1668 }
0x112c   :  { %v1674_v49 = vsel %vm573_vm3, %v1669_v48, 0 }
0x112d   :  { %v1646_v50 = vpack.c.bf16 %v1644_v47, %v1644_v47  ;;  %1683 = vmatpush.bf16.msrb.mxu3 %v1674_v49 }
0x1130   :  { %2276 = vmatmul.msk.bf16.vlgmr.msrb.gmra.mxu3 %vm500_vm2, %v1646_v50 }
0x1133   :  { %v1774_v58 = vpop.xlane.xlu1 %1773 }
0x1179   :  { %v1765_v26 = vpop.xlane.xlu2 %1764 }
0x117a   :  { %v1767_v51 = vsub.f32 %v1756_v43, %v1765_v26 }
0x117c   :  { %v1770_v52 = vmul.f32 1.442695, %v1767_v51 }
0x117e   :  { %2489 = vpow2.f32 %v1770_v52 }
0x1184   :  { %v2490_v53 = vpop.eup %2489 }
0x1185   :  { %v1775_v54 = vsel %vm500_vm2, %v2490_v53, 0.0 }
0x1186   :  { %1776 = vadd.xlane.f32.xlu1 %v1775_v54 }
0x119f   :  { %1784 = vrot.lane.b32.xlu1 %v3427_v19, %s3017_s18 }
0x11b3   :  { %v1685_v56 = vpop.f32.mrf.mxu3 }
0x11b4   :  { %v1689_v57 = vpack.c.bf16 %v1685_v56, %v1664_v41 }
0x11b6   :  { %2277 = vmatmul.msk.bf16.vlgmr.msra.gmra.mxu0 %vm500_vm2, %v1689_v57 }
0x11bb   :  { %v1687_v28 = vpop.f32.mrf.mxu3 }
0x11f9   :  { %v1777_v59 = vpop.xlane.xlu1 %1776 }
0x11fa   :  { %2491 = vrcp.f32 %v1777_v59 }
0x11fb   :  { %2493 = vrcp.f32 %v1774_v58  ;;  %v2414_v58 = vld [vmem:[#allocation20] ss:$0 sm:$0xff] }
0x1200   :  { %v2492_v60 = vpop.eup %2491 }
0x1201   :  { %v1781_v61 = vmul.f32 %v2492_v60, %v2490_v53  ;;  %v2494_v63 = vpop.eup %2493 }
0x1202   :  { %v1780_v0 = vmul.f32 %v2494_v63, %v2486_v36 }
0x1203   :  { %v1783_v62 = vpack.c.bf16 %v1781_v61, %v1781_v61 }
0x1204   :  { %v1782_v2 = vpack.c.bf16 %v1780_v0, %v1780_v0 }
0x1205   :  { %2281 = vmatmul.msk.bf16.vlgmr.msrb.gmra.mxu0 %vm500_vm2, %v1783_v62  ;;  %v2415_v62 = vld [vmem:[#allocation22] ss:$0 sm:$0xff] }
0x1211   :  { %v1785_v1 = vpop.permute.xlu1 %1784 }
0x1212   :  { %v1790_v19 = vsel %vm573_vm3, %v1785_v1, 0 }
0x1213   :  { %1799 = vmatpush.bf16.msra.mxu3 %v1790_v19 }
0x1216   :  { %2280 = vmatmul.msk.bf16.vlgmr.msra.gmra.mxu3 %vm500_vm2, %v1782_v2 }
0x1233   :  { %v1707_v3 = vpop.f32.mrf.mxu0 }
0x1234   :  { %v1712_v4 = vadd.f32 %v1707_v3, %v3521_v24 }
0x123b   :  { %v1709_v7 = vpop.f32.mrf.mxu0 }
0x123c   :  { %v1713_v23 = vadd.f32 %v1709_v7, %v1575_v18  ;;  %v2333_v7 = vld [vmem:[%s3611_s27] sm:$0xff] }
0x1282   :  { %v1822_v8 = vpop.f32.mrf.mxu0 }
0x128a   :  { %v1824_v9 = vpop.f32.mrf.mxu0 }
0x128b   :  { %v2416_v9 = vld [vmem:[#allocation25] ss:$0 sm:$0xff] }
0x1299   :  { %v1801_v33 = vpop.f32.mrf.mxu3 }
0x129a   :  { %v1826_v10 = vpack.c.bf16 %v1822_v8, %v1801_v33 }
0x129c   :  { %2282 = vmatmul.msk.bf16.vlgmr.msrb.gmra.mxu1 %vm500_vm2, %v1826_v10 }
0x12a1   :  { %v1803_v13 = vpop.f32.mrf.mxu3 }
0x1319   :  { %v1844_v15 = vpop.f32.mrf.mxu1 }
0x131a   :  { %v1849_v16 = vadd.f32 %v1844_v15, %v1712_v4  ;;  %v2336_v4 = vld [vmem:[%s3611_s27 + $0x18] sm:$0xff] }
0x131b   :  { %1999 = vmatpush.bf16.msrb.mxu3 %v2336_v4 }
0x131c   :  { %v1855_v17 = vadd.f32 %v2413_v14, %v1849_v16 }
0x131e   :  { %v1857_v22 = vadd.f32 %v1855_v17, %v3420_v11  ;;  %v2417_v17 = vld [vmem:[#allocation26] ss:$0 sm:$0xff] }
0x131f   :  { %2000 = vmatpush.bf16.msrb.mxu3 %v2335_v5 }
0x1320   :  { %v1859_v24 = vsel %vm437_vm1, %v1857_v22, 0.0 }
0x1321   :  { %1860 = vadd.xlane.f32.xlu2 %v1859_v24  ;;  %v1846_v25 = vpop.f32.mrf.mxu1 }
0x1322   :  { %v1850_v27 = vadd.f32 %v1846_v25, %v1713_v23 }
0x1323   :  { %2001 = vmatpush.bf16.msrb.mxu3 %v2334_v6 }
0x1324   :  { %v1856_v29 = vadd.f32 %v2413_v14, %v1850_v27 }
0x1326   :  { %v1858_v30 = vadd.f32 %v1856_v29, %v3422_v12  ;;  %v2332_v12 = vld [vmem:[#allocation23 + $0x8] sm:$0xff] }
0x1327   :  { %1945 = vmatpush.bf16.msrb.mxu2 %v2332_v12  ;;  %2002 = vmatpush.bf16.msrb.mxu3 %v2333_v7 }
0x1328   :  { %v1862_v31 = vsel %vm437_vm1, %v1858_v30, 0.0 }
0x1329   :  { %1863 = vadd.xlane.f32.xlu0 %v1862_v31 }
0x132b   :  { %1946 = vmatpush.bf16.msrb.mxu2 %v2331_v44 }
0x1394   :  { %v1861_v32 = vpop.xlane.xlu2 %1860 }
0x1395   :  { %v1865_v34 = vmul.f32 %v1861_v32, %v3394_v40 }
0x1397   :  { %v1867_v35 = vsub.f32 %v1857_v22, %v1865_v34 }
0x1399   :  { %v1869_v36 = vmul.f32 %v1867_v35, %v1867_v35 }
0x139b   :  { %v1871_v37 = vsel %vm437_vm1, %v1869_v36, 0.0 }
0x139c   :  { %1872 = vadd.xlane.f32.xlu2 %v1871_v37  ;;  %v1864_v11 = vpop.xlane.xlu0 %1863 }
0x139d   :  { %v1866_v38 = vmul.f32 %v1864_v11, %v3394_v40 }
0x139f   :  { %v1868_v39 = vsub.f32 %v1858_v30, %v1866_v38 }
0x13a1   :  { %v1870_v20 = vmul.f32 %v1868_v39, %v1868_v39 }
0x13a3   :  { %v1874_v41 = vsel %vm437_vm1, %v1870_v20, 0.0 }
0x13a4   :  { %1875 = vadd.xlane.f32.xlu1 %v1874_v41 }
0x140f   :  { %v1873_v42 = vpop.xlane.xlu2 %1872 }
0x1410   :  { %v1877_v43 = vmul.f32 %v1873_v42, %v3394_v40 }
0x1412   :  { %v1879_v21 = vadd.f32 1e-05, %v1877_v43 }
0x1414   :  { %2495 = vrsqrt.f32 %v1879_v21  ;;  %vm1887_vm3 = vweird.f32 %v1879_v21 }
0x1417   :  { %v1876_v45 = vpop.xlane.xlu1 %1875 }
0x1418   :  { %v1878_v46 = vmul.f32 %v1876_v45, %v3394_v40 }
0x141a   :  { %v2496_v47 = vpop.eup %2495  ;;  %v1880_v48 = vadd.f32 1e-05, %v1878_v46 }
0x141b   :  { %v1882_v49 = vmul.f32 %v2496_v47, %v1879_v21  ;;  %vm1888_vm2 = vweird.f32 %v2496_v47 }
0x141c   :  { %2497 = vrsqrt.f32 %v1880_v48  ;;  %vm1889_vm5 = vmor %vm1887_vm3, %vm1888_vm2  ;;  %vm1897_vm7 = vweird.f32 %v1880_v48 }
0x141d   :  { %v1883_v50 = vmul.f32 %v2496_v47, %v1882_v49  ;;  %v3019_v49 = vmov 8.0  }
0x141f   :  { %v1884_v26 = vmul.f32 0.5, %v1883_v50 }
0x1421   :  { %v1885_v51 = vsub.f32 1.5, %v1884_v26  ;;  %v2338_v26 = vld [vmem:[%s3173_s17 + $0x8] sm:$0xff] }
0x1422   :  { %v2498_v52 = vpop.eup %2497  ;;  %2128 = vmatpush.bf16.msra.mxu0 %v2338_v26 }
0x1423   :  { %v1886_v53 = vmul.f32 %v2496_v47, %v1885_v51  ;;  %v1892_v54 = vmul.f32 %v2498_v52, %v1880_v48  ;;  %vm1898_vm6 = vweird.f32 %v2498_v52 }
0x1424   :  { %vm1899_vm8 = vmor %vm1897_vm7, %vm1898_vm6 }
0x1425   :  { %v1893_v55 = vmul.f32 %v2498_v52, %v1892_v54  ;;  %v1890_v56 = vsel %vm1889_vm5, %v2496_v47, %v1886_v53  ;;  %v2337_v54 = vld [vmem:[%s3173_s17] sm:$0xff] }
0x1426   :  { %v1901_v59 = vmul.f32 %v1890_v56, %v1867_v35  ;;  %2129 = vmatpush.bf16.msra.mxu0 %v2337_v54 }
0x1427   :  { %v1894_v57 = vmul.f32 0.5, %v1893_v55  ;;  %v2418_v55 = vld [vmem:[#allocation28] ss:$0 sm:$0xff] }
0x1428   :  { %v1907_v63 = vmul.f32 %v2414_v58, %v1901_v59 }
0x1429   :  { %v1895_v28 = vsub.f32 1.5, %v1894_v57  ;;  %v2419_v57 = vld [vmem:[#allocation29] ss:$0 sm:$0xff] }
0x142a   :  { %v1913_v19 = vadd.f32 %v2415_v62, %v1907_v63 }
0x142b   :  { %v1896_v60 = vmul.f32 %v2498_v52, %v1895_v28 }
0x142d   :  { %v1900_v61 = vsel %vm1899_vm8, %v2498_v52, %v1896_v60 }
0x142e   :  { %v1902_v0 = vmul.f32 %v1900_v61, %v1868_v39 }
0x1430   :  { %v1908_v1 = vmul.f32 %v2414_v58, %v1902_v0 }
0x1432   :  { %v1914_v2 = vadd.f32 %v2415_v62, %v1908_v1 }
0x1434   :  { %v1915_v3 = vpack.c.bf16 %v1914_v2, %v1913_v19 }
0x1436   :  { %2291 = vmatmul.msk.bf16.vlgmr.msrb.gmra.mxu2 %vm437_vm1, %v1915_v3 }
0x14b9   :  { %v1948_v8 = vpop.f32.mrf.mxu2 }
0x14ba   :  { %v1949_v33 = vadd.f32 %v2416_v9, %v1948_v8 }
0x14bc   :  { %v1953_v14 = vmax.f32 %v1949_v33, 0.0 }
0x14c1   :  { %v1950_v10 = vpop.f32.mrf.mxu2 }
0x14c2   :  { %v1951_v13 = vadd.f32 %v2416_v9, %v1950_v10 }
0x14c4   :  { %v1954_v15 = vmax.f32 %v1951_v13, 0.0 }
0x14c6   :  { %v1955_v16 = vpack.c.bf16 %v1954_v15, %v1953_v14 }
0x14c8   :  { %2308 = vmatmul.msk.bf16.vlgmr.msrb.gmra.mxu3 %vm1190_vm11, %v1955_v16 }
0x154b   :  { %v2004_v18 = vpop.f32.mrf.mxu3 }
0x154c   :  { %v2005_v22 = vadd.f32 %v2417_v17, %v2004_v18 }
0x154e   :  { %v2009_v23 = vadd.f32 %v2005_v22, %v1913_v19 }
0x1550   :  { %v2011_v24 = vsel %vm437_vm1, %v2009_v23, 0.0 }
0x1551   :  { %2012 = vadd.xlane.f32.xlu2 %v2011_v24 }
0x1553   :  { %v2006_v25 = vpop.f32.mrf.mxu3 }
0x1554   :  { %v2007_v27 = vadd.f32 %v2417_v17, %v2006_v25 }
0x1556   :  { %v2010_v29 = vadd.f32 %v2007_v27, %v1914_v2 }
0x1558   :  { %v2014_v30 = vsel %vm437_vm1, %v2010_v29, 0.0 }
0x1559   :  { %2015 = vadd.xlane.f32.xlu2 %v2014_v30 }
0x15c4   :  { %v2013_v31 = vpop.xlane.xlu2 %2012 }
0x15c5   :  { %v2017_v32 = vmul.f32 %v2013_v31, %v3394_v40 }
0x15c7   :  { %v2019_v34 = vsub.f32 %v2009_v23, %v2017_v32 }
0x15c9   :  { %v2021_v35 = vmul.f32 %v2019_v34, %v2019_v34 }
0x15cb   :  { %v2023_v36 = vsel %vm437_vm1, %v2021_v35, 0.0 }
0x15cc   :  { %2024 = vadd.xlane.f32.xlu2 %v2023_v36  ;;  %v2016_v37 = vpop.xlane.xlu2 %2015 }
0x15cd   :  { %v2018_v11 = vmul.f32 %v2016_v37, %v3394_v40  ;;  %v2420_v37 = vld [vmem:[#allocation2] ss:$0 sm:$0xff] }
0x15cf   :  { %v2020_v38 = vsub.f32 %v2010_v29, %v2018_v11 }
0x15d1   :  { %v2022_v39 = vmul.f32 %v2020_v38, %v2020_v38 }
0x15d3   :  { %v2026_v20 = vsel %vm437_vm1, %v2022_v39, 0.0 }
0x15d4   :  { %2027 = vadd.xlane.f32.xlu2 %v2026_v20 }
0x163f   :  { %v2025_v41 = vpop.xlane.xlu2 %2024 }
0x1640   :  { %v2029_v12 = vmul.f32 %v2025_v41, %v3394_v40 }
0x1642   :  { %v2031_v42 = vadd.f32 1e-05, %v2029_v12 }
0x1644   :  { %2499 = vrsqrt.f32 %v2031_v42  ;;  %vm2039_vm10 = vweird.f32 %v2031_v42 }
0x1647   :  { %v2028_v43 = vpop.xlane.xlu2 %2027 }
0x1648   :  { %v2030_v21 = vmul.f32 %v2028_v43, %v3394_v40 }
0x164a   :  { %v2500_v44 = vpop.eup %2499  ;;  %v2032_v45 = vadd.f32 1e-05, %v2030_v21 }
0x164b   :  { %v2034_v46 = vmul.f32 %v2500_v44, %v2031_v42  ;;  %vm2040_vm9 = vweird.f32 %v2500_v44 }
0x164c   :  { %2501 = vrsqrt.f32 %v2032_v45  ;;  %vm2041_vm11 = vmor %vm2039_vm10, %vm2040_vm9  ;;  %vm2049_vm13 = vweird.f32 %v2032_v45 }
0x164d   :  { %v2035_v47 = vmul.f32 %v2500_v44, %v2034_v46  ;;  %2503 = vrcp.f32 %v3019_v49 }
0x164f   :  { %v2036_v48 = vmul.f32 0.5, %v2035_v47 }
0x1651   :  { %v2037_v50 = vsub.f32 1.5, %v2036_v48 }
0x1652   :  { %v2502_v51 = vpop.eup %2501 }
0x1653   :  { %v2038_v52 = vmul.f32 %v2500_v44, %v2037_v50  ;;  %v2044_v53 = vmul.f32 %v2502_v51, %v2032_v45  ;;  %v2504_v58 = vpop.eup %2503  ;;  %vm2050_vm12 = vweird.f32 %v2502_v51 }
0x1654   :  { %v2082_v62 = vmul.f32 8.0, %v2504_v58  ;;  %vm2051_vm14 = vmor %vm2049_vm13, %vm2050_vm12  ;;  %vm2086_vm15 = vweird.f32 %v2504_v58 }
0x1655   :  { %v2042_v40 = vsel %vm2041_vm11, %v2500_v44, %v2038_v52  ;;  %v2045_v56 = vmul.f32 %v2502_v51, %v2044_v53 }
0x1656   :  { %v2053_v28 = vmul.f32 %v2042_v40, %v2019_v34  ;;  %v2083_v3 = vsub.f32 1.0, %v2082_v62 }
0x1657   :  { %v2046_v59 = vmul.f32 0.5, %v2045_v56 }
0x1658   :  { %v2059_v60 = vmul.f32 %v2418_v55, %v2053_v28  ;;  %v2084_v8 = vmul.f32 %v2504_v58, %v2083_v3 }
0x1659   :  { %v2047_v61 = vsub.f32 1.5, %v2046_v59 }
0x165a   :  { %v2065_v63 = vadd.f32 %v2419_v57, %v2059_v60  ;;  %v2085_v15 = vadd.f32 %v2504_v58, %v2084_v8 }
0x165b   :  { %v2048_v0 = vmul.f32 %v2502_v51, %v2047_v61 }
0x165c   :  { %v2067_v1 = vsel %vm437_vm1, %v2065_v63, 0.0  ;;  %v2087_v22 = vsel %vm2086_vm15, %v2504_v58, %v2085_v15 }
0x165d   :  { %v2068_v19 = vrot.slane %v2067_v1, 4  ;;  %v2052_v2 = vsel %vm2051_vm14, %v2502_v51, %v2048_v0 }
0x165e   :  { %v2054_v4 = vmul.f32 %v2052_v2, %v2020_v38 }
0x165f   :  { %v2069_v5 = vadd.f32 %v2068_v19, %v2067_v1 }
0x1660   :  { %v2060_v6 = vmul.f32 %v2418_v55, %v2054_v4 }
0x1661   :  { %v2070_v7 = vrot.slane %v2069_v5, 2 }
0x1662   :  { %v2066_v9 = vadd.f32 %v2419_v57, %v2060_v6 }
0x1663   :  { %v2071_v33 = vadd.f32 %v2070_v7, %v2069_v5 }
0x1664   :  { %v2074_v10 = vsel %vm437_vm1, %v2066_v9, 0.0 }
0x1665   :  { %v2072_v13 = vrot.slane %v2071_v33, 1  ;;  %v2075_v14 = vrot.slane %v2074_v10, 4 }
0x1667   :  { %v2076_v16 = vadd.f32 %v2075_v14, %v2074_v10  ;;  %v2073_v17 = vadd.f32 %v2072_v13, %v2071_v33 }
0x1669   :  { %v2077_v18 = vrot.slane %v2076_v16, 2  ;;  %v2088_v24 = vmul.f32 %v2087_v22, %v2073_v17 }
0x166b   :  { %v2078_v23 = vadd.f32 %v2077_v18, %v2076_v16  ;;  %v2090_v30 = vpack.c.bf16 %v2088_v24, %v2088_v24 }
0x166d   :  { %v2079_v25 = vrot.slane %v2078_v23, 1  ;;  %v2102_v32 = vunpack.c.l.b16 %v2090_v30 }
0x166f   :  { %v2080_v27 = vadd.f32 %v2079_v25, %v2078_v23 }
0x1671   :  { %v2089_v29 = vmul.f32 %v2087_v22, %v2080_v27 }
0x1673   :  { %v2091_v31 = vpack.c.bf16 %v2089_v29, %v2089_v29 }
0x1675   :  { %v2103_v34 = vunpack.c.l.b16 %v2091_v31 }
0x1677   :  { %v2105_v35 = vsel %vm2104_vm0, %v2103_v34, %v2102_v32 }
0x1678   :  { %v2106_v36 = vpack.c.b16 %v2105_v35, %v2105_v35 }
0x167a   :  { %2317 = vmatmul.msk.bf16.vlgmr.msra.gmra.mxu0 %vm437_vm1, %v2106_v36 }
0x16f7   :  { %v2131_v11 = vpop.f32.mrf.mxu0 }
0x16f8   :  { %v2132_v38 = vadd.f32 %v2420_v37, %v2131_v11 }
0x16fa   :  { %2136 = vst.msk [vmem:[%s3181_s9] sm:$0x3] %vm2135_vm4, %v2132_v38 }
0x16ff   :  { %v2133_v39 = vpop.f32.mrf.mxu0 }
0x1700   :  { %2141 = vsyncpa [#allocation4], 1 }
0x1701   :  { %2142 = vsyncpa [#allocation6], 1 }
0x1702   :  { %2143 = vsyncpa [#allocation9], 1 }
0x1703   :  { %2144 = vsyncpa [#allocation12], 1 }
0x1704   :  { %2145 = vsyncpa [#allocation15], 1 }
0x1705   :  { %2146 = vsyncpa [#allocation18], 1 }
0x1706   :  { %2147 = vsyncpa [#allocation21], 1 }
0x1707   :  { %2148 = vsyncpa [#allocation24], 1 }
0x1708   :  { %2149 = vsyncpa [#allocation27], 1 }
0x1709   :  { %2150 = vsyncpa [#allocation30], 1 }

</bundles_post_ra>
